<compile_context>
chip_gen: v6e
topology: v6e:2x2x1
jax: 0.10.0
libtpu: 0.0.40
codegen_flags: <defaults>
</compile_context>

<pallas_src>
import math

import jax
import jax.numpy as jnp
from jax import lax
from jax.experimental import pallas as pl
from jax.experimental.pallas import tpu as pltpu


# ----------------------------------------------------------------------------
# Fused stage kernel
# ----------------------------------------------------------------------------
def _make_stage_kernel(*, tl, length, c, use_halo, emit_cond, r_next, c_next,
                       cond_dtype, handoff_dtype, compute_dtype):
    """One fused decoder stage, (C, TL) tile with time on lanes.

    refs (in order):
      x      : (1, c, tl)        stage input (already interleaved ConvTranspose output)
      lh, rh : (1, c, 128)       left/right halo lane-blocks            [if use_halo]
      w1, w2 : (3, c, c)         k=3 conv weights, w[t] == torch weight[:, :, t]
      b1, b2 : (c, 1)
      alphas : (2,) SMEM         PReLU scalars
      wup    : (r_next*c_next, c)  next ConvTranspose, row j*c_next+o == weight[:, o, j]
      bup    : (c_next, 1)                                             [if r_next]
    outputs: cond (1, c, tl) [if emit_cond], y_next (1, c_next, tl*r_next) [if r_next]
    """
    n_chunk = tl // 128

    def dotc(a, b):
        return jnp.dot(a.astype(compute_dtype), b.astype(compute_dtype),
                       preferred_element_type=jnp.float32)

    def prelu(v, a):
        return jnp.where(v >= 0, v, a * v)

    def kernel(*refs):
        i = 0
        x_ref = refs[i]; i += 1
        if use_halo:
            lh_ref, rh_ref = refs[i], refs[i + 1]
            i += 2
        w1_ref, b1_ref, w2_ref, b2_ref, a_ref = refs[i:i + 5]
        i += 5
        if r_next:
            wup_ref, bup_ref = refs[i], refs[i + 1]
            i += 2
        outs = refs[i:]
        cond_ref = outs[0] if emit_cond else None
        ynext_ref = (outs[1] if emit_cond else outs[0]) if r_next else None

        t0 = pl.program_id(1) * tl
        lane = lax.broadcasted_iota(jnp.int32, (1, tl), 1)
        valid = (lane + t0) < length

        a1 = a_ref[0]
        a2 = a_ref[1]

        # Crop to `length` + the convs' zero 'same' padding, applied as an in-register
        # mask (no slicing / no crop copies between kernels).
        y = jnp.where(valid, x_ref[0].astype(jnp.float32), 0.0)            # (c, tl)

        # Single-column halos at t0-2, t0-1, t0+tl, t0+tl+1 (zeros at the sequence edge).
        if use_halo:
            yl1 = jnp.where(t0 >= 1, lh_ref[0, :, 127:128].astype(jnp.float32), 0.0)
            yl2 = jnp.where(t0 >= 2, lh_ref[0, :, 126:127].astype(jnp.float32), 0.0)
            yr1 = jnp.where(t0 + tl < length, rh_ref[0, :, 0:1].astype(jnp.float32), 0.0)
            yr2 = jnp.where(t0 + tl + 1 < length,
                            rh_ref[0, :, 1:2].astype(jnp.float32), 0.0)
        else:
            zc = jnp.zeros((c, 1), jnp.float32)
            yl1 = yl2 = yr1 = yr2 = zc

        # conv1: W0 @ h(t-1) + W1 @ h(t) + W2 @ h(t+1) + b1; taps via XLU lane rolls
        # (wrap lanes fixed from the halo columns) -> no concatenated LHS copies.
        h = prelu(y, a1)
        hl1, hl2 = prelu(yl1, a1), prelu(yl2, a1)
        hr1, hr2 = prelu(yr1, a1), prelu(yr2, a1)
        first = lane == 0
        last = lane == tl - 1
        h_m1 = jnp.where(first, hl1, pltpu.roll(h, shift=1, axis=1))
        h_p1 = jnp.where(last, hr1, pltpu.roll(h, shift=tl - 1, axis=1))

        w1_0, w1_1, w1_2 = w1_ref[0], w1_ref[1], w1_ref[2]
        b1 = b1_ref[...]
        c1 = dotc(w1_0, h_m1) + dotc(w1_1, h) + dotc(w1_2, h_p1) + b1
        g = jnp.where(valid, prelu(c1, a2), 0.0)

        # conv2 needs g at t0-1 / t0+tl too (tiny single-column dots).
        gl1 = jnp.where(
            t0 >= 1,
            prelu(dotc(w1_0, hl2) + dotc(w1_1, hl1) + dotc(w1_2, h[:, 0:1]) + b1, a2),
            0.0)
        gr1 = jnp.where(
            t0 + tl < length,
            prelu(dotc(w1_0, h[:, tl - 1:tl]) + dotc(w1_1, hr1) + dotc(w1_2, hr2) + b1,
                  a2),
            0.0)
        g_m1 = jnp.where(first, gl1, pltpu.roll(g, shift=1, axis=1))
        g_p1 = jnp.where(last, gr1, pltpu.roll(g, shift=tl - 1, axis=1))
        z = (dotc(w2_ref[0], g_m1) + dotc(w2_ref[1], g) + dotc(w2_ref[2], g_p1)
             + b2_ref[...])

        out = y + z                                                        # residual, f32

        if emit_cond:
            cond_ref[0] = out.astype(cond_dtype)

        if r_next:
            # Fused next-stage ConvTranspose1d(c -> c_next, kernel=r, stride=r):
            # P = Wup_flat @ out stacks the r phases on sublanes; constant 0/1 dilation
            # matrices route them to interleaved true-time order on the MXU, so the
            # handoff is stored lane-dense and the next stage reads it like a plain
            # (C, L) signal.
            wup = wup_ref[...]
            bup = bup_ref[...]
            out_cd = out.astype(compute_dtype)
            l_i = lax.broadcasted_iota(jnp.int32, (128, 128 * r_next), 0)
            t_i = lax.broadcasted_iota(jnp.int32, (128, 128 * r_next), 1)
            phase = t_i - l_i * r_next
            s_mats = [(phase == j).astype(compute_dtype) for j in range(r_next)]
            chunks = []
            for ci in range(n_chunk):
                oc = out_cd[:, ci * 128:(ci + 1) * 128]
                p_all = jnp.dot(wup, oc, preferred_element_type=jnp.float32)
                p_all = p_all.astype(compute_dtype)
                acc = None
                for j in range(r_next):
                    d = jnp.dot(p_all[j * c_next:(j + 1) * c_next, :], s_mats[j],
                                preferred_element_type=jnp.float32)
                    acc = d if acc is None else acc + d
                chunks.append(acc)
            ynext = chunks[0] if n_chunk == 1 else jnp.concatenate(chunks, axis=1)
            ynext_ref[0] = (ynext + bup).astype(handoff_dtype)

    return kernel


# ----------------------------------------------------------------------------
# Tile planning (VMEM-budgeted, TPU-generation aware)
# ----------------------------------------------------------------------------
def _vmem_capacity_bytes():
    try:
        return int(pltpu.get_tpu_info().vmem_capacity_bytes)
    except Exception:
        return 128 * 1024 * 1024


def _plan_tile(length, c, in_bytes, emit_cond, r_next, c_next, budget):
    """Largest time tile (multiple of 128 lanes) whose per-step working set fits budget."""
    max_m = max(1, -(-length // 128))
    best = 1
    for m in range(1, min(max_m, 64) + 1):
        tl = 128 * m
        est = 2 * tl * c * in_bytes + 4 * 128 * c * in_bytes      # streamed input + halos
        est += 10 * tl * c * 4                                    # in-kernel f32 temps
        est += 4 * 3 * c * c * 2                                  # conv weights
        if emit_cond:
            est += 2 * tl * c * 4                                 # cond output stream
        if r_next:
            est += 2 * tl * r_next * c_next * 2                   # handoff output stream
            est += 4 * 128 * r_next * c_next * 4                  # up-matmul temporaries
            est += 2 * r_next * r_next * 128 * 128                # dilation matrices
            est += 2 * r_next * c_next * c * 2                    # up weights
        if est <= budget:
            best = m
        else:
            break
    return 128 * best


# ----------------------------------------------------------------------------
# pallas_call wrapper for one fused stage
# ----------------------------------------------------------------------------
def _stage_call(y_in, *, length, tl, conv, up, emit_cond, out_lanes_next,
                compute_dtype, handoff_dtype, vmem_limit):
    B, c, lin = y_in.shape
    assert c % 8 == 0 and tl % 128 == 0 and lin % 128 == 0
    n_t = -(-length // tl)
    use_halo = n_t > 1
    blk = tl // 128
    max_blk = lin // 128 - 1
    r_next = int(up["r"]) if up is not None else 0
    c_next = int(up["c_out"]) if up is not None else 0

    kernel = _make_stage_kernel(
        tl=tl, length=length, c=c, use_halo=use_halo, emit_cond=emit_cond,
        r_next=r_next, c_next=c_next, cond_dtype=jnp.float32,
        handoff_dtype=handoff_dtype, compute_dtype=compute_dtype)

    in_specs = [pl.BlockSpec((1, c, tl), lambda b, j: (b, 0, j))]
    args = [y_in]
    if use_halo:
        in_specs.append(pl.BlockSpec(
            (1, c, 128), lambda b, j, k=blk: (b, 0, jnp.maximum(j * k - 1, 0))))
        in_specs.append(pl.BlockSpec(
            (1, c, 128),
            lambda b, j, k=blk, m=max_blk: (b, 0, jnp.minimum((j + 1) * k, m))))
        args += [y_in, y_in]
    in_specs += [
        pl.BlockSpec((3, c, c), lambda b, j: (0, 0, 0)),
        pl.BlockSpec((c, 1), lambda b, j: (0, 0)),
        pl.BlockSpec((3, c, c), lambda b, j: (0, 0, 0)),
        pl.BlockSpec((c, 1), lambda b, j: (0, 0)),
        pl.BlockSpec(memory_space=pltpu.MemorySpace.SMEM),
    ]
    args += [conv["w1"].astype(compute_dtype), conv["b1"],
             conv["w2"].astype(compute_dtype), conv["b2"], conv["alphas"]]

    out_shape, out_specs = [], []
    if emit_cond:
        out_shape.append(jax.ShapeDtypeStruct((B, c, n_t * tl), jnp.float32))
        out_specs.append(pl.BlockSpec((1, c, tl), lambda b, j: (b, 0, j)))
    if up is not None:
        in_specs += [
            pl.BlockSpec((r_next * c_next, c), lambda b, j: (0, 0)),
            pl.BlockSpec((c_next, 1), lambda b, j: (0, 0)),
        ]
        args += [up["w_up"].astype(compute_dtype), up["b_up"]]
        lanes = max(n_t * tl * r_next, out_lanes_next)
        out_shape.append(jax.ShapeDtypeStruct((B, c_next, lanes), handoff_dtype))
        out_specs.append(pl.BlockSpec((1, c_next, tl * r_next), lambda b, j: (b, 0, j)))

    res = pl.pallas_call(
        kernel,
        out_shape=tuple(out_shape),
        grid=(B, n_t),
        in_specs=in_specs,
        out_specs=tuple(out_specs),
        compiler_params=pltpu.CompilerParams(
            dimension_semantics=("parallel", "parallel"),
            vmem_limit_bytes=vmem_limit),
    )(*args)
    if not isinstance(res, (tuple, list)):
        res = (res,)
    return tuple(res)


# ----------------------------------------------------------------------------
# ConditionerDecoder.forward  (Pallas path)
# ----------------------------------------------------------------------------
def conditioner_decoder_forward(params, x, lengths, *,
                                compute_dtype=jnp.bfloat16,
                                handoff_dtype=jnp.bfloat16):
    """x: (B, 2*n_channels[0], L0) float32 in PyTorch NCL layout; lengths: python ints."""
    B, c0, l0 = x.shape
    ups = params["ups"]
    assert len(lengths) == len(ups)

    vmem = _vmem_capacity_bytes()
    budget = min(max(vmem // 6, 4 << 20), 24 << 20)     # v7x (64 MiB VMEM) gets ~10 MiB
    vmem_limit = int(min(vmem // 2, 96 << 20))

    n = len(ups)
    stage_len = [l0] + list(lengths)
    stage_c = [c0] + [int(p["c_out"]) for p in ups]
    for k in range(1, n + 1):
        assert stage_len[k] <= stage_len[k - 1] * int(ups[k - 1]["r"]), \
            "target length exceeds upsampled length"
    in_bytes = [4] + [jnp.dtype(handoff_dtype).itemsize] * n

    tls, n_ts = [], []
    for k in range(n + 1):
        r_nx = int(ups[k]["r"]) if k < n else 0
        c_nx = int(ups[k]["c_out"]) if k < n else 0
        tl = _plan_tile(stage_len[k], stage_c[k], in_bytes[k],
                        emit_cond=(k > 0), r_next=r_nx, c_next=c_nx, budget=budget)
        tls.append(tl)
        n_ts.append(-(-stage_len[k] // tl))

    # Zero-pad the decoder input so every stage-0 block is fully in bounds.
    lpad0 = n_ts[0] * tls[0]
    if l0 < lpad0:
        x = jnp.pad(x, ((0, 0), (0, 0), (0, lpad0 - l0)))
    # TODO(synk): when B == 1 and a stage collapses to a single tile, split the time axis
    #             so the grid stays >= 2-wide for v7x's two TensorCores.

    cur = x
    conditions = []
    for k in range(n + 1):
        emit_cond = k > 0
        up = ups[k] if k < n else None
        conv = params["input"] if k == 0 else ups[k - 1]
        out_lanes_next = n_ts[k + 1] * tls[k + 1] if k < n else 0
        outs = _stage_call(cur, length=stage_len[k], tl=tls[k], conv=conv, up=up,
                           emit_cond=emit_cond, out_lanes_next=out_lanes_next,
                           compute_dtype=compute_dtype, handoff_dtype=handoff_dtype,
                           vmem_limit=vmem_limit)
        oi = 0
        if emit_cond:
            # TODO(synk): cond == ConvBlock output (3rd return value of ConvBlock) assumed.
            conditions.append(outs[oi][:, :, :stage_len[k]])
            oi += 1
        if up is not None:
            cur = outs[oi]
    return conditions[-1], conditions


# ----------------------------------------------------------------------------
# Parameter init (deterministic, synthetic; layouts match converted torch weights)
# ----------------------------------------------------------------------------
def _uniform(key, shape, scale):
    return jax.random.uniform(key, shape, jnp.float32, -scale, scale)


def init_conv_block_params(key, c):
    k1, k2, k3, k4 = jax.random.split(key, 4)
    s = 1.0 / math.sqrt(3 * c)
    return dict(
        w1=_uniform(k1, (3, c, c), s),     # w1[t] == torch Conv1d.weight[:, :, t]
        b1=_uniform(k2, (c, 1), s),
        w2=_uniform(k3, (3, c, c), s),
        b2=_uniform(k4, (c, 1), s),
        alphas=jnp.array([0.25, 0.25], jnp.float32),     # PReLU default init
    )


def init_up_block_params(key, c_out, r):
    ku, kb, kc = jax.random.split(key, 3)
    c_in = 2 * c_out
    s = 1.0 / math.sqrt(c_in * r)
    p = dict(
        c_out=c_out,
        r=r,
        # w_up[j*c_out + o, cin] == torch ConvTranspose1d.weight[cin, o, j]
        w_up=_uniform(ku, (r * c_out, c_in), s),
        # per-output-channel bias (broadcast across phases == real ConvTranspose bias)
        b_up=_uniform(kb, (c_out, 1), s),
    )
    p.update(init_conv_block_params(kc, c_out))
    return p


def init_conditioner_decoder_params(key, up_factors, input_channels):
    n_up = len(up_factors)
    n_channels = [input_channels * 2 ** (n_up - i - 1) for i in range(n_up)]
    keys = jax.random.split(key, n_up + 1)
    return dict(
        input=init_conv_block_params(keys[0], n_channels[0] * 2),
        ups=[init_up_block_params(keys[i + 1], c, r)
             for i, (c, r) in enumerate(zip(n_channels, up_factors))],
    )
    # TODO(synk): with_extra_conv_block / weight-norm / antialiasing branches not
    #             implemented (all off in the configuration exercised here).


# ----------------------------------------------------------------------------
# Pure-JAX reference (same semantics) for correctness check
# ----------------------------------------------------------------------------
def _prelu_ref(x, a):
    return jnp.where(x >= 0, x, a * x)


def _conv3_same_ref(h, w, b):
    zero = jnp.zeros_like(h[:, :, :1])
    hm = jnp.concatenate([zero, h[:, :, :-1]], axis=2)
    hp = jnp.concatenate([h[:, :, 1:], zero], axis=2)
    return (jnp.einsum("oc,bcl->bol", w[0], hm)
            + jnp.einsum("oc,bcl->bol", w[1], h)
            + jnp.einsum("oc,bcl->bol", w[2], hp) + b)


def _conv_block_ref(x, p):
    h = _prelu_ref(x, p["alphas"][0])
    y = _conv3_same_ref(h, p["w1"], p["b1"])
    g = _prelu_ref(y, p["alphas"][1])
    return x + _conv3_same_ref(g, p["w2"], p["b2"])


def conditioner_decoder_ref(params, x, lengths):
    x = _conv_block_ref(x, params["input"])
    conds = []
    for p, length in zip(params["ups"], lengths):
        B, C, L = x.shape
        r, cn = int(p["r"]), int(p["c_out"])
        u = jnp.einsum("kc,bcl->bkl", p["w_up"], x)                  # (B, r*cn, L)
        u = u.reshape(B, r, cn, L).transpose(0, 2, 3, 1).reshape(B, cn, L * r)
        u = u + p["b_up"]
        y = u[:, :, :length]
        x = _conv_block_ref(y, p)
        conds.append(x)
    return x, conds


# ----------------------------------------------------------------------------
if __name__ == "__main__":
    key = jax.random.PRNGKey(0)
    k_param, k_x = jax.random.split(key)

    up_factors = (4, 2)             # decoder = rate_factors[::-1] of the full network
    input_channels = 8
    B, L0 = 2, 24
    c0 = input_channels * 2 ** len(up_factors)   # = 2 * n_channels[0] = 32
    lengths = [94, 187]             # crop targets (exercise crop mask + partial tiles)

    params = init_conditioner_decoder_params(k_param, up_factors, input_channels)
    x = jax.random.normal(k_x, (B, c0, L0), jnp.float32)   # (B, C, L), as in PyTorch

    out_ref, conds_ref = conditioner_decoder_ref(params, x, lengths)

    # f32 path: tight check of the fused-kernel math.
    fwd32 = jax.jit(lambda xx: conditioner_decoder_forward(
        params, xx, lengths, compute_dtype=jnp.float32, handoff_dtype=jnp.float32))
    out32, conds32 = fwd32(x)
    out32 = jax.block_until_ready(out32)

    # bf16 MXU operands + bf16 inter-stage handoff: the default performance path.
    fwd16 = jax.jit(lambda xx: conditioner_decoder_forward(params, xx, lengths))
    out16, conds16 = fwd16(x)
    out16 = jax.block_until_ready(out16)
    conds16 = [jax.block_until_ready(cc) for cc in conds16]

    assert out16.shape == (B, input_channels, lengths[-1]), out16.shape
    assert [cc.shape for cc in conds16] == [(B, 16, lengths[0]), (B, 8, lengths[1])], \
        [cc.shape for cc in conds16]

    def check(got, want, tol, name):
        err = float(jnp.max(jnp.abs(got - want)))
        assert bool(jnp.allclose(got, want, rtol=tol, atol=tol)), (name, err)

    check(out32, out_ref, 1e-4, "out_f32")
    for i, (cc, cr) in enumerate(zip(conds32, conds_ref)):
        check(cc, cr, 1e-4, f"cond{i}_f32")
    check(out16, out_ref, 5e-2, "out_bf16")
    for i, (cc, cr) in enumerate(zip(conds16, conds_ref)):
        check(cc, cr, 5e-2, f"cond{i}_bf16")

    print("KERNEL_OK")
</pallas_src>

<mosaic_0001>
module attributes {stable_mosaic.version = 11 : i64} {
  func.func @kernel(%arg0: i32, %arg1: i32, %arg2: memref<1x32x128xf32, #tpu.memory_space<vmem>>, %arg3: memref<3x32x32xf32, #tpu.memory_space<vmem>>, %arg4: memref<32x1xf32, #tpu.memory_space<vmem>>, %arg5: memref<3x32x32xf32, #tpu.memory_space<vmem>>, %arg6: memref<32x1xf32, #tpu.memory_space<vmem>>, %arg7: memref<2xf32, #tpu.memory_space<smem>>, %arg8: memref<64x32xf32, #tpu.memory_space<vmem>>, %arg9: memref<16x1xf32, #tpu.memory_space<vmem>>, %arg10: memref<1x16x512xf32, #tpu.memory_space<vmem>>) attributes {dimension_semantics = [#tpu.dimension_semantics<parallel>, #tpu.dimension_semantics<parallel>], iteration_bounds = array<i64: 2, 1>, scalar_prefetch = 0 : i64, scratch_operands = 0 : i64, tpu.core_type = #tpu.core_type<tc>, window_params = [{transform_indices = @transform_0, window_bounds = array<i64: 1, 32, 128>}, {pipeline_mode = #tpu.pipeline_mode<synchronous>, transform_indices = @transform_1, window_bounds = array<i64: 3, 32, 32>}, {pipeline_mode = #tpu.pipeline_mode<synchronous>, transform_indices = @transform_2, window_bounds = array<i64: 32, 1>}, {pipeline_mode = #tpu.pipeline_mode<synchronous>, transform_indices = @transform_3, window_bounds = array<i64: 3, 32, 32>}, {pipeline_mode = #tpu.pipeline_mode<synchronous>, transform_indices = @transform_4, window_bounds = array<i64: 32, 1>}, {transform_indices = @transform_5, window_bounds = array<i64: 2>}, {pipeline_mode = #tpu.pipeline_mode<synchronous>, transform_indices = @transform_6, window_bounds = array<i64: 64, 32>}, {pipeline_mode = #tpu.pipeline_mode<synchronous>, transform_indices = @transform_7, window_bounds = array<i64: 16, 1>}, {transform_indices = @transform_8, window_bounds = array<i64: 1, 16, 512>}]} {
    %c128_i32 = arith.constant 128 : i32
    %0 = arith.muli %arg1, %c128_i32 : i32
    %1 = tpu.iota {dimensions = array<i32: 1>} : vector<1x128xi32>
    %2 = vector.broadcast %0 : i32 to vector<1x128xi32>
    %3 = arith.addi %1, %2 : vector<1x128xi32>
    %c24_i32 = arith.constant 24 : i32
    %4 = vector.broadcast %c24_i32 : i32 to vector<1x128xi32>
    %5 = arith.cmpi slt, %3, %4 : vector<1x128xi32>
    %c0 = arith.constant 0 : index
    %6 = memref.load %arg7[%c0] : memref<2xf32, #tpu.memory_space<smem>>
    %c1 = arith.constant 1 : index
    %7 = memref.load %arg7[%c1] : memref<2xf32, #tpu.memory_space<smem>>
    %c0_0 = arith.constant 0 : index
    %c0_1 = arith.constant 0 : index
    %c0_2 = arith.constant 0 : index
    %8 = vector.load %arg2[%c0_0, %c0_1, %c0_2] : memref<1x32x128xf32, #tpu.memory_space<vmem>>, vector<1x32x128xf32>
    %9 = vector.shape_cast %8 : vector<1x32x128xf32> to vector<32x128xf32>
    %cst = arith.constant 0.000000e+00 : f32
    %10 = vector.shape_cast %5 : vector<1x128xi1> to vector<1x128xi1>
    %11 = vector.broadcast %10 : vector<1x128xi1> to vector<32x128xi1>
    %12 = vector.broadcast %cst : f32 to vector<32x128xf32>
    %13 = arith.select %11, %9, %12 : vector<32x128xi1>, vector<32x128xf32>
    %cst_3 = arith.constant 0.000000e+00 : f32
    %14 = vector.broadcast %cst_3 : f32 to vector<32x1xf32>
    %cst_4 = arith.constant 0.000000e+00 : f32
    %15 = vector.broadcast %cst_4 : f32 to vector<32x128xf32>
    %16 = arith.cmpf oge, %13, %15 : vector<32x128xf32>
    %17 = vector.broadcast %6 : f32 to vector<32x128xf32>
    %18 = arith.mulf %17, %13 : vector<32x128xf32>
    %19 = arith.select %16, %13, %18 : vector<32x128xi1>, vector<32x128xf32>
    %cst_5 = arith.constant 0.000000e+00 : f32
    %20 = vector.broadcast %cst_5 : f32 to vector<32x1xf32>
    %21 = arith.cmpf oge, %14, %20 : vector<32x1xf32>
    %22 = vector.broadcast %6 : f32 to vector<32x1xf32>
    %23 = arith.mulf %22, %14 : vector<32x1xf32>
    %24 = arith.select %21, %14, %23 : vector<32x1xi1>, vector<32x1xf32>
    %cst_6 = arith.constant 0.000000e+00 : f32
    %25 = vector.broadcast %cst_6 : f32 to vector<32x1xf32>
    %26 = arith.cmpf oge, %14, %25 : vector<32x1xf32>
    %27 = vector.broadcast %6 : f32 to vector<32x1xf32>
    %28 = arith.mulf %27, %14 : vector<32x1xf32>
    %29 = arith.select %26, %14, %28 : vector<32x1xi1>, vector<32x1xf32>
    %cst_7 = arith.constant 0.000000e+00 : f32
    %30 = vector.broadcast %cst_7 : f32 to vector<32x1xf32>
    %31 = arith.cmpf oge, %14, %30 : vector<32x1xf32>
    %32 = vector.broadcast %6 : f32 to vector<32x1xf32>
    %33 = arith.mulf %32, %14 : vector<32x1xf32>
    %34 = arith.select %31, %14, %33 : vector<32x1xi1>, vector<32x1xf32>
    %cst_8 = arith.constant 0.000000e+00 : f32
    %35 = vector.broadcast %cst_8 : f32 to vector<32x1xf32>
    %36 = arith.cmpf oge, %14, %35 : vector<32x1xf32>
    %37 = vector.broadcast %6 : f32 to vector<32x1xf32>
    %38 = arith.mulf %37, %14 : vector<32x1xf32>
    %39 = arith.select %36, %14, %38 : vector<32x1xi1>, vector<32x1xf32>
    %c0_i32 = arith.constant 0 : i32
    %40 = vector.broadcast %c0_i32 : i32 to vector<1x128xi32>
    %41 = arith.cmpi eq, %1, %40 : vector<1x128xi32>
    %c127_i32 = arith.constant 127 : i32
    %42 = vector.broadcast %c127_i32 : i32 to vector<1x128xi32>
    %43 = arith.cmpi eq, %1, %42 : vector<1x128xi32>
    %c1_i32 = arith.constant 1 : i32
    %44 = tpu.dynamic_rotate %19 by %c1_i32 dim 1 : vector<32x128xf32>, i32 -> vector<32x128xf32>
    %45 = vector.shape_cast %41 : vector<1x128xi1> to vector<1x128xi1>
    %46 = vector.broadcast %45 : vector<1x128xi1> to vector<32x128xi1>
    %47 = vector.shape_cast %24 : vector<32x1xf32> to vector<32x1xf32>
    %48 = vector.broadcast %47 : vector<32x1xf32> to vector<32x128xf32>
    %49 = arith.select %46, %48, %44 : vector<32x128xi1>, vector<32x128xf32>
    %c127_i32_9 = arith.constant 127 : i32
    %50 = tpu.dynamic_rotate %19 by %c127_i32_9 dim 1 : vector<32x128xf32>, i32 -> vector<32x128xf32>
    %51 = vector.shape_cast %43 : vector<1x128xi1> to vector<1x128xi1>
    %52 = vector.broadcast %51 : vector<1x128xi1> to vector<32x128xi1>
    %53 = vector.shape_cast %34 : vector<32x1xf32> to vector<32x1xf32>
    %54 = vector.broadcast %53 : vector<32x1xf32> to vector<32x128xf32>
    %55 = arith.select %52, %54, %50 : vector<32x128xi1>, vector<32x128xf32>
    %c0_10 = arith.constant 0 : index
    %c0_11 = arith.constant 0 : index
    %c0_12 = arith.constant 0 : index
    %56 = vector.load %arg3[%c0_10, %c0_11, %c0_12] : memref<3x32x32xf32, #tpu.memory_space<vmem>>, vector<1x32x32xf32>
    %57 = vector.shape_cast %56 : vector<1x32x32xf32> to vector<32x32xf32>
    %c1_13 = arith.constant 1 : index
    %c0_14 = arith.constant 0 : index
    %c0_15 = arith.constant 0 : index
    %58 = vector.load %arg3[%c1_13, %c0_14, %c0_15] : memref<3x32x32xf32, #tpu.memory_space<vmem>>, vector<1x32x32xf32>
    %59 = vector.shape_cast %58 : vector<1x32x32xf32> to vector<32x32xf32>
    %c2 = arith.constant 2 : index
    %c0_16 = arith.constant 0 : index
    %c0_17 = arith.constant 0 : index
    %60 = vector.load %arg3[%c2, %c0_16, %c0_17] : memref<3x32x32xf32, #tpu.memory_space<vmem>>, vector<1x32x32xf32>
    %61 = vector.shape_cast %60 : vector<1x32x32xf32> to vector<32x32xf32>
    %c0_18 = arith.constant 0 : index
    %c0_19 = arith.constant 0 : index
    %62 = vector.load %arg4[%c0_18, %c0_19] : memref<32x1xf32, #tpu.memory_space<vmem>>, vector<32x1xf32>
    %cst_20 = arith.constant dense<0.000000e+00> : vector<32x128xf32>
    %63 = tpu.matmul %57, %49, %cst_20 {dimension_numbers = #tpu.dot_dimension_numbers<[1], [0], [0], [1], [0, 0, 1, 1], [], []>} : vector<32x32xf32>, vector<32x128xf32>, vector<32x128xf32> -> vector<32x128xf32>
    %cst_21 = arith.constant dense<0.000000e+00> : vector<32x128xf32>
    %64 = tpu.matmul %59, %19, %cst_21 {dimension_numbers = #tpu.dot_dimension_numbers<[1], [0], [0], [1], [0, 0, 1, 1], [], []>} : vector<32x32xf32>, vector<32x128xf32>, vector<32x128xf32> -> vector<32x128xf32>
    %65 = arith.addf %63, %64 : vector<32x128xf32>
    %cst_22 = arith.constant dense<0.000000e+00> : vector<32x128xf32>
    %66 = tpu.matmul %61, %55, %cst_22 {dimension_numbers = #tpu.dot_dimension_numbers<[1], [0], [0], [1], [0, 0, 1, 1], [], []>} : vector<32x32xf32>, vector<32x128xf32>, vector<32x128xf32> -> vector<32x128xf32>
    %67 = arith.addf %65, %66 : vector<32x128xf32>
    %68 = vector.broadcast %62 : vector<32x1xf32> to vector<32x128xf32>
    %69 = arith.addf %67, %68 : vector<32x128xf32>
    %cst_23 = arith.constant 0.000000e+00 : f32
    %70 = vector.broadcast %cst_23 : f32 to vector<32x128xf32>
    %71 = arith.cmpf oge, %69, %70 : vector<32x128xf32>
    %72 = vector.broadcast %7 : f32 to vector<32x128xf32>
    %73 = arith.mulf %72, %69 : vector<32x128xf32>
    %74 = arith.select %71, %69, %73 : vector<32x128xi1>, vector<32x128xf32>
    %cst_24 = arith.constant 0.000000e+00 : f32
    %75 = vector.shape_cast %5 : vector<1x128xi1> to vector<1x128xi1>
    %76 = vector.broadcast %75 : vector<1x128xi1> to vector<32x128xi1>
    %77 = vector.broadcast %cst_24 : f32 to vector<32x128xf32>
    %78 = arith.select %76, %74, %77 : vector<32x128xi1>, vector<32x128xf32>
    %c1_i32_25 = arith.constant 1 : i32
    %79 = arith.cmpi sge, %0, %c1_i32_25 : i32
    %cst_26 = arith.constant dense<0.000000e+00> : vector<32x1xf32>
    %80 = tpu.matmul %57, %29, %cst_26 {dimension_numbers = #tpu.dot_dimension_numbers<[1], [0], [0], [1], [0, 0, 1, 1], [], []>} : vector<32x32xf32>, vector<32x1xf32>, vector<32x1xf32> -> vector<32x1xf32>
    %cst_27 = arith.constant dense<0.000000e+00> : vector<32x1xf32>
    %81 = tpu.matmul %59, %24, %cst_27 {dimension_numbers = #tpu.dot_dimension_numbers<[1], [0], [0], [1], [0, 0, 1, 1], [], []>} : vector<32x32xf32>, vector<32x1xf32>, vector<32x1xf32> -> vector<32x1xf32>
    %82 = arith.addf %80, %81 : vector<32x1xf32>
    %83 = vector.extract_strided_slice %19 {offsets = [0, 0], sizes = [32, 1], strides = [1, 1]} : vector<32x128xf32> to vector<32x1xf32>
    %cst_28 = arith.constant dense<0.000000e+00> : vector<32x1xf32>
    %84 = tpu.matmul %61, %83, %cst_28 {dimension_numbers = #tpu.dot_dimension_numbers<[1], [0], [0], [1], [0, 0, 1, 1], [], []>} : vector<32x32xf32>, vector<32x1xf32>, vector<32x1xf32> -> vector<32x1xf32>
    %85 = arith.addf %82, %84 : vector<32x1xf32>
    %86 = arith.addf %85, %62 : vector<32x1xf32>
    %cst_29 = arith.constant 0.000000e+00 : f32
    %87 = vector.broadcast %cst_29 : f32 to vector<32x1xf32>
    %88 = arith.cmpf oge, %86, %87 : vector<32x1xf32>
    %89 = vector.broadcast %7 : f32 to vector<32x1xf32>
    %90 = arith.mulf %89, %86 : vector<32x1xf32>
    %91 = arith.select %88, %86, %90 : vector<32x1xi1>, vector<32x1xf32>
    %cst_30 = arith.constant 0.000000e+00 : f32
    %92 = vector.broadcast %cst_30 : f32 to vector<32x1xf32>
    %93 = arith.select %79, %91, %92 : vector<32x1xf32>
    %c128_i32_31 = arith.constant 128 : i32
    %94 = arith.addi %0, %c128_i32_31 : i32
    %c24_i32_32 = arith.constant 24 : i32
    %95 = arith.cmpi slt, %94, %c24_i32_32 : i32
    %96 = vector.extract_strided_slice %19 {offsets = [0, 127], sizes = [32, 1], strides = [1, 1]} : vector<32x128xf32> to vector<32x1xf32>
    %cst_33 = arith.constant dense<0.000000e+00> : vector<32x1xf32>
    %97 = tpu.matmul %57, %96, %cst_33 {dimension_numbers = #tpu.dot_dimension_numbers<[1], [0], [0], [1], [0, 0, 1, 1], [], []>} : vector<32x32xf32>, vector<32x1xf32>, vector<32x1xf32> -> vector<32x1xf32>
    %cst_34 = arith.constant dense<0.000000e+00> : vector<32x1xf32>
    %98 = tpu.matmul %59, %34, %cst_34 {dimension_numbers = #tpu.dot_dimension_numbers<[1], [0], [0], [1], [0, 0, 1, 1], [], []>} : vector<32x32xf32>, vector<32x1xf32>, vector<32x1xf32> -> vector<32x1xf32>
    %99 = arith.addf %97, %98 : vector<32x1xf32>
    %cst_35 = arith.constant dense<0.000000e+00> : vector<32x1xf32>
    %100 = tpu.matmul %61, %39, %cst_35 {dimension_numbers = #tpu.dot_dimension_numbers<[1], [0], [0], [1], [0, 0, 1, 1], [], []>} : vector<32x32xf32>, vector<32x1xf32>, vector<32x1xf32> -> vector<32x1xf32>
    %101 = arith.addf %99, %100 : vector<32x1xf32>
    %102 = arith.addf %101, %62 : vector<32x1xf32>
    %cst_36 = arith.constant 0.000000e+00 : f32
    %103 = vector.broadcast %cst_36 : f32 to vector<32x1xf32>
    %104 = arith.cmpf oge, %102, %103 : vector<32x1xf32>
    %105 = vector.broadcast %7 : f32 to vector<32x1xf32>
    %106 = arith.mulf %105, %102 : vector<32x1xf32>
    %107 = arith.select %104, %102, %106 : vector<32x1xi1>, vector<32x1xf32>
    %cst_37 = arith.constant 0.000000e+00 : f32
    %108 = vector.broadcast %cst_37 : f32 to vector<32x1xf32>
    %109 = arith.select %95, %107, %108 : vector<32x1xf32>
    %c1_i32_38 = arith.constant 1 : i32
    %110 = tpu.dynamic_rotate %78 by %c1_i32_38 dim 1 : vector<32x128xf32>, i32 -> vector<32x128xf32>
    %111 = vector.shape_cast %41 : vector<1x128xi1> to vector<1x128xi1>
    %112 = vector.broadcast %111 : vector<1x128xi1> to vector<32x128xi1>
    %113 = vector.shape_cast %93 : vector<32x1xf32> to vector<32x1xf32>
    %114 = vector.broadcast %113 : vector<32x1xf32> to vector<32x128xf32>
    %115 = arith.select %112, %114, %110 : vector<32x128xi1>, vector<32x128xf32>
    %c127_i32_39 = arith.constant 127 : i32
    %116 = tpu.dynamic_rotate %78 by %c127_i32_39 dim 1 : vector<32x128xf32>, i32 -> vector<32x128xf32>
    %117 = vector.shape_cast %43 : vector<1x128xi1> to vector<1x128xi1>
    %118 = vector.broadcast %117 : vector<1x128xi1> to vector<32x128xi1>
    %119 = vector.shape_cast %109 : vector<32x1xf32> to vector<32x1xf32>
    %120 = vector.broadcast %119 : vector<32x1xf32> to vector<32x128xf32>
    %121 = arith.select %118, %120, %116 : vector<32x128xi1>, vector<32x128xf32>
    %c0_40 = arith.constant 0 : index
    %c0_41 = arith.constant 0 : index
    %c0_42 = arith.constant 0 : index
    %122 = vector.load %arg5[%c0_40, %c0_41, %c0_42] : memref<3x32x32xf32, #tpu.memory_space<vmem>>, vector<1x32x32xf32>
    %123 = vector.shape_cast %122 : vector<1x32x32xf32> to vector<32x32xf32>
    %cst_43 = arith.constant dense<0.000000e+00> : vector<32x128xf32>
    %124 = tpu.matmul %123, %115, %cst_43 {dimension_numbers = #tpu.dot_dimension_numbers<[1], [0], [0], [1], [0, 0, 1, 1], [], []>} : vector<32x32xf32>, vector<32x128xf32>, vector<32x128xf32> -> vector<32x128xf32>
    %c1_44 = arith.constant 1 : index
    %c0_45 = arith.constant 0 : index
    %c0_46 = arith.constant 0 : index
    %125 = vector.load %arg5[%c1_44, %c0_45, %c0_46] : memref<3x32x32xf32, #tpu.memory_space<vmem>>, vector<1x32x32xf32>
    %126 = vector.shape_cast %125 : vector<1x32x32xf32> to vector<32x32xf32>
    %cst_47 = arith.constant dense<0.000000e+00> : vector<32x128xf32>
    %127 = tpu.matmul %126, %78, %cst_47 {dimension_numbers = #tpu.dot_dimension_numbers<[1], [0], [0], [1], [0, 0, 1, 1], [], []>} : vector<32x32xf32>, vector<32x128xf32>, vector<32x128xf32> -> vector<32x128xf32>
    %128 = arith.addf %124, %127 : vector<32x128xf32>
    %c2_48 = arith.constant 2 : index
    %c0_49 = arith.constant 0 : index
    %c0_50 = arith.constant 0 : index
    %129 = vector.load %arg5[%c2_48, %c0_49, %c0_50] : memref<3x32x32xf32, #tpu.memory_space<vmem>>, vector<1x32x32xf32>
    %130 = vector.shape_cast %129 : vector<1x32x32xf32> to vector<32x32xf32>
    %cst_51 = arith.constant dense<0.000000e+00> : vector<32x128xf32>
    %131 = tpu.matmul %130, %121, %cst_51 {dimension_numbers = #tpu.dot_dimension_numbers<[1], [0], [0], [1], [0, 0, 1, 1], [], []>} : vector<32x32xf32>, vector<32x128xf32>, vector<32x128xf32> -> vector<32x128xf32>
    %132 = arith.addf %128, %131 : vector<32x128xf32>
    %c0_52 = arith.constant 0 : index
    %c0_53 = arith.constant 0 : index
    %133 = vector.load %arg6[%c0_52, %c0_53] : memref<32x1xf32, #tpu.memory_space<vmem>>, vector<32x1xf32>
    %134 = vector.broadcast %133 : vector<32x1xf32> to vector<32x128xf32>
    %135 = arith.addf %132, %134 : vector<32x128xf32>
    %136 = arith.addf %13, %135 : vector<32x128xf32>
    %c0_54 = arith.constant 0 : index
    %c0_55 = arith.constant 0 : index
    %137 = vector.load %arg8[%c0_54, %c0_55] : memref<64x32xf32, #tpu.memory_space<vmem>>, vector<64x32xf32>
    %c0_56 = arith.constant 0 : index
    %c0_57 = arith.constant 0 : index
    %138 = vector.load %arg9[%c0_56, %c0_57] : memref<16x1xf32, #tpu.memory_space<vmem>>, vector<16x1xf32>
    %139 = tpu.iota {dimensions = array<i32: 0>} : vector<128x512xi32>
    %140 = tpu.iota {dimensions = array<i32: 1>} : vector<128x512xi32>
    %c4_i32 = arith.constant 4 : i32
    %141 = vector.broadcast %c4_i32 : i32 to vector<128x512xi32>
    %142 = arith.muli %139, %141 : vector<128x512xi32>
    %143 = arith.subi %140, %142 : vector<128x512xi32>
    %c0_i32_58 = arith.constant 0 : i32
    %144 = vector.broadcast %c0_i32_58 : i32 to vector<128x512xi32>
    %145 = arith.cmpi eq, %143, %144 : vector<128x512xi32>
    %146 = arith.extui %145 : vector<128x512xi1> to vector<128x512xi32>
    %147 = arith.sitofp %146 : vector<128x512xi32> to vector<128x512xf32>
    %c1_i32_59 = arith.constant 1 : i32
    %148 = vector.broadcast %c1_i32_59 : i32 to vector<128x512xi32>
    %149 = arith.cmpi eq, %143, %148 : vector<128x512xi32>
    %150 = arith.extui %149 : vector<128x512xi1> to vector<128x512xi32>
    %151 = arith.sitofp %150 : vector<128x512xi32> to vector<128x512xf32>
    %c2_i32 = arith.constant 2 : i32
    %152 = vector.broadcast %c2_i32 : i32 to vector<128x512xi32>
    %153 = arith.cmpi eq, %143, %152 : vector<128x512xi32>
    %154 = arith.extui %153 : vector<128x512xi1> to vector<128x512xi32>
    %155 = arith.sitofp %154 : vector<128x512xi32> to vector<128x512xf32>
    %c3_i32 = arith.constant 3 : i32
    %156 = vector.broadcast %c3_i32 : i32 to vector<128x512xi32>
    %157 = arith.cmpi eq, %143, %156 : vector<128x512xi32>
    %158 = arith.extui %157 : vector<128x512xi1> to vector<128x512xi32>
    %159 = arith.sitofp %158 : vector<128x512xi32> to vector<128x512xf32>
    %cst_60 = arith.constant dense<0.000000e+00> : vector<64x128xf32>
    %160 = tpu.matmul %137, %136, %cst_60 {dimension_numbers = #tpu.dot_dimension_numbers<[1], [0], [0], [1], [0, 0, 1, 1], [], []>} : vector<64x32xf32>, vector<32x128xf32>, vector<64x128xf32> -> vector<64x128xf32>
    %161 = vector.extract_strided_slice %160 {offsets = [0, 0], sizes = [16, 128], strides = [1, 1]} : vector<64x128xf32> to vector<16x128xf32>
    %cst_61 = arith.constant dense<0.000000e+00> : vector<16x512xf32>
    %162 = tpu.matmul %161, %147, %cst_61 {dimension_numbers = #tpu.dot_dimension_numbers<[1], [0], [0], [1], [0, 0, 1, 1], [], []>} : vector<16x128xf32>, vector<128x512xf32>, vector<16x512xf32> -> vector<16x512xf32>
    %163 = vector.extract_strided_slice %160 {offsets = [16, 0], sizes = [16, 128], strides = [1, 1]} : vector<64x128xf32> to vector<16x128xf32>
    %cst_62 = arith.constant dense<0.000000e+00> : vector<16x512xf32>
    %164 = tpu.matmul %163, %151, %cst_62 {dimension_numbers = #tpu.dot_dimension_numbers<[1], [0], [0], [1], [0, 0, 1, 1], [], []>} : vector<16x128xf32>, vector<128x512xf32>, vector<16x512xf32> -> vector<16x512xf32>
    %165 = arith.addf %162, %164 : vector<16x512xf32>
    %166 = vector.extract_strided_slice %160 {offsets = [32, 0], sizes = [16, 128], strides = [1, 1]} : vector<64x128xf32> to vector<16x128xf32>
    %cst_63 = arith.constant dense<0.000000e+00> : vector<16x512xf32>
    %167 = tpu.matmul %166, %155, %cst_63 {dimension_numbers = #tpu.dot_dimension_numbers<[1], [0], [0], [1], [0, 0, 1, 1], [], []>} : vector<16x128xf32>, vector<128x512xf32>, vector<16x512xf32> -> vector<16x512xf32>
    %168 = arith.addf %165, %167 : vector<16x512xf32>
    %169 = vector.extract_strided_slice %160 {offsets = [48, 0], sizes = [16, 128], strides = [1, 1]} : vector<64x128xf32> to vector<16x128xf32>
    %cst_64 = arith.constant dense<0.000000e+00> : vector<16x512xf32>
    %170 = tpu.matmul %169, %159, %cst_64 {dimension_numbers = #tpu.dot_dimension_numbers<[1], [0], [0], [1], [0, 0, 1, 1], [], []>} : vector<16x128xf32>, vector<128x512xf32>, vector<16x512xf32> -> vector<16x512xf32>
    %171 = arith.addf %168, %170 : vector<16x512xf32>
    %172 = vector.broadcast %138 : vector<16x1xf32> to vector<16x512xf32>
    %173 = arith.addf %171, %172 : vector<16x512xf32>
    %c0_65 = arith.constant 0 : index
    %c0_66 = arith.constant 0 : index
    %c0_67 = arith.constant 0 : index
    %174 = vector.load %arg10[%c0_65, %c0_66, %c0_67] : memref<1x16x512xf32, #tpu.memory_space<vmem>>, vector<1x16x512xf32>
    %175 = vector.shape_cast %174 : vector<1x16x512xf32> to vector<16x512xf32>
    %176 = vector.shape_cast %173 : vector<16x512xf32> to vector<1x16x512xf32>
    tpu.vector_store %arg10[%c0_65, %c0_66, %c0_67], %176 {strides = array<i32>} : memref<1x16x512xf32, #tpu.memory_space<vmem>>, vector<1x16x512xf32>,
    return
  }
  func.func @transform_0(%arg0: i32, %arg1: i32) -> (i32, i32, i32) {
    %c0_i32 = arith.constant 0 : i32
    %c0_i32_0 = arith.constant 0 : i32
    return %arg0, %c0_i32, %arg1 : i32, i32, i32
  }
  func.func @transform_1(%arg0: i32, %arg1: i32) -> (i32, i32, i32) {
    %c0_i32 = arith.constant 0 : i32
    %c0_i32_0 = arith.constant 0 : i32
    %c0_i32_1 = arith.constant 0 : i32
    %c0_i32_2 = arith.constant 0 : i32
    return %c0_i32, %c0_i32_0, %c0_i32_1 : i32, i32, i32
  }
  func.func @transform_2(%arg0: i32, %arg1: i32) -> (i32, i32) {
    %c0_i32 = arith.constant 0 : i32
    %c0_i32_0 = arith.constant 0 : i32
    %c0_i32_1 = arith.constant 0 : i32
    return %c0_i32, %c0_i32_0 : i32, i32
  }
  func.func @transform_3(%arg0: i32, %arg1: i32) -> (i32, i32, i32) {
    %c0_i32 = arith.constant 0 : i32
    %c0_i32_0 = arith.constant 0 : i32
    %c0_i32_1 = arith.constant 0 : i32
    %c0_i32_2 = arith.constant 0 : i32
    return %c0_i32, %c0_i32_0, %c0_i32_1 : i32, i32, i32
  }
  func.func @transform_4(%arg0: i32, %arg1: i32) -> (i32, i32) {
    %c0_i32 = arith.constant 0 : i32
    %c0_i32_0 = arith.constant 0 : i32
    %c0_i32_1 = arith.constant 0 : i32
    return %c0_i32, %c0_i32_0 : i32, i32
  }
  func.func @transform_5(%arg0: i32, %arg1: i32) -> i32 {
    %c0_i32 = arith.constant 0 : i32
    %c0_i32_0 = arith.constant 0 : i32
    return %c0_i32 : i32
  }
  func.func @transform_6(%arg0: i32, %arg1: i32) -> (i32, i32) {
    %c0_i32 = arith.constant 0 : i32
    %c0_i32_0 = arith.constant 0 : i32
    %c0_i32_1 = arith.constant 0 : i32
    return %c0_i32, %c0_i32_0 : i32, i32
  }
  func.func @transform_7(%arg0: i32, %arg1: i32) -> (i32, i32) {
    %c0_i32 = arith.constant 0 : i32
    %c0_i32_0 = arith.constant 0 : i32
    %c0_i32_1 = arith.constant 0 : i32
    return %c0_i32, %c0_i32_0 : i32, i32
  }
  func.func @transform_8(%arg0: i32, %arg1: i32) -> (i32, i32, i32) {
    %c0_i32 = arith.constant 0 : i32
    %c0_i32_0 = arith.constant 0 : i32
    return %arg0, %c0_i32, %arg1 : i32, i32, i32
  }
}

module attributes {stable_mosaic.version = 11 : i64} {
  func.func @kernel(%arg0: i32, %arg1: i32, %arg2: memref<1x16x128xf32, #tpu.memory_space<vmem>>, %arg3: memref<3x16x16xf32, #tpu.memory_space<vmem>>, %arg4: memref<16x1xf32, #tpu.memory_space<vmem>>, %arg5: memref<3x16x16xf32, #tpu.memory_space<vmem>>, %arg6: memref<16x1xf32, #tpu.memory_space<vmem>>, %arg7: memref<2xf32, #tpu.memory_space<smem>>, %arg8: memref<16x16xf32, #tpu.memory_space<vmem>>, %arg9: memref<8x1xf32, #tpu.memory_space<vmem>>, %arg10: memref<1x16x128xf32, #tpu.memory_space<vmem>>, %arg11: memref<1x8x256xf32, #tpu.memory_space<vmem>>) attributes {dimension_semantics = [#tpu.dimension_semantics<parallel>, #tpu.dimension_semantics<parallel>], iteration_bounds = array<i64: 2, 1>, scalar_prefetch = 0 : i64, scratch_operands = 0 : i64, tpu.core_type = #tpu.core_type<tc>, window_params = [{transform_indices = @transform_0, window_bounds = array<i64: 1, 16, 128>}, {pipeline_mode = #tpu.pipeline_mode<synchronous>, transform_indices = @transform_1, window_bounds = array<i64: 3, 16, 16>}, {pipeline_mode = #tpu.pipeline_mode<synchronous>, transform_indices = @transform_2, window_bounds = array<i64: 16, 1>}, {pipeline_mode = #tpu.pipeline_mode<synchronous>, transform_indices = @transform_3, window_bounds = array<i64: 3, 16, 16>}, {pipeline_mode = #tpu.pipeline_mode<synchronous>, transform_indices = @transform_4, window_bounds = array<i64: 16, 1>}, {transform_indices = @transform_5, window_bounds = array<i64: 2>}, {pipeline_mode = #tpu.pipeline_mode<synchronous>, transform_indices = @transform_6, window_bounds = array<i64: 16, 16>}, {pipeline_mode = #tpu.pipeline_mode<synchronous>, transform_indices = @transform_7, window_bounds = array<i64: 8, 1>}, {transform_indices = @transform_8, window_bounds = array<i64: 1, 16, 128>}, {transform_indices = @transform_9, window_bounds = array<i64: 1, 8, 256>}]} {
    %c128_i32 = arith.constant 128 : i32
    %0 = arith.muli %arg1, %c128_i32 : i32
    %1 = tpu.iota {dimensions = array<i32: 1>} : vector<1x128xi32>
    %2 = vector.broadcast %0 : i32 to vector<1x128xi32>
    %3 = arith.addi %1, %2 : vector<1x128xi32>
    %c94_i32 = arith.constant 94 : i32
    %4 = vector.broadcast %c94_i32 : i32 to vector<1x128xi32>
    %5 = arith.cmpi slt, %3, %4 : vector<1x128xi32>
    %c0 = arith.constant 0 : index
    %6 = memref.load %arg7[%c0] : memref<2xf32, #tpu.memory_space<smem>>
    %c1 = arith.constant 1 : index
    %7 = memref.load %arg7[%c1] : memref<2xf32, #tpu.memory_space<smem>>
    %c0_0 = arith.constant 0 : index
    %c0_1 = arith.constant 0 : index
    %c0_2 = arith.constant 0 : index
    %8 = vector.load %arg2[%c0_0, %c0_1, %c0_2] : memref<1x16x128xf32, #tpu.memory_space<vmem>>, vector<1x16x128xf32>
    %9 = vector.shape_cast %8 : vector<1x16x128xf32> to vector<16x128xf32>
    %cst = arith.constant 0.000000e+00 : f32
    %10 = vector.shape_cast %5 : vector<1x128xi1> to vector<1x128xi1>
    %11 = vector.broadcast %10 : vector<1x128xi1> to vector<16x128xi1>
    %12 = vector.broadcast %cst : f32 to vector<16x128xf32>
    %13 = arith.select %11, %9, %12 : vector<16x128xi1>, vector<16x128xf32>
    %cst_3 = arith.constant 0.000000e+00 : f32
    %14 = vector.broadcast %cst_3 : f32 to vector<16x1xf32>
    %cst_4 = arith.constant 0.000000e+00 : f32
    %15 = vector.broadcast %cst_4 : f32 to vector<16x128xf32>
    %16 = arith.cmpf oge, %13, %15 : vector<16x128xf32>
    %17 = vector.broadcast %6 : f32 to vector<16x128xf32>
    %18 = arith.mulf %17, %13 : vector<16x128xf32>
    %19 = arith.select %16, %13, %18 : vector<16x128xi1>, vector<16x128xf32>
    %cst_5 = arith.constant 0.000000e+00 : f32
    %20 = vector.broadcast %cst_5 : f32 to vector<16x1xf32>
    %21 = arith.cmpf oge, %14, %20 : vector<16x1xf32>
    %22 = vector.broadcast %6 : f32 to vector<16x1xf32>
    %23 = arith.mulf %22, %14 : vector<16x1xf32>
    %24 = arith.select %21, %14, %23 : vector<16x1xi1>, vector<16x1xf32>
    %cst_6 = arith.constant 0.000000e+00 : f32
    %25 = vector.broadcast %cst_6 : f32 to vector<16x1xf32>
    %26 = arith.cmpf oge, %14, %25 : vector<16x1xf32>
    %27 = vector.broadcast %6 : f32 to vector<16x1xf32>
    %28 = arith.mulf %27, %14 : vector<16x1xf32>
    %29 = arith.select %26, %14, %28 : vector<16x1xi1>, vector<16x1xf32>
    %cst_7 = arith.constant 0.000000e+00 : f32
    %30 = vector.broadcast %cst_7 : f32 to vector<16x1xf32>
    %31 = arith.cmpf oge, %14, %30 : vector<16x1xf32>
    %32 = vector.broadcast %6 : f32 to vector<16x1xf32>
    %33 = arith.mulf %32, %14 : vector<16x1xf32>
    %34 = arith.select %31, %14, %33 : vector<16x1xi1>, vector<16x1xf32>
    %cst_8 = arith.constant 0.000000e+00 : f32
    %35 = vector.broadcast %cst_8 : f32 to vector<16x1xf32>
    %36 = arith.cmpf oge, %14, %35 : vector<16x1xf32>
    %37 = vector.broadcast %6 : f32 to vector<16x1xf32>
    %38 = arith.mulf %37, %14 : vector<16x1xf32>
    %39 = arith.select %36, %14, %38 : vector<16x1xi1>, vector<16x1xf32>
    %c0_i32 = arith.constant 0 : i32
    %40 = vector.broadcast %c0_i32 : i32 to vector<1x128xi32>
    %41 = arith.cmpi eq, %1, %40 : vector<1x128xi32>
    %c127_i32 = arith.constant 127 : i32
    %42 = vector.broadcast %c127_i32 : i32 to vector<1x128xi32>
    %43 = arith.cmpi eq, %1, %42 : vector<1x128xi32>
    %c1_i32 = arith.constant 1 : i32
    %44 = tpu.dynamic_rotate %19 by %c1_i32 dim 1 : vector<16x128xf32>, i32 -> vector<16x128xf32>
    %45 = vector.shape_cast %41 : vector<1x128xi1> to vector<1x128xi1>
    %46 = vector.broadcast %45 : vector<1x128xi1> to vector<16x128xi1>
    %47 = vector.shape_cast %24 : vector<16x1xf32> to vector<16x1xf32>
    %48 = vector.broadcast %47 : vector<16x1xf32> to vector<16x128xf32>
    %49 = arith.select %46, %48, %44 : vector<16x128xi1>, vector<16x128xf32>
    %c127_i32_9 = arith.constant 127 : i32
    %50 = tpu.dynamic_rotate %19 by %c127_i32_9 dim 1 : vector<16x128xf32>, i32 -> vector<16x128xf32>
    %51 = vector.shape_cast %43 : vector<1x128xi1> to vector<1x128xi1>
    %52 = vector.broadcast %51 : vector<1x128xi1> to vector<16x128xi1>
    %53 = vector.shape_cast %34 : vector<16x1xf32> to vector<16x1xf32>
    %54 = vector.broadcast %53 : vector<16x1xf32> to vector<16x128xf32>
    %55 = arith.select %52, %54, %50 : vector<16x128xi1>, vector<16x128xf32>
    %c0_10 = arith.constant 0 : index
    %c0_11 = arith.constant 0 : index
    %c0_12 = arith.constant 0 : index
    %56 = vector.load %arg3[%c0_10, %c0_11, %c0_12] : memref<3x16x16xf32, #tpu.memory_space<vmem>>, vector<1x16x16xf32>
    %57 = vector.shape_cast %56 : vector<1x16x16xf32> to vector<16x16xf32>
    %c1_13 = arith.constant 1 : index
    %c0_14 = arith.constant 0 : index
    %c0_15 = arith.constant 0 : index
    %58 = vector.load %arg3[%c1_13, %c0_14, %c0_15] : memref<3x16x16xf32, #tpu.memory_space<vmem>>, vector<1x16x16xf32>
    %59 = vector.shape_cast %58 : vector<1x16x16xf32> to vector<16x16xf32>
    %c2 = arith.constant 2 : index
    %c0_16 = arith.constant 0 : index
    %c0_17 = arith.constant 0 : index
    %60 = vector.load %arg3[%c2, %c0_16, %c0_17] : memref<3x16x16xf32, #tpu.memory_space<vmem>>, vector<1x16x16xf32>
    %61 = vector.shape_cast %60 : vector<1x16x16xf32> to vector<16x16xf32>
    %c0_18 = arith.constant 0 : index
    %c0_19 = arith.constant 0 : index
    %62 = vector.load %arg4[%c0_18, %c0_19] : memref<16x1xf32, #tpu.memory_space<vmem>>, vector<16x1xf32>
    %cst_20 = arith.constant dense<0.000000e+00> : vector<16x128xf32>
    %63 = tpu.matmul %57, %49, %cst_20 {dimension_numbers = #tpu.dot_dimension_numbers<[1], [0], [0], [1], [0, 0, 1, 1], [], []>} : vector<16x16xf32>, vector<16x128xf32>, vector<16x128xf32> -> vector<16x128xf32>
    %cst_21 = arith.constant dense<0.000000e+00> : vector<16x128xf32>
    %64 = tpu.matmul %59, %19, %cst_21 {dimension_numbers = #tpu.dot_dimension_numbers<[1], [0], [0], [1], [0, 0, 1, 1], [], []>} : vector<16x16xf32>, vector<16x128xf32>, vector<16x128xf32> -> vector<16x128xf32>
    %65 = arith.addf %63, %64 : vector<16x128xf32>
    %cst_22 = arith.constant dense<0.000000e+00> : vector<16x128xf32>
    %66 = tpu.matmul %61, %55, %cst_22 {dimension_numbers = #tpu.dot_dimension_numbers<[1], [0], [0], [1], [0, 0, 1, 1], [], []>} : vector<16x16xf32>, vector<16x128xf32>, vector<16x128xf32> -> vector<16x128xf32>
    %67 = arith.addf %65, %66 : vector<16x128xf32>
    %68 = vector.broadcast %62 : vector<16x1xf32> to vector<16x128xf32>
    %69 = arith.addf %67, %68 : vector<16x128xf32>
    %cst_23 = arith.constant 0.000000e+00 : f32
    %70 = vector.broadcast %cst_23 : f32 to vector<16x128xf32>
    %71 = arith.cmpf oge, %69, %70 : vector<16x128xf32>
    %72 = vector.broadcast %7 : f32 to vector<16x128xf32>
    %73 = arith.mulf %72, %69 : vector<16x128xf32>
    %74 = arith.select %71, %69, %73 : vector<16x128xi1>, vector<16x128xf32>
    %cst_24 = arith.constant 0.000000e+00 : f32
    %75 = vector.shape_cast %5 : vector<1x128xi1> to vector<1x128xi1>
    %76 = vector.broadcast %75 : vector<1x128xi1> to vector<16x128xi1>
    %77 = vector.broadcast %cst_24 : f32 to vector<16x128xf32>
    %78 = arith.select %76, %74, %77 : vector<16x128xi1>, vector<16x128xf32>
    %c1_i32_25 = arith.constant 1 : i32
    %79 = arith.cmpi sge, %0, %c1_i32_25 : i32
    %cst_26 = arith.constant dense<0.000000e+00> : vector<16x1xf32>
    %80 = tpu.matmul %57, %29, %cst_26 {dimension_numbers = #tpu.dot_dimension_numbers<[1], [0], [0], [1], [0, 0, 1, 1], [], []>} : vector<16x16xf32>, vector<16x1xf32>, vector<16x1xf32> -> vector<16x1xf32>
    %cst_27 = arith.constant dense<0.000000e+00> : vector<16x1xf32>
    %81 = tpu.matmul %59, %24, %cst_27 {dimension_numbers = #tpu.dot_dimension_numbers<[1], [0], [0], [1], [0, 0, 1, 1], [], []>} : vector<16x16xf32>, vector<16x1xf32>, vector<16x1xf32> -> vector<16x1xf32>
    %82 = arith.addf %80, %81 : vector<16x1xf32>
    %83 = vector.extract_strided_slice %19 {offsets = [0, 0], sizes = [16, 1], strides = [1, 1]} : vector<16x128xf32> to vector<16x1xf32>
    %cst_28 = arith.constant dense<0.000000e+00> : vector<16x1xf32>
    %84 = tpu.matmul %61, %83, %cst_28 {dimension_numbers = #tpu.dot_dimension_numbers<[1], [0], [0], [1], [0, 0, 1, 1], [], []>} : vector<16x16xf32>, vector<16x1xf32>, vector<16x1xf32> -> vector<16x1xf32>
    %85 = arith.addf %82, %84 : vector<16x1xf32>
    %86 = arith.addf %85, %62 : vector<16x1xf32>
    %cst_29 = arith.constant 0.000000e+00 : f32
    %87 = vector.broadcast %cst_29 : f32 to vector<16x1xf32>
    %88 = arith.cmpf oge, %86, %87 : vector<16x1xf32>
    %89 = vector.broadcast %7 : f32 to vector<16x1xf32>
    %90 = arith.mulf %89, %86 : vector<16x1xf32>
    %91 = arith.select %88, %86, %90 : vector<16x1xi1>, vector<16x1xf32>
    %cst_30 = arith.constant 0.000000e+00 : f32
    %92 = vector.broadcast %cst_30 : f32 to vector<16x1xf32>
    %93 = arith.select %79, %91, %92 : vector<16x1xf32>
    %c128_i32_31 = arith.constant 128 : i32
    %94 = arith.addi %0, %c128_i32_31 : i32
    %c94_i32_32 = arith.constant 94 : i32
    %95 = arith.cmpi slt, %94, %c94_i32_32 : i32
    %96 = vector.extract_strided_slice %19 {offsets = [0, 127], sizes = [16, 1], strides = [1, 1]} : vector<16x128xf32> to vector<16x1xf32>
    %cst_33 = arith.constant dense<0.000000e+00> : vector<16x1xf32>
    %97 = tpu.matmul %57, %96, %cst_33 {dimension_numbers = #tpu.dot_dimension_numbers<[1], [0], [0], [1], [0, 0, 1, 1], [], []>} : vector<16x16xf32>, vector<16x1xf32>, vector<16x1xf32> -> vector<16x1xf32>
    %cst_34 = arith.constant dense<0.000000e+00> : vector<16x1xf32>
    %98 = tpu.matmul %59, %34, %cst_34 {dimension_numbers = #tpu.dot_dimension_numbers<[1], [0], [0], [1], [0, 0, 1, 1], [], []>} : vector<16x16xf32>, vector<16x1xf32>, vector<16x1xf32> -> vector<16x1xf32>
    %99 = arith.addf %97, %98 : vector<16x1xf32>
    %cst_35 = arith.constant dense<0.000000e+00> : vector<16x1xf32>
    %100 = tpu.matmul %61, %39, %cst_35 {dimension_numbers = #tpu.dot_dimension_numbers<[1], [0], [0], [1], [0, 0, 1, 1], [], []>} : vector<16x16xf32>, vector<16x1xf32>, vector<16x1xf32> -> vector<16x1xf32>
    %101 = arith.addf %99, %100 : vector<16x1xf32>
    %102 = arith.addf %101, %62 : vector<16x1xf32>
    %cst_36 = arith.constant 0.000000e+00 : f32
    %103 = vector.broadcast %cst_36 : f32 to vector<16x1xf32>
    %104 = arith.cmpf oge, %102, %103 : vector<16x1xf32>
    %105 = vector.broadcast %7 : f32 to vector<16x1xf32>
    %106 = arith.mulf %105, %102 : vector<16x1xf32>
    %107 = arith.select %104, %102, %106 : vector<16x1xi1>, vector<16x1xf32>
    %cst_37 = arith.constant 0.000000e+00 : f32
    %108 = vector.broadcast %cst_37 : f32 to vector<16x1xf32>
    %109 = arith.select %95, %107, %108 : vector<16x1xf32>
    %c1_i32_38 = arith.constant 1 : i32
    %110 = tpu.dynamic_rotate %78 by %c1_i32_38 dim 1 : vector<16x128xf32>, i32 -> vector<16x128xf32>
    %111 = vector.shape_cast %41 : vector<1x128xi1> to vector<1x128xi1>
    %112 = vector.broadcast %111 : vector<1x128xi1> to vector<16x128xi1>
    %113 = vector.shape_cast %93 : vector<16x1xf32> to vector<16x1xf32>
    %114 = vector.broadcast %113 : vector<16x1xf32> to vector<16x128xf32>
    %115 = arith.select %112, %114, %110 : vector<16x128xi1>, vector<16x128xf32>
    %c127_i32_39 = arith.constant 127 : i32
    %116 = tpu.dynamic_rotate %78 by %c127_i32_39 dim 1 : vector<16x128xf32>, i32 -> vector<16x128xf32>
    %117 = vector.shape_cast %43 : vector<1x128xi1> to vector<1x128xi1>
    %118 = vector.broadcast %117 : vector<1x128xi1> to vector<16x128xi1>
    %119 = vector.shape_cast %109 : vector<16x1xf32> to vector<16x1xf32>
    %120 = vector.broadcast %119 : vector<16x1xf32> to vector<16x128xf32>
    %121 = arith.select %118, %120, %116 : vector<16x128xi1>, vector<16x128xf32>
    %c0_40 = arith.constant 0 : index
    %c0_41 = arith.constant 0 : index
    %c0_42 = arith.constant 0 : index
    %122 = vector.load %arg5[%c0_40, %c0_41, %c0_42] : memref<3x16x16xf32, #tpu.memory_space<vmem>>, vector<1x16x16xf32>
    %123 = vector.shape_cast %122 : vector<1x16x16xf32> to vector<16x16xf32>
    %cst_43 = arith.constant dense<0.000000e+00> : vector<16x128xf32>
    %124 = tpu.matmul %123, %115, %cst_43 {dimension_numbers = #tpu.dot_dimension_numbers<[1], [0], [0], [1], [0, 0, 1, 1], [], []>} : vector<16x16xf32>, vector<16x128xf32>, vector<16x128xf32> -> vector<16x128xf32>
    %c1_44 = arith.constant 1 : index
    %c0_45 = arith.constant 0 : index
    %c0_46 = arith.constant 0 : index
    %125 = vector.load %arg5[%c1_44, %c0_45, %c0_46] : memref<3x16x16xf32, #tpu.memory_space<vmem>>, vector<1x16x16xf32>
    %126 = vector.shape_cast %125 : vector<1x16x16xf32> to vector<16x16xf32>
    %cst_47 = arith.constant dense<0.000000e+00> : vector<16x128xf32>
    %127 = tpu.matmul %126, %78, %cst_47 {dimension_numbers = #tpu.dot_dimension_numbers<[1], [0], [0], [1], [0, 0, 1, 1], [], []>} : vector<16x16xf32>, vector<16x128xf32>, vector<16x128xf32> -> vector<16x128xf32>
    %128 = arith.addf %124, %127 : vector<16x128xf32>
    %c2_48 = arith.constant 2 : index
    %c0_49 = arith.constant 0 : index
    %c0_50 = arith.constant 0 : index
    %129 = vector.load %arg5[%c2_48, %c0_49, %c0_50] : memref<3x16x16xf32, #tpu.memory_space<vmem>>, vector<1x16x16xf32>
    %130 = vector.shape_cast %129 : vector<1x16x16xf32> to vector<16x16xf32>
    %cst_51 = arith.constant dense<0.000000e+00> : vector<16x128xf32>
    %131 = tpu.matmul %130, %121, %cst_51 {dimension_numbers = #tpu.dot_dimension_numbers<[1], [0], [0], [1], [0, 0, 1, 1], [], []>} : vector<16x16xf32>, vector<16x128xf32>, vector<16x128xf32> -> vector<16x128xf32>
    %132 = arith.addf %128, %131 : vector<16x128xf32>
    %c0_52 = arith.constant 0 : index
    %c0_53 = arith.constant 0 : index
    %133 = vector.load %arg6[%c0_52, %c0_53] : memref<16x1xf32, #tpu.memory_space<vmem>>, vector<16x1xf32>
    %134 = vector.broadcast %133 : vector<16x1xf32> to vector<16x128xf32>
    %135 = arith.addf %132, %134 : vector<16x128xf32>
    %136 = arith.addf %13, %135 : vector<16x128xf32>
    %c0_54 = arith.constant 0 : index
    %c0_55 = arith.constant 0 : index
    %c0_56 = arith.constant 0 : index
    %137 = vector.load %arg10[%c0_54, %c0_55, %c0_56] : memref<1x16x128xf32, #tpu.memory_space<vmem>>, vector<1x16x128xf32>
    %138 = vector.shape_cast %137 : vector<1x16x128xf32> to vector<16x128xf32>
    %139 = vector.shape_cast %136 : vector<16x128xf32> to vector<1x16x128xf32>
    tpu.vector_store %arg10[%c0_54, %c0_55, %c0_56], %139 {strides = array<i32>} : memref<1x16x128xf32, #tpu.memory_space<vmem>>, vector<1x16x128xf32>,
    %c0_57 = arith.constant 0 : index
    %c0_58 = arith.constant 0 : index
    %140 = vector.load %arg8[%c0_57, %c0_58] : memref<16x16xf32, #tpu.memory_space<vmem>>, vector<16x16xf32>
    %c0_59 = arith.constant 0 : index
    %c0_60 = arith.constant 0 : index
    %141 = vector.load %arg9[%c0_59, %c0_60] : memref<8x1xf32, #tpu.memory_space<vmem>>, vector<8x1xf32>
    %142 = tpu.iota {dimensions = array<i32: 0>} : vector<128x256xi32>
    %143 = tpu.iota {dimensions = array<i32: 1>} : vector<128x256xi32>
    %c2_i32 = arith.constant 2 : i32
    %144 = vector.broadcast %c2_i32 : i32 to vector<128x256xi32>
    %145 = arith.muli %142, %144 : vector<128x256xi32>
    %146 = arith.subi %143, %145 : vector<128x256xi32>
    %c0_i32_61 = arith.constant 0 : i32
    %147 = vector.broadcast %c0_i32_61 : i32 to vector<128x256xi32>
    %148 = arith.cmpi eq, %146, %147 : vector<128x256xi32>
    %149 = arith.extui %148 : vector<128x256xi1> to vector<128x256xi32>
    %150 = arith.sitofp %149 : vector<128x256xi32> to vector<128x256xf32>
    %c1_i32_62 = arith.constant 1 : i32
    %151 = vector.broadcast %c1_i32_62 : i32 to vector<128x256xi32>
    %152 = arith.cmpi eq, %146, %151 : vector<128x256xi32>
    %153 = arith.extui %152 : vector<128x256xi1> to vector<128x256xi32>
    %154 = arith.sitofp %153 : vector<128x256xi32> to vector<128x256xf32>
    %cst_63 = arith.constant dense<0.000000e+00> : vector<16x128xf32>
    %155 = tpu.matmul %140, %136, %cst_63 {dimension_numbers = #tpu.dot_dimension_numbers<[1], [0], [0], [1], [0, 0, 1, 1], [], []>} : vector<16x16xf32>, vector<16x128xf32>, vector<16x128xf32> -> vector<16x128xf32>
    %156 = vector.extract_strided_slice %155 {offsets = [0, 0], sizes = [8, 128], strides = [1, 1]} : vector<16x128xf32> to vector<8x128xf32>
    %cst_64 = arith.constant dense<0.000000e+00> : vector<8x256xf32>
    %157 = tpu.matmul %156, %150, %cst_64 {dimension_numbers = #tpu.dot_dimension_numbers<[1], [0], [0], [1], [0, 0, 1, 1], [], []>} : vector<8x128xf32>, vector<128x256xf32>, vector<8x256xf32> -> vector<8x256xf32>
    %158 = vector.extract_strided_slice %155 {offsets = [8, 0], sizes = [8, 128], strides = [1, 1]} : vector<16x128xf32> to vector<8x128xf32>
    %cst_65 = arith.constant dense<0.000000e+00> : vector<8x256xf32>
    %159 = tpu.matmul %158, %154, %cst_65 {dimension_numbers = #tpu.dot_dimension_numbers<[1], [0], [0], [1], [0, 0, 1, 1], [], []>} : vector<8x128xf32>, vector<128x256xf32>, vector<8x256xf32> -> vector<8x256xf32>
    %160 = arith.addf %157, %159 : vector<8x256xf32>
    %161 = vector.broadcast %141 : vector<8x1xf32> to vector<8x256xf32>
    %162 = arith.addf %160, %161 : vector<8x256xf32>
    %c0_66 = arith.constant 0 : index
    %c0_67 = arith.constant 0 : index
    %c0_68 = arith.constant 0 : index
    %163 = vector.load %arg11[%c0_66, %c0_67, %c0_68] : memref<1x8x256xf32, #tpu.memory_space<vmem>>, vector<1x8x256xf32>
    %164 = vector.shape_cast %163 : vector<1x8x256xf32> to vector<8x256xf32>
    %165 = vector.shape_cast %162 : vector<8x256xf32> to vector<1x8x256xf32>
    tpu.vector_store %arg11[%c0_66, %c0_67, %c0_68], %165 {strides = array<i32>} : memref<1x8x256xf32, #tpu.memory_space<vmem>>, vector<1x8x256xf32>,
    return
  }
  func.func @transform_0(%arg0: i32, %arg1: i32) -> (i32, i32, i32) {
    %c0_i32 = arith.constant 0 : i32
    %c0_i32_0 = arith.constant 0 : i32
    return %arg0, %c0_i32, %arg1 : i32, i32, i32
  }
  func.func @transform_1(%arg0: i32, %arg1: i32) -> (i32, i32, i32) {
    %c0_i32 = arith.constant 0 : i32
    %c0_i32_0 = arith.constant 0 : i32
    %c0_i32_1 = arith.constant 0 : i32
    %c0_i32_2 = arith.constant 0 : i32
    return %c0_i32, %c0_i32_0, %c0_i32_1 : i32, i32, i32
  }
  func.func @transform_2(%arg0: i32, %arg1: i32) -> (i32, i32) {
    %c0_i32 = arith.constant 0 : i32
    %c0_i32_0 = arith.constant 0 : i32
    %c0_i32_1 = arith.constant 0 : i32
    return %c0_i32, %c0_i32_0 : i32, i32
  }
  func.func @transform_3(%arg0: i32, %arg1: i32) -> (i32, i32, i32) {
    %c0_i32 = arith.constant 0 : i32
    %c0_i32_0 = arith.constant 0 : i32
    %c0_i32_1 = arith.constant 0 : i32
    %c0_i32_2 = arith.constant 0 : i32
    return %c0_i32, %c0_i32_0, %c0_i32_1 : i32, i32, i32
  }
  func.func @transform_4(%arg0: i32, %arg1: i32) -> (i32, i32) {
    %c0_i32 = arith.constant 0 : i32
    %c0_i32_0 = arith.constant 0 : i32
    %c0_i32_1 = arith.constant 0 : i32
    return %c0_i32, %c0_i32_0 : i32, i32
  }
  func.func @transform_5(%arg0: i32, %arg1: i32) -> i32 {
    %c0_i32 = arith.constant 0 : i32
    %c0_i32_0 = arith.constant 0 : i32
    return %c0_i32 : i32
  }
  func.func @transform_6(%arg0: i32, %arg1: i32) -> (i32, i32) {
    %c0_i32 = arith.constant 0 : i32
    %c0_i32_0 = arith.constant 0 : i32
    %c0_i32_1 = arith.constant 0 : i32
    return %c0_i32, %c0_i32_0 : i32, i32
  }
  func.func @transform_7(%arg0: i32, %arg1: i32) -> (i32, i32) {
    %c0_i32 = arith.constant 0 : i32
    %c0_i32_0 = arith.constant 0 : i32
    %c0_i32_1 = arith.constant 0 : i32
    return %c0_i32, %c0_i32_0 : i32, i32
  }
  func.func @transform_8(%arg0: i32, %arg1: i32) -> (i32, i32, i32) {
    %c0_i32 = arith.constant 0 : i32
    %c0_i32_0 = arith.constant 0 : i32
    return %arg0, %c0_i32, %arg1 : i32, i32, i32
  }
  func.func @transform_9(%arg0: i32, %arg1: i32) -> (i32, i32, i32) {
    %c0_i32 = arith.constant 0 : i32
    %c0_i32_0 = arith.constant 0 : i32
    return %arg0, %c0_i32, %arg1 : i32, i32, i32
  }
}

module attributes {stable_mosaic.version = 11 : i64} {
  func.func @kernel(%arg0: i32, %arg1: i32, %arg2: memref<1x8x256xf32, #tpu.memory_space<vmem>>, %arg3: memref<3x8x8xf32, #tpu.memory_space<vmem>>, %arg4: memref<8x1xf32, #tpu.memory_space<vmem>>, %arg5: memref<3x8x8xf32, #tpu.memory_space<vmem>>, %arg6: memref<8x1xf32, #tpu.memory_space<vmem>>, %arg7: memref<2xf32, #tpu.memory_space<smem>>, %arg8: memref<1x8x256xf32, #tpu.memory_space<vmem>>) attributes {dimension_semantics = [#tpu.dimension_semantics<parallel>, #tpu.dimension_semantics<parallel>], iteration_bounds = array<i64: 2, 1>, scalar_prefetch = 0 : i64, scratch_operands = 0 : i64, tpu.core_type = #tpu.core_type<tc>, window_params = [{transform_indices = @transform_0, window_bounds = array<i64: 1, 8, 256>}, {pipeline_mode = #tpu.pipeline_mode<synchronous>, transform_indices = @transform_1, window_bounds = array<i64: 3, 8, 8>}, {pipeline_mode = #tpu.pipeline_mode<synchronous>, transform_indices = @transform_2, window_bounds = array<i64: 8, 1>}, {pipeline_mode = #tpu.pipeline_mode<synchronous>, transform_indices = @transform_3, window_bounds = array<i64: 3, 8, 8>}, {pipeline_mode = #tpu.pipeline_mode<synchronous>, transform_indices = @transform_4, window_bounds = array<i64: 8, 1>}, {transform_indices = @transform_5, window_bounds = array<i64: 2>}, {transform_indices = @transform_6, window_bounds = array<i64: 1, 8, 256>}]} {
    %c256_i32 = arith.constant 256 : i32
    %0 = arith.muli %arg1, %c256_i32 : i32
    %1 = tpu.iota {dimensions = array<i32: 1>} : vector<1x256xi32>
    %2 = vector.broadcast %0 : i32 to vector<1x256xi32>
    %3 = arith.addi %1, %2 : vector<1x256xi32>
    %c187_i32 = arith.constant 187 : i32
    %4 = vector.broadcast %c187_i32 : i32 to vector<1x256xi32>
    %5 = arith.cmpi slt, %3, %4 : vector<1x256xi32>
    %c0 = arith.constant 0 : index
    %6 = memref.load %arg7[%c0] : memref<2xf32, #tpu.memory_space<smem>>
    %c1 = arith.constant 1 : index
    %7 = memref.load %arg7[%c1] : memref<2xf32, #tpu.memory_space<smem>>
    %c0_0 = arith.constant 0 : index
    %c0_1 = arith.constant 0 : index
    %c0_2 = arith.constant 0 : index
    %8 = vector.load %arg2[%c0_0, %c0_1, %c0_2] : memref<1x8x256xf32, #tpu.memory_space<vmem>>, vector<1x8x256xf32>
    %9 = vector.shape_cast %8 : vector<1x8x256xf32> to vector<8x256xf32>
    %cst = arith.constant 0.000000e+00 : f32
    %10 = vector.shape_cast %5 : vector<1x256xi1> to vector<1x256xi1>
    %11 = vector.broadcast %10 : vector<1x256xi1> to vector<8x256xi1>
    %12 = vector.broadcast %cst : f32 to vector<8x256xf32>
    %13 = arith.select %11, %9, %12 : vector<8x256xi1>, vector<8x256xf32>
    %cst_3 = arith.constant 0.000000e+00 : f32
    %14 = vector.broadcast %cst_3 : f32 to vector<8x1xf32>
    %cst_4 = arith.constant 0.000000e+00 : f32
    %15 = vector.broadcast %cst_4 : f32 to vector<8x256xf32>
    %16 = arith.cmpf oge, %13, %15 : vector<8x256xf32>
    %17 = vector.broadcast %6 : f32 to vector<8x256xf32>
    %18 = arith.mulf %17, %13 : vector<8x256xf32>
    %19 = arith.select %16, %13, %18 : vector<8x256xi1>, vector<8x256xf32>
    %cst_5 = arith.constant 0.000000e+00 : f32
    %20 = vector.broadcast %cst_5 : f32 to vector<8x1xf32>
    %21 = arith.cmpf oge, %14, %20 : vector<8x1xf32>
    %22 = vector.broadcast %6 : f32 to vector<8x1xf32>
    %23 = arith.mulf %22, %14 : vector<8x1xf32>
    %24 = arith.select %21, %14, %23 : vector<8x1xi1>, vector<8x1xf32>
    %cst_6 = arith.constant 0.000000e+00 : f32
    %25 = vector.broadcast %cst_6 : f32 to vector<8x1xf32>
    %26 = arith.cmpf oge, %14, %25 : vector<8x1xf32>
    %27 = vector.broadcast %6 : f32 to vector<8x1xf32>
    %28 = arith.mulf %27, %14 : vector<8x1xf32>
    %29 = arith.select %26, %14, %28 : vector<8x1xi1>, vector<8x1xf32>
    %cst_7 = arith.constant 0.000000e+00 : f32
    %30 = vector.broadcast %cst_7 : f32 to vector<8x1xf32>
    %31 = arith.cmpf oge, %14, %30 : vector<8x1xf32>
    %32 = vector.broadcast %6 : f32 to vector<8x1xf32>
    %33 = arith.mulf %32, %14 : vector<8x1xf32>
    %34 = arith.select %31, %14, %33 : vector<8x1xi1>, vector<8x1xf32>
    %cst_8 = arith.constant 0.000000e+00 : f32
    %35 = vector.broadcast %cst_8 : f32 to vector<8x1xf32>
    %36 = arith.cmpf oge, %14, %35 : vector<8x1xf32>
    %37 = vector.broadcast %6 : f32 to vector<8x1xf32>
    %38 = arith.mulf %37, %14 : vector<8x1xf32>
    %39 = arith.select %36, %14, %38 : vector<8x1xi1>, vector<8x1xf32>
    %c0_i32 = arith.constant 0 : i32
    %40 = vector.broadcast %c0_i32 : i32 to vector<1x256xi32>
    %41 = arith.cmpi eq, %1, %40 : vector<1x256xi32>
    %c255_i32 = arith.constant 255 : i32
    %42 = vector.broadcast %c255_i32 : i32 to vector<1x256xi32>
    %43 = arith.cmpi eq, %1, %42 : vector<1x256xi32>
    %c1_i32 = arith.constant 1 : i32
    %44 = tpu.dynamic_rotate %19 by %c1_i32 dim 1 : vector<8x256xf32>, i32 -> vector<8x256xf32>
    %45 = vector.shape_cast %41 : vector<1x256xi1> to vector<1x256xi1>
    %46 = vector.broadcast %45 : vector<1x256xi1> to vector<8x256xi1>
    %47 = vector.shape_cast %24 : vector<8x1xf32> to vector<8x1xf32>
    %48 = vector.broadcast %47 : vector<8x1xf32> to vector<8x256xf32>
    %49 = arith.select %46, %48, %44 : vector<8x256xi1>, vector<8x256xf32>
    %c255_i32_9 = arith.constant 255 : i32
    %50 = tpu.dynamic_rotate %19 by %c255_i32_9 dim 1 : vector<8x256xf32>, i32 -> vector<8x256xf32>
    %51 = vector.shape_cast %43 : vector<1x256xi1> to vector<1x256xi1>
    %52 = vector.broadcast %51 : vector<1x256xi1> to vector<8x256xi1>
    %53 = vector.shape_cast %34 : vector<8x1xf32> to vector<8x1xf32>
    %54 = vector.broadcast %53 : vector<8x1xf32> to vector<8x256xf32>
    %55 = arith.select %52, %54, %50 : vector<8x256xi1>, vector<8x256xf32>
    %c0_10 = arith.constant 0 : index
    %c0_11 = arith.constant 0 : index
    %c0_12 = arith.constant 0 : index
    %56 = vector.load %arg3[%c0_10, %c0_11, %c0_12] : memref<3x8x8xf32, #tpu.memory_space<vmem>>, vector<1x8x8xf32>
    %57 = vector.shape_cast %56 : vector<1x8x8xf32> to vector<8x8xf32>
    %c1_13 = arith.constant 1 : index
    %c0_14 = arith.constant 0 : index
    %c0_15 = arith.constant 0 : index
    %58 = vector.load %arg3[%c1_13, %c0_14, %c0_15] : memref<3x8x8xf32, #tpu.memory_space<vmem>>, vector<1x8x8xf32>
    %59 = vector.shape_cast %58 : vector<1x8x8xf32> to vector<8x8xf32>
    %c2 = arith.constant 2 : index
    %c0_16 = arith.constant 0 : index
    %c0_17 = arith.constant 0 : index
    %60 = vector.load %arg3[%c2, %c0_16, %c0_17] : memref<3x8x8xf32, #tpu.memory_space<vmem>>, vector<1x8x8xf32>
    %61 = vector.shape_cast %60 : vector<1x8x8xf32> to vector<8x8xf32>
    %c0_18 = arith.constant 0 : index
    %c0_19 = arith.constant 0 : index
    %62 = vector.load %arg4[%c0_18, %c0_19] : memref<8x1xf32, #tpu.memory_space<vmem>>, vector<8x1xf32>
    %cst_20 = arith.constant dense<0.000000e+00> : vector<8x256xf32>
    %63 = tpu.matmul %57, %49, %cst_20 {dimension_numbers = #tpu.dot_dimension_numbers<[1], [0], [0], [1], [0, 0, 1, 1], [], []>} : vector<8x8xf32>, vector<8x256xf32>, vector<8x256xf32> -> vector<8x256xf32>
    %cst_21 = arith.constant dense<0.000000e+00> : vector<8x256xf32>
    %64 = tpu.matmul %59, %19, %cst_21 {dimension_numbers = #tpu.dot_dimension_numbers<[1], [0], [0], [1], [0, 0, 1, 1], [], []>} : vector<8x8xf32>, vector<8x256xf32>, vector<8x256xf32> -> vector<8x256xf32>
    %65 = arith.addf %63, %64 : vector<8x256xf32>
    %cst_22 = arith.constant dense<0.000000e+00> : vector<8x256xf32>
    %66 = tpu.matmul %61, %55, %cst_22 {dimension_numbers = #tpu.dot_dimension_numbers<[1], [0], [0], [1], [0, 0, 1, 1], [], []>} : vector<8x8xf32>, vector<8x256xf32>, vector<8x256xf32> -> vector<8x256xf32>
    %67 = arith.addf %65, %66 : vector<8x256xf32>
    %68 = vector.broadcast %62 : vector<8x1xf32> to vector<8x256xf32>
    %69 = arith.addf %67, %68 : vector<8x256xf32>
    %cst_23 = arith.constant 0.000000e+00 : f32
    %70 = vector.broadcast %cst_23 : f32 to vector<8x256xf32>
    %71 = arith.cmpf oge, %69, %70 : vector<8x256xf32>
    %72 = vector.broadcast %7 : f32 to vector<8x256xf32>
    %73 = arith.mulf %72, %69 : vector<8x256xf32>
    %74 = arith.select %71, %69, %73 : vector<8x256xi1>, vector<8x256xf32>
    %cst_24 = arith.constant 0.000000e+00 : f32
    %75 = vector.shape_cast %5 : vector<1x256xi1> to vector<1x256xi1>
    %76 = vector.broadcast %75 : vector<1x256xi1> to vector<8x256xi1>
    %77 = vector.broadcast %cst_24 : f32 to vector<8x256xf32>
    %78 = arith.select %76, %74, %77 : vector<8x256xi1>, vector<8x256xf32>
    %c1_i32_25 = arith.constant 1 : i32
    %79 = arith.cmpi sge, %0, %c1_i32_25 : i32
    %cst_26 = arith.constant dense<0.000000e+00> : vector<8x1xf32>
    %80 = tpu.matmul %57, %29, %cst_26 {dimension_numbers = #tpu.dot_dimension_numbers<[1], [0], [0], [1], [0, 0, 1, 1], [], []>} : vector<8x8xf32>, vector<8x1xf32>, vector<8x1xf32> -> vector<8x1xf32>
    %cst_27 = arith.constant dense<0.000000e+00> : vector<8x1xf32>
    %81 = tpu.matmul %59, %24, %cst_27 {dimension_numbers = #tpu.dot_dimension_numbers<[1], [0], [0], [1], [0, 0, 1, 1], [], []>} : vector<8x8xf32>, vector<8x1xf32>, vector<8x1xf32> -> vector<8x1xf32>
    %82 = arith.addf %80, %81 : vector<8x1xf32>
    %83 = vector.extract_strided_slice %19 {offsets = [0, 0], sizes = [8, 1], strides = [1, 1]} : vector<8x256xf32> to vector<8x1xf32>
    %cst_28 = arith.constant dense<0.000000e+00> : vector<8x1xf32>
    %84 = tpu.matmul %61, %83, %cst_28 {dimension_numbers = #tpu.dot_dimension_numbers<[1], [0], [0], [1], [0, 0, 1, 1], [], []>} : vector<8x8xf32>, vector<8x1xf32>, vector<8x1xf32> -> vector<8x1xf32>
    %85 = arith.addf %82, %84 : vector<8x1xf32>
    %86 = arith.addf %85, %62 : vector<8x1xf32>
    %cst_29 = arith.constant 0.000000e+00 : f32
    %87 = vector.broadcast %cst_29 : f32 to vector<8x1xf32>
    %88 = arith.cmpf oge, %86, %87 : vector<8x1xf32>
    %89 = vector.broadcast %7 : f32 to vector<8x1xf32>
    %90 = arith.mulf %89, %86 : vector<8x1xf32>
    %91 = arith.select %88, %86, %90 : vector<8x1xi1>, vector<8x1xf32>
    %cst_30 = arith.constant 0.000000e+00 : f32
    %92 = vector.broadcast %cst_30 : f32 to vector<8x1xf32>
    %93 = arith.select %79, %91, %92 : vector<8x1xf32>
    %c256_i32_31 = arith.constant 256 : i32
    %94 = arith.addi %0, %c256_i32_31 : i32
    %c187_i32_32 = arith.constant 187 : i32
    %95 = arith.cmpi slt, %94, %c187_i32_32 : i32
    %96 = vector.extract_strided_slice %19 {offsets = [0, 255], sizes = [8, 1], strides = [1, 1]} : vector<8x256xf32> to vector<8x1xf32>
    %cst_33 = arith.constant dense<0.000000e+00> : vector<8x1xf32>
    %97 = tpu.matmul %57, %96, %cst_33 {dimension_numbers = #tpu.dot_dimension_numbers<[1], [0], [0], [1], [0, 0, 1, 1], [], []>} : vector<8x8xf32>, vector<8x1xf32>, vector<8x1xf32> -> vector<8x1xf32>
    %cst_34 = arith.constant dense<0.000000e+00> : vector<8x1xf32>
    %98 = tpu.matmul %59, %34, %cst_34 {dimension_numbers = #tpu.dot_dimension_numbers<[1], [0], [0], [1], [0, 0, 1, 1], [], []>} : vector<8x8xf32>, vector<8x1xf32>, vector<8x1xf32> -> vector<8x1xf32>
    %99 = arith.addf %97, %98 : vector<8x1xf32>
    %cst_35 = arith.constant dense<0.000000e+00> : vector<8x1xf32>
    %100 = tpu.matmul %61, %39, %cst_35 {dimension_numbers = #tpu.dot_dimension_numbers<[1], [0], [0], [1], [0, 0, 1, 1], [], []>} : vector<8x8xf32>, vector<8x1xf32>, vector<8x1xf32> -> vector<8x1xf32>
    %101 = arith.addf %99, %100 : vector<8x1xf32>
    %102 = arith.addf %101, %62 : vector<8x1xf32>
    %cst_36 = arith.constant 0.000000e+00 : f32
    %103 = vector.broadcast %cst_36 : f32 to vector<8x1xf32>
    %104 = arith.cmpf oge, %102, %103 : vector<8x1xf32>
    %105 = vector.broadcast %7 : f32 to vector<8x1xf32>
    %106 = arith.mulf %105, %102 : vector<8x1xf32>
    %107 = arith.select %104, %102, %106 : vector<8x1xi1>, vector<8x1xf32>
    %cst_37 = arith.constant 0.000000e+00 : f32
    %108 = vector.broadcast %cst_37 : f32 to vector<8x1xf32>
    %109 = arith.select %95, %107, %108 : vector<8x1xf32>
    %c1_i32_38 = arith.constant 1 : i32
    %110 = tpu.dynamic_rotate %78 by %c1_i32_38 dim 1 : vector<8x256xf32>, i32 -> vector<8x256xf32>
    %111 = vector.shape_cast %41 : vector<1x256xi1> to vector<1x256xi1>
    %112 = vector.broadcast %111 : vector<1x256xi1> to vector<8x256xi1>
    %113 = vector.shape_cast %93 : vector<8x1xf32> to vector<8x1xf32>
    %114 = vector.broadcast %113 : vector<8x1xf32> to vector<8x256xf32>
    %115 = arith.select %112, %114, %110 : vector<8x256xi1>, vector<8x256xf32>
    %c255_i32_39 = arith.constant 255 : i32
    %116 = tpu.dynamic_rotate %78 by %c255_i32_39 dim 1 : vector<8x256xf32>, i32 -> vector<8x256xf32>
    %117 = vector.shape_cast %43 : vector<1x256xi1> to vector<1x256xi1>
    %118 = vector.broadcast %117 : vector<1x256xi1> to vector<8x256xi1>
    %119 = vector.shape_cast %109 : vector<8x1xf32> to vector<8x1xf32>
    %120 = vector.broadcast %119 : vector<8x1xf32> to vector<8x256xf32>
    %121 = arith.select %118, %120, %116 : vector<8x256xi1>, vector<8x256xf32>
    %c0_40 = arith.constant 0 : index
    %c0_41 = arith.constant 0 : index
    %c0_42 = arith.constant 0 : index
    %122 = vector.load %arg5[%c0_40, %c0_41, %c0_42] : memref<3x8x8xf32, #tpu.memory_space<vmem>>, vector<1x8x8xf32>
    %123 = vector.shape_cast %122 : vector<1x8x8xf32> to vector<8x8xf32>
    %cst_43 = arith.constant dense<0.000000e+00> : vector<8x256xf32>
    %124 = tpu.matmul %123, %115, %cst_43 {dimension_numbers = #tpu.dot_dimension_numbers<[1], [0], [0], [1], [0, 0, 1, 1], [], []>} : vector<8x8xf32>, vector<8x256xf32>, vector<8x256xf32> -> vector<8x256xf32>
    %c1_44 = arith.constant 1 : index
    %c0_45 = arith.constant 0 : index
    %c0_46 = arith.constant 0 : index
    %125 = vector.load %arg5[%c1_44, %c0_45, %c0_46] : memref<3x8x8xf32, #tpu.memory_space<vmem>>, vector<1x8x8xf32>
    %126 = vector.shape_cast %125 : vector<1x8x8xf32> to vector<8x8xf32>
    %cst_47 = arith.constant dense<0.000000e+00> : vector<8x256xf32>
    %127 = tpu.matmul %126, %78, %cst_47 {dimension_numbers = #tpu.dot_dimension_numbers<[1], [0], [0], [1], [0, 0, 1, 1], [], []>} : vector<8x8xf32>, vector<8x256xf32>, vector<8x256xf32> -> vector<8x256xf32>
    %128 = arith.addf %124, %127 : vector<8x256xf32>
    %c2_48 = arith.constant 2 : index
    %c0_49 = arith.constant 0 : index
    %c0_50 = arith.constant 0 : index
    %129 = vector.load %arg5[%c2_48, %c0_49, %c0_50] : memref<3x8x8xf32, #tpu.memory_space<vmem>>, vector<1x8x8xf32>
    %130 = vector.shape_cast %129 : vector<1x8x8xf32> to vector<8x8xf32>
    %cst_51 = arith.constant dense<0.000000e+00> : vector<8x256xf32>
    %131 = tpu.matmul %130, %121, %cst_51 {dimension_numbers = #tpu.dot_dimension_numbers<[1], [0], [0], [1], [0, 0, 1, 1], [], []>} : vector<8x8xf32>, vector<8x256xf32>, vector<8x256xf32> -> vector<8x256xf32>
    %132 = arith.addf %128, %131 : vector<8x256xf32>
    %c0_52 = arith.constant 0 : index
    %c0_53 = arith.constant 0 : index
    %133 = vector.load %arg6[%c0_52, %c0_53] : memref<8x1xf32, #tpu.memory_space<vmem>>, vector<8x1xf32>
    %134 = vector.broadcast %133 : vector<8x1xf32> to vector<8x256xf32>
    %135 = arith.addf %132, %134 : vector<8x256xf32>
    %136 = arith.addf %13, %135 : vector<8x256xf32>
    %c0_54 = arith.constant 0 : index
    %c0_55 = arith.constant 0 : index
    %c0_56 = arith.constant 0 : index
    %137 = vector.load %arg8[%c0_54, %c0_55, %c0_56] : memref<1x8x256xf32, #tpu.memory_space<vmem>>, vector<1x8x256xf32>
    %138 = vector.shape_cast %137 : vector<1x8x256xf32> to vector<8x256xf32>
    %139 = vector.shape_cast %136 : vector<8x256xf32> to vector<1x8x256xf32>
    tpu.vector_store %arg8[%c0_54, %c0_55, %c0_56], %139 {strides = array<i32>} : memref<1x8x256xf32, #tpu.memory_space<vmem>>, vector<1x8x256xf32>,
    return
  }
  func.func @transform_0(%arg0: i32, %arg1: i32) -> (i32, i32, i32) {
    %c0_i32 = arith.constant 0 : i32
    %c0_i32_0 = arith.constant 0 : i32
    return %arg0, %c0_i32, %arg1 : i32, i32, i32
  }
  func.func @transform_1(%arg0: i32, %arg1: i32) -> (i32, i32, i32) {
    %c0_i32 = arith.constant 0 : i32
    %c0_i32_0 = arith.constant 0 : i32
    %c0_i32_1 = arith.constant 0 : i32
    %c0_i32_2 = arith.constant 0 : i32
    return %c0_i32, %c0_i32_0, %c0_i32_1 : i32, i32, i32
  }
  func.func @transform_2(%arg0: i32, %arg1: i32) -> (i32, i32) {
    %c0_i32 = arith.constant 0 : i32
    %c0_i32_0 = arith.constant 0 : i32
    %c0_i32_1 = arith.constant 0 : i32
    return %c0_i32, %c0_i32_0 : i32, i32
  }
  func.func @transform_3(%arg0: i32, %arg1: i32) -> (i32, i32, i32) {
    %c0_i32 = arith.constant 0 : i32
    %c0_i32_0 = arith.constant 0 : i32
    %c0_i32_1 = arith.constant 0 : i32
    %c0_i32_2 = arith.constant 0 : i32
    return %c0_i32, %c0_i32_0, %c0_i32_1 : i32, i32, i32
  }
  func.func @transform_4(%arg0: i32, %arg1: i32) -> (i32, i32) {
    %c0_i32 = arith.constant 0 : i32
    %c0_i32_0 = arith.constant 0 : i32
    %c0_i32_1 = arith.constant 0 : i32
    return %c0_i32, %c0_i32_0 : i32, i32
  }
  func.func @transform_5(%arg0: i32, %arg1: i32) -> i32 {
    %c0_i32 = arith.constant 0 : i32
    %c0_i32_0 = arith.constant 0 : i32
    return %c0_i32 : i32
  }
  func.func @transform_6(%arg0: i32, %arg1: i32) -> (i32, i32, i32) {
    %c0_i32 = arith.constant 0 : i32
    %c0_i32_0 = arith.constant 0 : i32
    return %arg0, %c0_i32, %arg1 : i32, i32, i32
  }
}

</mosaic_0001>

<bundles_post_ra>
// kernel: _lambda_.5
= control target key start
LH: loop header
LB: loop body
LE: loop exit
PB: predicated region body
PF: predicated region fallthrough
CT: control target
= control target key end

     0   :  { %11 = vsyncpa [#allocation3], 0  ;;  %s1554_s21 = smov 0   ;;  %s1556_s22 = smov 0   ;;  %s1736_s0 = inlined_call_operand.vmem [shape: f32[2,8,256], index: 0, kind: input, shape index: {}]   ;;  %s1737_s1 = inlined_call_operand.vmem [shape: f32[3,8,8], index: 1, kind: input, shape index: {}]   ;;  %s1738_s2 = inlined_call_operand.vmem [shape: f32[8,1], index: 2, kind: input, shape index: {}]   ;;  %s1739_s3 = inlined_call_operand.vmem [shape: f32[3,8,8], index: 3, kind: input, shape index: {}]   ;;  %s1740_s4 = inlined_call_operand.vmem [shape: f32[8,1], index: 4, kind: input, shape index: {}]   ;;  %s1741_s5 = inlined_call_operand.vmem [shape: f32[2], index: 5, kind: input, shape index: {}]   ;;  %s1742_s6 = inlined_call_operand.vmem [shape: f32[2,8,256], index: 6, kind: output, shape index: {}]  }
   0x1   :  { %s1558_s23 = smov 0  }
   0x2 LB: > { %s1352_s24 = sadd.s32 4294967295, %s1511_s23   ;;  %s29_s25 = sadd.s32 1, %s1507_s22  ;;  %s1511_s23 = sphi %s1558_s23, %s17_s23   ;;  %s1507_s22 = sphi %s1556_s22, %s1746_s22   ;;  %s1503_s21 = sphi %s1554_s21, %s1745_s21  }
   0x3   : > { %p31_p0 = scmp.ge.s32.totalorder %s29_s25, 2  ;;  %p1354_p1 = scmp.ge.s32.totalorder %s1511_s23, 1 }
   0x4   : > { %p195_p2 = scmp.lt.s32.totalorder %s1511_s23, 3  ;;  %p1579_p4 = scmp.eq.s32.totalorder %s1352_s24, 0 }
   0x5   : > { %s1748_s25 = smov (%p31_p0, %s29_s25), 0  ;;  %s220_s30 = sshll.u32 %s1741_s5, 4  ;;  %s221_s30 = int_to_ptr.vmem [resolvable:$true] %s220_s30 }
   0x6   : > { %p1575_p3 = pnand %p1354_p1, %p195_p2  ;;  %s1470_s7 = scalar_lea.vmem %s221_s30, 16 }
   0x7   : > { %p1471_p7 = scmp.ne.s32.totalorder %s221_s30, %s1470_s7  ;;  %p1478_p11 = scmp.lt.s32.totalorder %s221_s30, %s221_s30 }
   0x8   : > { %p1427_p5 = pneg %p1575_p3  ;;  %p1479_p12 = scmp.lt.s32.totalorder %s1470_s7, %s1470_s7 }
   0xa   : > { %p1428_p6 = pnand %p1579_p4, %p1427_p5  ;;  %p1480_p13 = por %p1479_p12, %p1478_p11 }
   0xc   : > { %p1472_p8 = pneg %p1428_p6 }
   0xe   : > { %p1473_p9 = pnand %p1472_p8, %p1471_p7 }
  0x10   : > { %p1474_p10 = pneg %p1473_p9 }
  0x12   : > { %p1481_p0 = pnand %p1480_p13, %p1474_p10 }
  0x14   : > { %1484 = shalt.err (!%p1481_p0)
}
  0x15   : > { %s1513_s8 = smov [#allocation2]   ;;  %246 = sbr.rel (%p1575_p3) target bundleno = 691 (0x2b3), region = 44 }
  0x16   : > { %1430 = dma.vmem_to_smem (!%p1428_p6), %s221_s30, 16, %s1513_s8, [#allocation3]  }
  0x1a   : > { %1498 = dma.done.wait (%p1579_p4), [#allocation3], 16  }
  0x1b   : > { %1500 = vsyncadd (%p1579_p4), [#allocation3], 4294967280 }
  0x1c   : > { %252 = sfence }
  0x1d   : > { %p286_p1 = scmp.lt.s32.totalorder %s1503_s21, 1  ;;  %s314_s9 = sld [smem:[#allocation2]]  ;;  %v306_v0 = vlaneseq  ;;  %v1514_v1 = vmov 0.0   ;;  %v1515_v7 = vmov 0   ;;  %v1364_v13 = vld [vmem:[%s1737_s1 + $0x8] sm:$0xff]  ;;  %vm370_vm3 = vcmask 64512  }
  0x1e   : > { %438 = vmatprep.mubr.f32.mxu0 %v1514_v1  ;;  %512 = vmatprep.mubr.f32.mxu1 %v1514_v1  ;;  %s1516_s14 = smov 127   ;;  %s1517_s15 = smov 1   ;;  %v369_v14 = vld [vmem:[%s1738_s2] sm:$0xff]  ;;  %v1365_v24 = vld [vmem:[%s1737_s1 + $0x10] sm:$0xff]  ;;  %vm1518_vm10 = vmmov 0   ;;  %v1378_v44 = vld [vmem:[%s1739_s3 + $0x8] sm:$0xff] }
  0x1f   : > { %s1750_s21 = smov (!%p286_p1, %s1503_s21), 1  ;;  %v1602_v2 = vand.u32 127, %v306_v0  ;;  %1463 = vset.pattern.permute.xlu0 %v1515_v7  ;;  %1464 = vset.pattern.permute.xlu1 %v1515_v7  ;;  %v364_v23 = vld [vmem:[%s1737_s1] sm:$0xff]  ;;  %s1363_s28 = sld [smem:[#allocation2 + $0x1]] }
  0x20   : > { %s1386_s10 = sshll.u32 %s1750_s21, 4  ;;  %v1241_v46 = vld [vmem:[%s1740_s4] sm:$0xff] }
  0x21   : > { %v1606_v3 = vadd.s32 128, %v1602_v2  ;;  %s293_s13 = scalar_lea.vmem %s1736_s0, %s1386_s10  ;;  %vm334_vm5 = vcmp.eq.s32.totalorder %v1602_v2, 0  ;;  %vm355_vm6 = vcmp.lt.s32.totalorder %v1602_v2, 127  ;;  %vm342_vm7 = vcmp.lt.s32.totalorder %v1602_v2, 1  ;;  %v1012_v63 = vld [vmem:[%s1739_s3] sm:$0xff]  ;;  %s303_s16 = scalar_lea.vmem %s1742_s6, %s1386_s10 }
  0x22   : > { %v1613_v4 = vld [vmem:[%s293_s13] sm:$0xff]  ;;  %v317_v6 = vld [vmem:[%s293_s13 + $0x8] sm:$0xff]  ;;  %vm1367_vm9 = vmneg %vm334_vm5 }
  0x23   : > { %v326_v5 = vstv %s314_s9  ;;  %vm313_vm0 = vcmp.lt.s32.totalorder %v1606_v3, 187  ;;  %vm324_vm1 = vcmp.ge.f32.partialorder %v1613_v4, 0.0  ;;  %vm337_vm4 = vcmp.eq.s32.totalorder %v1606_v3, 255 }
  0x24   : > { %v327_v8 = vmul.f32 %v326_v5, %v1613_v4  ;;  %v1620_v9 = vsel %vm313_vm0, %v317_v6, 0.0  ;;  %vm1370_vm8 = vmneg %vm337_vm4 }
  0x25   : > { %vm325_vm2 = vcmp.ge.f32.partialorder %v1620_v9, 0.0  ;;  %v328_v10 = vmul.f32 %v326_v5, %v1620_v9  ;;  %v604_v36 = vstv %s1363_s28 }
  0x26   : > { %v329_v11 = vsel %vm324_vm1, %v1613_v4, %v327_v8 }
  0x27   : > { %351 = vrot.lane.b32.xlu1 %v329_v11, %s1516_s14  ;;  %338 = vrot.lane.b32.xlu0 %v329_v11, %s1517_s15  ;;  %v330_v12 = vsel %vm325_vm2, %v1620_v9, %v328_v10  ;;  %v1382_v10 = vld [vmem:[%s1739_s3 + $0x10] sm:$0xff] }
  0x28   : > { %404 = vmatprep.subr.mxu0 %v330_v12 }
  0x29   : > { %405 = vmatpush1.msra.mxu0 %v329_v11 }
  0x2a   : > { %1366 = vmatmul.mubr.msk.f32.vlgmr.msra.gmra.mxu0 %vm370_vm3, %v1364_v13 }
  0x2b   : > { %353 = vrot.lane.b32.xlu1 %v330_v12, %s1516_s14  ;;  %340 = vrot.lane.b32.xlu0 %v330_v12, %s1517_s15 }
  0x2c   : > { %586 = vmatprep.mubr.f32.mxu0 %v1514_v1 }
  0x2f   : > { %597 = vperm.xlu0 %1463, %v369_v14   ;;  %834 = vrot.lane.b32.xlu1 %v330_v12, %s1517_s15 }
  0x33   : > { %1466 = vperm.xlu1 %1464, %v1514_v1  }
  0x99   : > { %v352_v15 = vpop.permute.xlu1 %351  ;;  %v339_v16 = vpop.permute.xlu0 %338 }
  0x9d   : > { %v354_v17 = vpop.permute.xlu1 %353  ;;  %v341_v18 = vpop.permute.xlu0 %340 }
  0x9e   : > { %v356_v19 = vsel %vm355_vm6, %v352_v15, %v354_v17  ;;  %v357_v20 = vsel %vm355_vm6, %v354_v17, %v352_v15  ;;  %v343_v21 = vsel %vm342_vm7, %v339_v16, %v341_v18  ;;  %v344_v22 = vsel %vm342_vm7, %v341_v18, %v339_v16 }
  0x9f   : > { %478 = vmatprep.subr.mxu1 %v343_v21  ;;  %1371 = vmatprep.subr.msk.mxu0 %vm1370_vm8, %v357_v20 }
  0xa0   : > { %1368 = vmatpush1.msk.msra.mxu1 %vm1367_vm9, %v344_v22  ;;  %553 = vmatpush1.msra.mxu0 %v356_v19 }
  0xa1   : > { %1369 = vmatmul.mubr.msk.f32.vlgmr.msra.gmra.mxu1 %vm370_vm3, %v364_v23  ;;  %1372 = vmatmul.mubr.msk.f32.vlgmr.msra.gmra.mxu0 %vm370_vm3, %v1365_v24  ;;  %v835_v25 = vpop.permute.xlu1 %834 }
  0xa2   : > { %1403 = vmatprep.subr.mxu0 %v1514_v1  ;;  %1398 = vmatprep.subr.mxu1 %v1514_v1 }
  0xa3   : > { %1404 = vmatpush3.msra.mxu0 %v1514_v1  ;;  %1399 = vmatpush3.msra.mxu1 %v1514_v1 }
  0xa4   : > { %1413 = vmatprep.subr.mxu0 %v1514_v1  ;;  %1408 = vmatprep.subr.mxu1 %v1514_v1 }
  0xa5   : > { %1405 = vmatprep.mubr.msk.f32.mxu0 %vm1518_vm10, %v1514_v1  ;;  %1400 = vmatprep.mubr.msk.f32.mxu1 %vm1518_vm10, %v1514_v1 }
  0xa6   : > { %1406 = vmatmul.mubr.msk.f32.vlgmr.msra.gmra.mxu0 %vm370_vm3, %v364_v23  ;;  %1401 = vmatmul.mubr.msk.f32.vlgmr.msra.gmra.mxu1 %vm370_vm3, %v1364_v13 }
  0xa7   : > { %1414 = vmatpush3.msra.mxu0 %v835_v25  ;;  %1415 = vmatprep.mubr.msk.f32.mxu0 %vm1518_vm10, %v1514_v1 }
  0xa8   : > { %1409 = vmatpush3.msra.mxu1 %v329_v11  ;;  %1410 = vmatprep.mubr.msk.f32.mxu1 %vm1518_vm10, %v1514_v1 }
  0xa9   : > { %1418 = vmatprep.subr.mxu1 %v1514_v1 }
  0xaa   : > { %1416 = vmatmul.mubr.msk.f32.vlgmr.msra.gmra.mxu0 %vm370_vm3, %v364_v23  ;;  %1411 = vmatmul.mubr.msk.f32.vlgmr.msra.gmra.mxu1 %vm370_vm3, %v1365_v24  ;;  %v598_v32 = vpop.permute.xlu0 %597 }
  0xab   : > { %1419 = vmatpush3.msra.mxu1 %v1514_v1  ;;  %1420 = vmatprep.mubr.msk.f32.mxu1 %vm1518_vm10, %v1514_v1 }
  0xac   : > { %1082 = vmatprep.mubr.f32.mxu0 %v1514_v1 }
  0xae   : > { %1421 = vmatmul.mubr.msk.f32.vlgmr.msra.gmra.mxu1 %vm370_vm3, %v1365_v24  ;;  %v1467_v57 = vpop.permute.xlu1 %1466 }
  0xaf   : > { %1156 = vmatprep.mubr.f32.mxu1 %v1514_v1  ;;  %v1468_v59 = vunpack.i.l.bf16 %v1467_v57 }
  0xea   : > { %v440_v26 = vpop.f32.mrf.mxu0 }
  0xec   : > { %v442_v27 = vpop.f32.mrf.mxu0 }
 0x161   : > { %v514_v28 = vpop.f32.mrf.mxu1  ;;  %v588_v29 = vpop.f32.mrf.mxu0 }
 0x162   : > { %v515_v30 = vadd.f32 %v514_v28, %v440_v26 }
 0x163   : > { %v516_v31 = vpop.f32.mrf.mxu1  ;;  %v590_v35 = vpop.f32.mrf.mxu0 }
 0x164   : > { %v593_v33 = vadd.f32 %v588_v29, %v515_v30  ;;  %v517_v34 = vadd.f32 %v516_v31, %v442_v27 }
 0x166   : > { %v594_v37 = vadd.f32 %v590_v35, %v517_v34  ;;  %v600_v38 = vadd.f32 %v598_v32, %v593_v33  ;;  %v678_v47 = vpop.f32.mrf.mxu1  ;;  %v748_v48 = vpop.f32.mrf.mxu0 }
 0x168   : > { %v601_v39 = vadd.f32 %v598_v32, %v594_v37  ;;  %vm602_vm11 = vcmp.ge.f32.partialorder %v600_v38, 0.0  ;;  %v605_v40 = vmul.f32 %v604_v36, %v600_v38  ;;  %v1402_v49 = vpop.f32.mrf.mxu1  ;;  %v1407_v50 = vpop.f32.mrf.mxu0 }
 0x16a   : > { %v606_v41 = vmul.f32 %v604_v36, %v601_v39  ;;  %v607_v42 = vsel %vm602_vm11, %v600_v38, %v605_v40  ;;  %vm603_vm12 = vcmp.ge.f32.partialorder %v601_v39, 0.0  ;;  %v818_v51 = vpop.f32.mrf.mxu1  ;;  %v903_v52 = vpop.f32.mrf.mxu0 }
 0x16b   : > { %986 = vrot.lane.b32.xlu0 %v607_v42, %s1517_s15 }
 0x16c   : > { %v608_v43 = vsel %vm603_vm12, %v601_v39, %v606_v41  ;;  %v1412_v53 = vpop.f32.mrf.mxu1  ;;  %v1417_v54 = vpop.f32.mrf.mxu0 }
 0x16d   : > { %1379 = vmatprep.subr.msk.mxu0 %vm313_vm0, %v608_v43  ;;  %v610_v45 = vsel %vm313_vm0, %v608_v43, 0.0 }
 0x16e   : > { %1049 = vmatpush1.msra.mxu0 %v607_v42  ;;  %988 = vrot.lane.b32.xlu1 %v610_v45, %s1517_s15  ;;  %v973_v55 = vpop.f32.mrf.mxu1 }
 0x16f   : > { %999 = vrot.lane.b32.xlu0 %v607_v42, %s1516_s14  ;;  %1380 = vmatmul.mubr.msk.f32.vlgmr.msra.gmra.mxu0 %vm370_vm3, %v1378_v44 }
 0x170   : > { %1232 = vmatprep.mubr.f32.mxu0 %v1514_v1  ;;  %v1422_v56 = vpop.f32.mrf.mxu1  ;;  %v1469_v1 = vunpack.i.h.bf16 %v1467_v57 }
 0x172   : > { %1001 = vrot.lane.b32.xlu1 %v610_v45, %s1516_s14 }
 0x173   : > { %1244 = vperm.xlu0 %1463, %v1241_v46  }
 0x1dd   : > { %v987_v58 = vpop.permute.xlu0 %986 }
 0x1e0   : > { %v989_v60 = vpop.permute.xlu1 %988 }
 0x1e1   : > { %v991_v61 = vsel %vm342_vm7, %v989_v60, %v987_v58  ;;  %v990_v62 = vsel %vm342_vm7, %v987_v58, %v989_v60  ;;  %v1000_v5 = vpop.permute.xlu0 %999 }
 0x1e2   : > { %1122 = vmatprep.subr.mxu1 %v990_v62  ;;  %v997_v0 = vsel %vm334_vm5, %v1468_v59, %v991_v61 }
 0x1e3   : > { %1123 = vmatpush1.msra.mxu1 %v997_v0 }
 0x1e4   : > { %v1002_v6 = vpop.permute.xlu1 %1001  ;;  %1381 = vmatmul.mubr.msk.f32.vlgmr.msra.gmra.mxu1 %vm370_vm3, %v1012_v63 }
 0x1e5   : > { %v1004_v7 = vsel %vm355_vm6, %v1002_v6, %v1000_v5  ;;  %v1003_v11 = vsel %vm355_vm6, %v1000_v5, %v1002_v6 }
 0x1e6   : > { %v1011_v8 = vsel %vm337_vm4, %v1469_v1, %v1004_v7 }
 0x1e7   : > { %1198 = vmatprep.subr.mxu0 %v1011_v8 }
 0x1e8   : > { %1199 = vmatpush1.msra.mxu0 %v1003_v11 }
 0x1e9   : > { %1383 = vmatmul.mubr.msk.f32.vlgmr.msra.gmra.mxu0 %vm370_vm3, %v1382_v10 }
 0x1ee   : > { %v1245_v19 = vpop.permute.xlu0 %1244 }
 0x22f   : > { %v1084_v12 = vpop.f32.mrf.mxu0 }
 0x231   : > { %v1086_v14 = vpop.f32.mrf.mxu0 }
 0x2a4   : > { %v1158_v13 = vpop.f32.mrf.mxu1 }
 0x2a5   : > { %v1159_v16 = vadd.f32 %v1158_v13, %v1084_v12 }
 0x2a6   : > { %v1160_v15 = vpop.f32.mrf.mxu1 }
 0x2a7   : > { %v1161_v3 = vadd.f32 %v1160_v15, %v1086_v14 }
 0x2a9   : > { %v1234_v17 = vpop.f32.mrf.mxu0 }
 0x2aa   : > { %v1239_v18 = vadd.f32 %v1234_v17, %v1159_v16 }
 0x2ab   : > { %v1236_v20 = vpop.f32.mrf.mxu0 }
 0x2ac   : > { %v1247_v21 = vadd.f32 %v1245_v19, %v1239_v18  ;;  %v1240_v22 = vadd.f32 %v1236_v20, %v1161_v3 }
 0x2ae   : > { %v1249_v2 = vadd.f32 %v1247_v21, %v1613_v4  ;;  %v1248_v23 = vadd.f32 %v1245_v19, %v1240_v22 }
 0x2b0   : > { %1251 = vst [vmem:[%s303_s16] sm:$0xff] %v1249_v2  ;;  %v1250_v24 = vadd.f32 %v1248_v23, %v1620_v9 }
 0x2b2   : > { %1252 = vst [vmem:[%s303_s16 + $0x8] sm:$0xff] %v1250_v24 }
 0x2b3 PF: > { %s17_s23 = sadd.s32 1, %s1511_s23   ;;  %s1745_s21 = smov %s1507_s22 }
 0x2b4   : > { %p14_p2 = scmp.ge.s32.totalorder %s17_s23, 4   ;;  %s1746_s22 = smov %s1748_s25 }
 0x2b6   :  { %16 = sbr.rel (!%p14_p2) target bundleno = 2 (0x2), region = 83 }
 0x2bb   :  { %1283 = vsyncpa [#allocation3], 1 }
 0x2bc   :  { %1285 = vsyncpa [#allocation3 + $0x1], 1 }

// kernel: _lambda_.4
= control target key start
LH: loop header
LB: loop body
LE: loop exit
PB: predicated region body
PF: predicated region fallthrough
CT: control target
= control target key end

     0   :  { %s3237_s0 = inlined_call_operand.vmem [shape: f32[2,16,512], index: 0, kind: input, shape index: {}]   ;;  %s3238_s1 = inlined_call_operand.vmem [shape: f32[3,16,16], index: 1, kind: input, shape index: {}]   ;;  %s3239_s2 = inlined_call_operand.vmem [shape: f32[16,1], index: 2, kind: input, shape index: {}]   ;;  %s3240_s3 = inlined_call_operand.vmem [shape: f32[3,16,16], index: 3, kind: input, shape index: {}]   ;;  %s3241_s4 = inlined_call_operand.vmem [shape: f32[16,1], index: 4, kind: input, shape index: {}]   ;;  %s3242_s5 = inlined_call_operand.vmem [shape: f32[2], index: 5, kind: input, shape index: {}]   ;;  %s3243_s6 = inlined_call_operand.vmem [shape: f32[16,16], index: 6, kind: input, shape index: {}]   ;;  %s3244_s7 = inlined_call_operand.vmem [shape: f32[8,1], index: 7, kind: input, shape index: {}]   ;;  %s3245_s8 = inlined_call_operand.hbm [shape: f32[2,16,128], index: 8, kind: output, shape index: {0}]   ;;  %s3246_s9 = inlined_call_operand.vmem [shape: f32[2,8,256], index: 9, kind: output, shape index: {1}]  }
   0x1   :  { %3249 = sst [smem:[#allocation9_spill]] %s3237_s0 }
   0x2   :  { %15 = vsyncpa [#allocation5], 0 }
   0x3   :  { %16 = vsyncpa [#allocation4], 0 }
   0x4   :  { %18 = vsyncpa [#allocation4 + $0x1], 0  ;;  %s2671_s30 = smov 0   ;;  %s2673_s10 = smov 0  }
   0x5   :  { %s2675_s11 = smov 0   ;;  %s2677_s12 = smov 0  }
   0x6   :  { %s2679_s13 = smov 0   ;;  %s2681_s14 = smov 0  }
   0x7 LB: > { %s2114_s15 = sadd.s32 4294967295, %s2610_s14   ;;  %s2115_s16 = sadd.s32 4294967294, %s2610_s14   ;;  %s2610_s14 = sphi %s2681_s14, %s24_s14   ;;  %s2606_s13 = sphi %s2679_s13, %s3263_s13   ;;  %s2602_s12 = sphi %s2677_s12, %s3262_s12   ;;  %s2598_s11 = sphi %s2675_s11, %s3261_s11   ;;  %s2594_s10 = sphi %s2673_s10, %s3260_s10   ;;  %s2590_s30 = sphi %s2671_s30, %s3259_s30  }
   0x8   : > { %s36_s17 = sadd.s32 1, %s2606_s13  ;;  %s45_s18 = sadd.s32 1, %s2598_s11 }
   0x9   : > { %p38_p0 = scmp.ge.s32.totalorder %s36_s17, 2  ;;  %p52_p1 = scmp.ne.s32.totalorder %s2598_s11, %s2594_s10 }
   0xa   : > { %p53_p2 = scmp.eq.s32.totalorder %s2610_s14, 0  ;;  %p231_p3 = scmp.eq.s32.totalorder %s2114_s15, 1 }
   0xb   : > { %s3265_s17 = smov (%p38_p0, %s36_s17), 0  ;;  %p236_p6 = scmp.ne.s32.totalorder %s2594_s10, %s2590_s30 }
   0xc   : > { %p2710_p4 = por %p53_p2, %p52_p1  ;;  %p2714_p5 = por %p231_p3, %p52_p1 }
   0xd   : > { %s40_s21 = ssub.s32 %s2606_s13, %s3265_s17  ;;  %p237_p8 = scmp.eq.s32.totalorder %s2115_s16, 1 }
   0xe   : > { %s3251_s20 = scalar_select %p2714_p5, 1, 0 }
   0xf   : > { %p43_p7 = scmp.eq.s32.totalorder %s40_s21, 0  ;;  %p2116_p9 = scmp.ge.s32.totalorder %s2610_s14, 1 }
  0x10   : > { %p272_p10 = scmp.lt.s32.totalorder %s2610_s14, 3  ;;  %p2727_p11 = por %p237_p8, %p236_p6 }
  0x11   : > { %s2725_s22 = scalar_select %p43_p7, %s2598_s11, %s45_s18  }
  0x12   : > { %s3252_s23 = scalar_select %p2727_p11, 1, 0 }
  0x13   : > { %p2731_p12 = pnand %p2116_p9, %p272_p10  ;;  %p2735_p13 = scmp.eq.s32.totalorder %s2114_s15, 0 }
  0x14   : > { %s297_s28 = sshll.u32 %s3242_s5, 4  ;;  %s298_s28 = int_to_ptr.vmem [resolvable:$true] %s297_s28 }
  0x15   : > { %p2436_p0 = pneg %p2731_p12  ;;  %s2515_s29 = scalar_lea.vmem %s298_s28, 16 }
  0x16   : > { %p2516_p2 = scmp.ne.s32.totalorder %s298_s28, %s2515_s29  ;;  %p2523_p8 = scmp.lt.s32.totalorder %s298_s28, %s298_s28 }
  0x17   : > { %p2437_p1 = pnand %p2735_p13, %p2436_p0  ;;  %p2524_p9 = scmp.lt.s32.totalorder %s2515_s29, %s2515_s29 }
  0x19   : > { %p2517_p3 = pneg %p2437_p1  ;;  %p2525_p10 = por %p2524_p9, %p2523_p8 }
  0x1b   : > { %p2518_p6 = pnand %p2517_p3, %p2516_p2 }
  0x1d   : > { %p2519_p7 = pneg %p2518_p6 }
  0x1f   : > { %p2526_p11 = pnand %p2525_p10, %p2519_p7 }
  0x21   : > { %2529 = shalt.err (!%p2526_p11)
}
  0x22   : > { %s2612_s15 = smov [#allocation3]   ;;  %p2118_p5 = scmp.ge.s32.totalorder %s2610_s14, 2 }
  0x23   : > { %2439 = dma.vmem_to_smem (!%p2437_p1), %s298_s28, 16, %s2612_s15, [#allocation5]  }
  0x24   : > { %310 = sbr.rel (%p2118_p5) target bundleno = 53 (0x35), region = 44 }
  0x29   : > { %313 = sbr.rel (!%p2710_p4) target bundleno = 53 (0x35), region = 48  ;;  %s315_s16 = sand.u32 (%p2710_p4), 1, %s2598_s11  }
  0x2a   : > { %s2304_s18 = sshll.u32 (%p2710_p4), %s2606_s13, 6  ;;  %s2119_s21 = sshll.u32 (%p2710_p4), %s315_s16, 4 }
  0x2b   : > { %s3255_s0 = sld [smem:[#allocation9_spill]] (%p2710_p4)  ;;  %s317_s28 = scalar_lea.vmem (%p2710_p4), [#allocation2], %s2119_s21 }
  0x31   : > { %s321_s29 = scalar_lea.vmem %s3255_s0, %s2304_s18 }
  0x32   : > { %v352_v0 = vld [vmem:[%s321_s29] sm:$0xff] }
  0x33   : > { %v354_v1 = vld [vmem:[%s321_s29 + $0x20] sm:$0xff]  ;;  %353 = vst [vmem:[%s317_s28] sm:$0xff] %v352_v0 }
  0x34   : > { %355 = vst [vmem:[%s317_s28 + $0x8] sm:$0xff] %v354_v1 }
  0x35 PF: > { %364 = sbr.rel (%p2731_p12) target bundleno = 1117 (0x45d), region = 86  ;;  %s3248_s19 = sand.u32 (!%p2731_p12), 1, %s2594_s10  }
  0x36   : > { %s2761_s15 = sshll.u32 (!%p2731_p12), %s3248_s19, 4 }
  0x37   : > { %s369_s16 = scalar_lea.vmem (!%p2731_p12), [#allocation2], %s2761_s15 }
  0x3a   : > { %2581 = dma.done.wait (%p2735_p13), [#allocation5], 16  }
  0x3b   : > { %2583 = vsyncadd (%p2735_p13), [#allocation5], 4294967280 }
  0x3c   : > { %377 = sfence }
  0x3d   : > { %v427_v2 = vlaneseq  ;;  %s432_s18 = sld [smem:[#allocation3]]  ;;  %v2771_v3 = vld [vmem:[%s3238_s1 + $0x10] sm:$0xff]  ;;  %vm478_vm0 = vcmask 130048   ;;  %v2776_v4 = vld [vmem:[%s3238_s1] sm:$0xff]  ;;  %v435_v6 = vld [vmem:[%s369_s16 + $0x8] sm:$0xff]  ;;  %v2613_v8 = vmov 0  }
  0x3e   : > { %v434_v7 = vld [vmem:[%s369_s16] sm:$0xff]  ;;  %2356 = vmatprep.mubr.msk.f32.mxu0 %vm478_vm0, %v2771_v3  ;;  %2363 = vmatprep.mubr.msk.f32.mxu1 %vm478_vm0, %v2776_v4  ;;  %s2614_s25 = smov 127   ;;  %s2615_s29 = smov 1   ;;  %v2130_v16 = vld [vmem:[%s3238_s1 + $0x18] sm:$0xff]  ;;  %v477_v18 = vld [vmem:[%s3239_s2 + $0x8] sm:$0xff]  ;;  %v2616_v20 = vmov 0.0  }
  0x3f   : > { %v2779_v5 = vand.u32 127, %v427_v2  ;;  %2503 = vset.pattern.permute.xlu0 %v2613_v8  ;;  %2504 = vset.pattern.permute.xlu1 %v2613_v8  ;;  %v2131_v17 = vld [vmem:[%s3238_s1 + $0x20] sm:$0xff]  ;;  %v469_v25 = vld [vmem:[%s3238_s1 + $0x8] sm:$0xff]  ;;  %s2128_s21 = sld [smem:[#allocation3 + $0x1]]  ;;  %v2157_v32 = vld [vmem:[%s3240_s3 + $0x10] sm:$0xff]  ;;  %s3098_s27 = scalar_lea.vmem [#allocation6], %s2761_s15 }
  0x40   : > { %v476_v19 = vld [vmem:[%s3239_s2] sm:$0xff]  ;;  %v2132_v26 = vld [vmem:[%s3238_s1 + $0x28] sm:$0xff]  ;;  %v2158_v56 = vld [vmem:[%s3240_s3 + $0x18] sm:$0xff]  ;;  %s2306_s15 = sshll.u32 %s2602_s12, 8  ;;  %s1981_s28 = sshll.u32 %s3098_s27, 4  ;;  %s3182_s28 = int_to_ptr.vmem [resolvable:$true] %s1981_s28 }
  0x41   : > { %vm431_vm1 = vcmp.lt.s32.totalorder %v2779_v5, 94  ;;  %vm450_vm4 = vcmp.eq.s32.totalorder %v2779_v5, 0  ;;  %vm451_vm5 = vcmp.eq.s32.totalorder %v2779_v5, 127  ;;  %v1193_v36 = vld [vmem:[%s3240_s3] sm:$0xff]  ;;  %v1447_v62 = vld [vmem:[%s3241_s4 + $0x8] sm:$0xff]  ;;  %s2530_s26 = scalar_lea.vmem %s3182_s28, 256 }
  0x42   : > { %v2788_v9 = vsel %vm431_vm1, %v435_v6, 0.0  ;;  %v2792_v10 = vsel %vm431_vm1, %v434_v7, 0.0  ;;  %vm2135_vm6 = vmneg %vm450_vm4  ;;  %v2165_v59 = vld [vmem:[%s3240_s3 + $0x20] sm:$0xff]  ;;  %p2531_p4 = scmp.ne.s32.totalorder %s3182_s28, %s2530_s26  ;;  %p3257_p11 = scmp.ne.s32.totalorder %s3251_s20, 0 }
  0x43   : > { %vm441_vm2 = vcmp.ge.f32.partialorder %v2788_v9, 0.0  ;;  %v442_v11 = vstv %s432_s18  ;;  %vm440_vm3 = vcmp.ge.f32.partialorder %v2792_v10, 0.0  ;;  %vm2141_vm7 = vmneg %vm451_vm5  ;;  %v1446_v63 = vld [vmem:[%s3241_s4] sm:$0xff]  ;;  %s3180_s18 = scalar_lea.hbm %s3245_s8, %s2306_s15  ;;  %s2618_s19 = smov [#allocation6]  }
  0x44   : > { %v444_v12 = vmul.f32 %v442_v11, %v2788_v9  ;;  %v443_v13 = vmul.f32 %v442_v11, %v2792_v10  ;;  %v1466_v0 = vld [vmem:[%s3244_s7] sm:$0xff]  ;;  %p2532_p12 = pnand %p2531_p4, %p3257_p11 }
  0x45   : > { %v738_v42 = vstv %s2128_s21  ;;  %s3256_s21 = sand.u32 1, %s2594_s10  }
  0x46   : > { %v446_v14 = vsel %vm441_vm2, %v2788_v9, %v444_v12  ;;  %v445_v15 = vsel %vm440_vm3, %v2792_v10, %v443_v13  ;;  %s3186_s24 = scalar_lea.sflag [#allocation4], %s3256_s21  ;;  %p2533_p13 = pneg %p2532_p12 }
  0x47   : > { %462 = vrot.lane.b32.xlu1 %v446_v14, %s2614_s25  ;;  %454 = vrot.lane.b32.xlu0 %v446_v14, %s2615_s29 }
  0x48   : > { %2352 = vmatprep.subr.mxu0 %v446_v14 }
  0x49   : > { %2353 = vmatpush3.msra.mxu0 %v446_v14 }
  0x4a   : > { %2354 = vmatprep.subr.mxu0 %v445_v15 }
  0x4b   : > { %460 = vrot.lane.b32.xlu1 %v445_v15, %s2614_s25  ;;  %452 = vrot.lane.b32.xlu0 %v445_v15, %s2615_s29 }
  0x4c   : > { %2355 = vmatpush3.msra.mxu0 %v445_v15 }
  0x4d   : > { %2357 = vmatmul.mubr.msk.f32.vlgmr.msra.gmra.mxu0 %vm478_vm0, %v2130_v16 }
  0x4e   : > { %2370 = vmatprep.mubr.msk.f32.mxu0 %vm478_vm0, %v2131_v17 }
  0x4f   : > { %731 = vperm.xlu0 %2503, %v477_v18   ;;  %726 = vperm.xlu1 %2504, %v476_v19  }
  0x53   : > { %2506 = vperm.xlu0 %2503, %v2616_v20   ;;  %992 = vrot.lane.b32.xlu1 %v446_v14, %s2615_s29 }
  0x57   : > { %2511 = vperm.xlu0 %2503, %v2616_v20   ;;  %990 = vrot.lane.b32.xlu1 %v445_v15, %s2615_s29 }
  0xb9   : > { %v463_v21 = vpop.permute.xlu1 %462  ;;  %v455_v22 = vpop.permute.xlu0 %454 }
  0xba   : > { %2359 = vmatprep.subr.msk.mxu1 %vm2135_vm6, %v455_v22  ;;  %2366 = vmatprep.subr.msk.mxu0 %vm2141_vm7, %v463_v21 }
  0xbb   : > { %2360 = vmatpush3.msk.msra.mxu1 %vm2135_vm6, %v455_v22  ;;  %2367 = vmatpush3.msk.msra.mxu0 %vm2141_vm7, %v463_v21 }
  0xbd   : > { %v461_v23 = vpop.permute.xlu1 %460  ;;  %v453_v24 = vpop.permute.xlu0 %452 }
  0xbe   : > { %2361 = vmatprep.subr.msk.mxu1 %vm2135_vm6, %v453_v24  ;;  %2368 = vmatprep.subr.msk.mxu0 %vm2141_vm7, %v461_v23 }
  0xbf   : > { %2362 = vmatpush3.msk.msra.mxu1 %vm2135_vm6, %v453_v24  ;;  %2369 = vmatpush3.msk.msra.mxu0 %vm2141_vm7, %v461_v23  ;;  %v2166_v23 = vld [vmem:[%s3240_s3 + $0x28] sm:$0xff]  ;;  %v1464_v24 = vld [vmem:[%s3243_s6] sm:$0xff] }
  0xc0   : > { %2364 = vmatmul.mubr.msk.f32.vlgmr.msra.gmra.mxu1 %vm478_vm0, %v469_v25  ;;  %2371 = vmatmul.mubr.msk.f32.vlgmr.msra.gmra.mxu0 %vm478_vm0, %v2132_v26 }
  0xc1   : > { %2378 = vmatprep.subr.mxu0 %v2616_v20  ;;  %2380 = vmatprep.mubr.msk.f32.mxu0 %vm478_vm0, %v2776_v4 }
  0xc2   : > { %2379 = vmatpush3.msra.mxu0 %v2616_v20  ;;  %2373 = vmatprep.subr.mxu1 %v2616_v20 }
  0xc3   : > { %2374 = vmatpush3.msra.mxu1 %v2616_v20  ;;  %2375 = vmatprep.mubr.msk.f32.mxu1 %vm478_vm0, %v2771_v3 }
  0xc4   : > { %2381 = vmatmul.mubr.msk.f32.vlgmr.msra.gmra.mxu0 %vm478_vm0, %v469_v25  ;;  %2376 = vmatmul.mubr.msk.f32.vlgmr.msra.gmra.mxu1 %vm478_vm0, %v2130_v16  ;;  %v1194_v16 = vld [vmem:[%s3240_s3 + $0x8] sm:$0xff] }
  0xc5   : > { %2394 = vmatprep.mubr.msk.f32.mxu0 %vm478_vm0, %v2776_v4  ;;  %2383 = vmatprep.subr.mxu1 %v446_v14 }
  0xc6   : > { %2384 = vmatpush3.msra.mxu1 %v446_v14  ;;  %2387 = vmatprep.mubr.msk.f32.mxu1 %vm478_vm0, %v2131_v17 }
  0xc7   : > { %2385 = vmatprep.subr.mxu1 %v445_v15 }
  0xc8   : > { %2386 = vmatpush3.msra.mxu1 %v445_v15 }
  0xc9   : > { %2388 = vmatmul.mubr.msk.f32.vlgmr.msra.gmra.mxu1 %vm478_vm0, %v2132_v26  ;;  %2397 = vmatprep.subr.mxu1 %v2616_v20 }
  0xca   : > { %2398 = vmatpush3.msra.mxu1 %v2616_v20  ;;  %2399 = vmatprep.mubr.msk.f32.mxu1 %vm478_vm0, %v2131_v17  ;;  %v727_v27 = vpop.permute.xlu1 %726  ;;  %v732_v39 = vpop.permute.xlu0 %731 }
  0xcd   : > { %2400 = vmatmul.mubr.msk.f32.vlgmr.msra.gmra.mxu1 %vm478_vm0, %v2132_v26 }
  0xce   : > { %v993_v28 = vpop.permute.xlu1 %992  ;;  %2413 = vmatprep.mubr.msk.f32.mxu1 %vm478_vm0, %v1193_v36  ;;  %v2507_v4 = vpop.permute.xlu0 %2506 }
  0xcf   : > { %2390 = vmatprep.subr.mxu0 %v993_v28  ;;  %v2508_v7 = vunpack.i.l.bf16 %v2507_v4  ;;  %v2509_v11 = vunpack.i.h.bf16 %v2507_v4 }
  0xd0   : > { %2391 = vmatpush3.msra.mxu0 %v993_v28 }
  0xd2   : > { %v991_v29 = vpop.permute.xlu1 %990  ;;  %v2512_v6 = vpop.permute.xlu0 %2511 }
  0xd3   : > { %2392 = vmatprep.subr.mxu0 %v991_v29  ;;  %v2513_v14 = vunpack.i.l.bf16 %v2512_v6  ;;  %v2514_v18 = vunpack.i.h.bf16 %v2512_v6 }
  0xd4   : > { %2393 = vmatpush3.msra.mxu0 %v991_v29 }
  0xd5   : > { %2395 = vmatmul.mubr.msk.f32.vlgmr.msra.gmra.mxu0 %vm478_vm0, %v469_v25  ;;  %v2918_v25 = vshrl.u32 %v427_v2, 7 }
  0xd6   : > { %2406 = vmatprep.mubr.msk.f32.mxu0 %vm478_vm0, %v2157_v32 }
  0xd7   : > { %v1483_v26 = vadd.s32 120, %v2918_v25  ;;  %v1482_v28 = vadd.s32 112, %v2918_v25  ;;  %v1481_v29 = vadd.s32 104, %v2918_v25 }
  0xd9   : > { %v1499_v32 = vmul.u32 2, %v1482_v28 }
 0x10d   : > { %v2358_v30 = vpop.f32.mrf.mxu0 }
 0x10f   : > { %v551_v31 = vpop.f32.mrf.mxu0 }
 0x180   : > { %v2365_v33 = vpop.f32.mrf.mxu1  ;;  %v2372_v34 = vpop.f32.mrf.mxu0 }
 0x181   : > { %v638_v35 = vadd.f32 %v2365_v33, %v2358_v30  ;;  %v1480_v30 = vadd.s32 96, %v2918_v25  ;;  %v1498_v33 = vmul.u32 2, %v1481_v29 }
 0x182   : > { %v632_v37 = vpop.f32.mrf.mxu1  ;;  %v713_v38 = vpop.f32.mrf.mxu0 }
 0x183   : > { %v723_v40 = vadd.f32 %v2372_v34, %v638_v35  ;;  %v633_v41 = vadd.f32 %v632_v37, %v551_v31  ;;  %v1500_v31 = vmul.u32 2, %v1483_v26  ;;  %v1497_v34 = vmul.u32 2, %v1480_v30 }
 0x184   : > { %v2377_v43 = vpop.f32.mrf.mxu1  ;;  %v2382_v44 = vpop.f32.mrf.mxu0  ;;  %v2937_v37 = vsub.s32 %v2779_v5, %v1499_v32 }
 0x185   : > { %v735_v45 = vadd.f32 %v732_v39, %v723_v40  ;;  %v722_v46 = vadd.f32 %v713_v38, %v633_v41  ;;  %v2931_v2 = vsub.s32 %v2779_v5, %v1500_v31  ;;  %v2943_v39 = vsub.s32 %v2779_v5, %v1498_v33 }
 0x186   : > { %v812_v47 = vpop.f32.mrf.mxu1  ;;  %v887_v48 = vpop.f32.mrf.mxu0  ;;  %v1479_v41 = vadd.s32 88, %v2918_v25  ;;  %v2617_v43 = vmov 1.0   ;;  %vm1657_vm13 = vcmp.eq.s32.totalorder %v2937_v37, 1 }
 0x187   : > { %v740_v49 = vmul.f32 %v738_v42, %v735_v45  ;;  %v734_v50 = vadd.f32 %v727_v27, %v722_v46  ;;  %vm737_vm8 = vcmp.ge.f32.partialorder %v735_v45, 0.0  ;;  %v2922_v27 = vadd.s32 128, %v2779_v5 }
 0x188   : > { %vm1659_vm11 = vcmp.eq.s32.totalorder %v2931_v2, 1  ;;  %vm1655_vm15 = vcmp.eq.s32.totalorder %v2943_v39, 1  ;;  %v1496_v44 = vmul.u32 2, %v1479_v41  ;;  %v1477_v46 = vadd.s32 72, %v2918_v25 }
 0x189   : > { %v739_v51 = vmul.f32 %v738_v42, %v734_v50  ;;  %v742_v52 = vsel %vm737_vm8, %v735_v45, %v740_v49  ;;  %vm736_vm9 = vcmp.ge.f32.partialorder %v734_v50, 0.0  ;;  %v2389_v53 = vpop.f32.mrf.mxu1  ;;  %v2928_v35 = vsub.s32 %v2922_v27, %v1500_v31 }
 0x18a   : > { %2402 = vmatprep.subr.msk.mxu0 %vm431_vm1, %v742_v52  ;;  %v744_v54 = vsel %vm431_vm1, %v742_v52, 0.0  ;;  %v2934_v36 = vsub.s32 %v2922_v27, %v1499_v32  ;;  %v2940_v38 = vsub.s32 %v2922_v27, %v1498_v33  ;;  %v2946_v40 = vsub.s32 %v2922_v27, %v1497_v34 }
 0x18b   : > { %2403 = vmatpush3.msk.msra.mxu0 %vm431_vm1, %v742_v52  ;;  %1163 = vrot.lane.b32.xlu1 %v744_v54, %s2615_s29  ;;  %v741_v55 = vsel %vm736_vm9, %v734_v50, %v739_v51  ;;  %v962_v57 = vpop.f32.mrf.mxu1  ;;  %vm1660_vm10 = vcmp.eq.s32.totalorder %v2928_v35, 1  ;;  %v2953_v42 = vsub.s32 %v2779_v5, %v1497_v34  ;;  %v1478_v45 = vadd.s32 80, %v2918_v25 }
 0x18c   : > { %2404 = vmatprep.subr.msk.mxu0 %vm431_vm1, %v741_v55  ;;  %v743_v58 = vsel %vm431_vm1, %v741_v55, 0.0  ;;  %vm1658_vm12 = vcmp.eq.s32.totalorder %v2934_v36, 1  ;;  %vm1656_vm14 = vcmp.eq.s32.totalorder %v2940_v38, 1  ;;  %v2968_v47 = vsub.s32 %v2922_v27, %v1496_v44 }
 0x18d   : > { %2405 = vmatpush3.msk.msra.mxu0 %vm431_vm1, %v741_v55  ;;  %1161 = vrot.lane.b32.xlu0 %v743_v58, %s2615_s29  ;;  %v2401_v60 = vpop.f32.mrf.mxu1  ;;  %vm1654_vm1 = vcmp.eq.s32.totalorder %v2946_v40, 1  ;;  %vm1653_vm2 = vcmp.eq.s32.totalorder %v2953_v42, 1  ;;  %v2971_v48 = vsub.s32 %v2779_v5, %v1496_v44  ;;  %v1476_v49 = vadd.s32 64, %v2918_v25 }
 0x18e   : > { %2407 = vmatmul.mubr.msk.f32.vlgmr.msra.gmra.mxu0 %vm478_vm0, %v2158_v56  ;;  %v1475_v50 = vadd.s32 56, %v2918_v25  ;;  %v1495_v51 = vmul.u32 2, %v1478_v45  ;;  %v1494_v52 = vmul.u32 2, %v1477_v46  ;;  %vm1652_vm3 = vcmp.eq.s32.totalorder %v2968_v47, 1 }
 0x18f   : > { %1179 = vrot.lane.b32.xlu1 %v744_v54, %s2614_s25  ;;  %2420 = vmatprep.mubr.msk.f32.mxu0 %vm478_vm0, %v2165_v59  ;;  %v1137_v61 = vpop.f32.mrf.mxu1  ;;  %v1493_v57 = vmul.u32 2, %v1476_v49  ;;  %v1474_v59 = vadd.s32 48, %v2918_v25  ;;  %v1473_v60 = vadd.s32 40, %v2918_v25 }
 0x190   : > { %v2981_v53 = vsub.s32 %v2922_v27, %v1495_v51  ;;  %v2984_v54 = vsub.s32 %v2779_v5, %v1495_v51  ;;  %v2987_v55 = vsub.s32 %v2922_v27, %v1494_v52  ;;  %v2990_v56 = vsub.s32 %v2779_v5, %v1494_v52 }
 0x191   : > { %1177 = vrot.lane.b32.xlu0 %v743_v58, %s2614_s25  ;;  %v1492_v58 = vmul.u32 2, %v1475_v50  ;;  %v3002_v61 = vsub.s32 %v2922_v27, %v1493_v57 }
 0x192   : > { %vm1649_vm6 = vcmp.eq.s32.totalorder %v2984_v54, 1  ;;  %vm1648_vm7 = vcmp.eq.s32.totalorder %v2987_v55, 1  ;;  %vm1647_vm8 = vcmp.eq.s32.totalorder %v2990_v56, 1 }
 0x193   : > { %1455 = vperm.xlu1 %2504, %v1447_v62   ;;  %v3006_v62 = vsub.s32 %v2779_v5, %v1493_v57  ;;  %vm1646_vm9 = vcmp.eq.s32.totalorder %v3002_v61, 1 }
 0x195   : > { %1450 = vperm.xlu0 %2503, %v1446_v63   ;;  %v2396_v1 = vpop.f32.mrf.mxu0  ;;  %v3009_v63 = vsub.s32 %v2922_v27, %v1492_v58 }
 0x196   : > { %v1491_v1 = vmul.u32 2, %v1474_v59 }
 0x197   : > { %1950 = vperm.xlu1 %2504, %v1466_v0   ;;  %v1062_v3 = vpop.f32.mrf.mxu0  ;;  %v3012_v0 = vsub.s32 %v2779_v5, %v1492_v58 }
 0x198   : > { %v1490_v3 = vmul.u32 2, %v1473_v60  ;;  %v3022_v4 = vsub.s32 %v2922_v27, %v1491_v1  ;;  %v3025_v6 = vsub.s32 %v2779_v5, %v1491_v1  ;;  %v1465_v1 = vld [vmem:[%s3243_s6 + $0x8] sm:$0xff] }
 0x1fd   : > { %v1164_v8 = vpop.permute.xlu1 %1163 }
 0x1fe   : > { %v1176_v12 = vsel %vm450_vm4, %v2508_v7, %v1164_v8  ;;  %v3029_v7 = vsub.s32 %v2922_v27, %v1490_v3  ;;  %v3032_v8 = vsub.s32 %v2779_v5, %v1490_v3 }
 0x1ff   : > { %2409 = vmatprep.subr.mxu1 %v1176_v12  ;;  %v1162_v13 = vpop.permute.xlu0 %1161 }
 0x200   : > { %2410 = vmatpush3.msra.mxu1 %v1176_v12  ;;  %v1175_v15 = vsel %vm450_vm4, %v2509_v11, %v1162_v13  ;;  %vm1651_vm4 = vcmp.eq.s32.totalorder %v2971_v48, 1  ;;  %v1472_v11 = vadd.s32 32, %v2918_v25  ;;  %v1471_v12 = vadd.s32 24, %v2918_v25 }
 0x201   : > { %v1180_v17 = vpop.permute.xlu1 %1179  ;;  %2411 = vmatprep.subr.mxu1 %v1175_v15 }
 0x202   : > { %2412 = vmatpush3.msra.mxu1 %v1175_v15  ;;  %v1192_v19 = vsel %vm451_vm5, %v2513_v14, %v1180_v17  ;;  %v1489_v13 = vmul.u32 2, %v1472_v11  ;;  %v1488_v14 = vmul.u32 2, %v1471_v12  ;;  %v1470_v15 = vadd.s32 16, %v2918_v25 }
 0x203   : > { %2414 = vmatmul.mubr.msk.f32.vlgmr.msra.gmra.mxu1 %vm478_vm0, %v1194_v16  ;;  %2416 = vmatprep.subr.mxu0 %v1192_v19  ;;  %v1178_v21 = vpop.permute.xlu0 %1177  ;;  %v1469_v16 = vadd.s32 8, %v2918_v25 }
 0x204   : > { %2417 = vmatpush3.msra.mxu0 %v1192_v19  ;;  %v1191_v22 = vsel %vm451_vm5, %v2514_v18, %v1178_v21  ;;  %2427 = vmatprep.mubr.msk.f32.mxu1 %vm478_vm0, %v1464_v24  ;;  %vm1650_vm5 = vcmp.eq.s32.totalorder %v2981_v53, 1  ;;  %v3047_v17 = vsub.s32 %v2922_v27, %v1489_v13  ;;  %v3050_v18 = vsub.s32 %v2779_v5, %v1489_v13 }
 0x205   : > { %2418 = vmatprep.subr.mxu0 %v1191_v22  ;;  %v1485_v19 = vmul.u32 2, %v2918_v25  ;;  %v3055_v21 = vsub.s32 %v2922_v27, %v1488_v14  ;;  %v1486_v24 = vmul.u32 2, %v1469_v16 }
 0x206   : > { %2419 = vmatpush3.msra.mxu0 %v1191_v22  ;;  %v3058_v22 = vsub.s32 %v2779_v5, %v1488_v14 }
 0x207   : > { %2421 = vmatmul.mubr.msk.f32.vlgmr.msra.gmra.mxu0 %vm478_vm0, %v2166_v23  ;;  %2235 = vmatprep.subr.msk.mxu0 %vm1660_vm10, %v2617_v43  ;;  %vm1645_vm10 = vcmp.eq.s32.totalorder %v3006_v62, 1  ;;  %v1487_v23 = vmul.u32 2, %v1470_v15  ;;  %v3074_v29 = vsub.s32 %v2922_v27, %v1486_v24  ;;  %v3077_v30 = vsub.s32 %v2779_v5, %v1486_v24 }
 0x208   : > { %1870 = vmatprep.mubr.f32.mxu0 %v2616_v20  ;;  %2236 = vmatpush1.msk.msra.mxu0 %vm1659_vm11, %v2617_v43  ;;  %vm1644_vm11 = vcmp.eq.s32.totalorder %v3009_v63, 1  ;;  %v3084_v31 = vsub.s32 %v2922_v27, %v1485_v19 }
 0x209   : > { %2237 = vmatprep.subr.msk.mxu0 %vm1658_vm12, %v2617_v43  ;;  %vm1643_vm12 = vcmp.eq.s32.totalorder %v3012_v0, 1  ;;  %v3067_v26 = vsub.s32 %v2922_v27, %v1487_v23  ;;  %v3071_v28 = vsub.s32 %v2779_v5, %v1487_v23 }
 0x20a   : > { %2238 = vmatpush1.msk.msra.mxu0 %vm1657_vm13, %v2617_v43  ;;  %vm1642_vm13 = vcmp.eq.s32.totalorder %v3022_v4, 1 }
 0x20b   : > { %2239 = vmatprep.subr.msk.mxu0 %vm1656_vm14, %v2617_v43  ;;  %vm1641_vm14 = vcmp.eq.s32.totalorder %v3025_v6, 1 }
 0x20c   : > { %2240 = vmatpush1.msk.msra.mxu0 %vm1655_vm15, %v2617_v43  ;;  %vm1640_vm15 = vcmp.eq.s32.totalorder %v3029_v7, 1 }
 0x20d   : > { %2241 = vmatprep.subr.msk.mxu0 %vm1654_vm1, %v2617_v43  ;;  %vm1639_vm1 = vcmp.eq.s32.totalorder %v3032_v8, 1 }
 0x20e   : > { %2242 = vmatpush1.msk.msra.mxu0 %vm1653_vm2, %v2617_v43  ;;  %vm1638_vm2 = vcmp.eq.s32.totalorder %v3047_v17, 1  ;;  %v1456_v49 = vpop.permute.xlu1 %1455 }
 0x20f   : > { %2243 = vmatprep.subr.msk.mxu0 %vm1652_vm3, %v2617_v43  ;;  %vm1637_vm3 = vcmp.eq.s32.totalorder %v3050_v18, 1 }
 0x210   : > { %2244 = vmatpush1.msk.msra.mxu0 %vm1651_vm4, %v2617_v43  ;;  %vm1636_vm4 = vcmp.eq.s32.totalorder %v3055_v21, 1  ;;  %v1451_v57 = vpop.permute.xlu0 %1450 }
 0x211   : > { %2245 = vmatprep.subr.msk.mxu0 %vm1650_vm5, %v2617_v43  ;;  %vm1635_vm5 = vcmp.eq.s32.totalorder %v3058_v22, 1 }
 0x212   : > { %2246 = vmatpush1.msk.msra.mxu0 %vm1649_vm6, %v2617_v43  ;;  %vm1634_vm6 = vcmp.eq.s32.totalorder %v3067_v26, 1 }
 0x213   : > { %2247 = vmatprep.subr.msk.mxu0 %vm1648_vm7, %v2617_v43  ;;  %vm1633_vm7 = vcmp.eq.s32.totalorder %v3071_v28, 1 }
 0x214   : > { %2248 = vmatpush1.msk.msra.mxu0 %vm1647_vm8, %v2617_v43  ;;  %vm1632_vm8 = vcmp.eq.s32.totalorder %v3074_v29, 1 }
 0x215   : > { %2249 = vmatprep.subr.msk.mxu0 %vm1646_vm9, %v2617_v43  ;;  %vm1631_vm9 = vcmp.eq.s32.totalorder %v3077_v30, 1 }
 0x216   : > { %2250 = vmatpush1.msk.msra.mxu0 %vm1645_vm10, %v2617_v43  ;;  %vm1630_vm10 = vcmp.eq.s32.totalorder %v3084_v31, 1 }
 0x217   : > { %2251 = vmatprep.subr.msk.mxu0 %vm1644_vm11, %v2617_v43  ;;  %vm1564_vm11 = vcmp.eq.s32.totalorder %v2928_v35, 0 }
 0x218   : > { %2252 = vmatpush1.msk.msra.mxu0 %vm1643_vm12, %v2617_v43  ;;  %vm1563_vm12 = vcmp.eq.s32.totalorder %v2931_v2, 0 }
 0x219   : > { %2253 = vmatprep.subr.msk.mxu0 %vm1642_vm13, %v2617_v43  ;;  %vm1562_vm13 = vcmp.eq.s32.totalorder %v2934_v36, 0 }
 0x21a   : > { %2254 = vmatpush1.msk.msra.mxu0 %vm1641_vm14, %v2617_v43  ;;  %vm1561_vm14 = vcmp.eq.s32.totalorder %v2937_v37, 0 }
 0x21b   : > { %2255 = vmatprep.subr.msk.mxu0 %vm1640_vm15, %v2617_v43  ;;  %vm1560_vm15 = vcmp.eq.s32.totalorder %v2940_v38, 0 }
 0x21c   : > { %2256 = vmatpush1.msk.msra.mxu0 %vm1639_vm1, %v2617_v43  ;;  %vm1559_vm1 = vcmp.eq.s32.totalorder %v2943_v39, 0 }
 0x21d   : > { %2257 = vmatprep.subr.msk.mxu0 %vm1638_vm2, %v2617_v43  ;;  %vm1558_vm2 = vcmp.eq.s32.totalorder %v2946_v40, 0 }
 0x21e   : > { %2258 = vmatpush1.msk.msra.mxu0 %vm1637_vm3, %v2617_v43  ;;  %vm1556_vm3 = vcmp.eq.s32.totalorder %v2968_v47, 0 }
 0x21f   : > { %2259 = vmatprep.subr.msk.mxu0 %vm1636_vm4, %v2617_v43  ;;  %vm1555_vm4 = vcmp.eq.s32.totalorder %v2971_v48, 0 }
 0x220   : > { %2260 = vmatpush1.msk.msra.mxu0 %vm1635_vm5, %v2617_v43  ;;  %vm1554_vm5 = vcmp.eq.s32.totalorder %v2981_v53, 0 }
 0x221   : > { %2261 = vmatprep.subr.msk.mxu0 %vm1634_vm6, %v2617_v43  ;;  %vm1553_vm6 = vcmp.eq.s32.totalorder %v2984_v54, 0 }
 0x222   : > { %2262 = vmatpush1.msk.msra.mxu0 %vm1633_vm7, %v2617_v43  ;;  %vm1552_vm7 = vcmp.eq.s32.totalorder %v2987_v55, 0 }
 0x223   : > { %2263 = vmatprep.subr.msk.mxu0 %vm1632_vm8, %v2617_v43  ;;  %vm1551_vm8 = vcmp.eq.s32.totalorder %v2990_v56, 0 }
 0x224   : > { %2264 = vmatpush1.msk.msra.mxu0 %vm1631_vm9, %v2617_v43  ;;  %vm1550_vm9 = vcmp.eq.s32.totalorder %v3002_v61, 0 }
 0x225   : > { %2265 = vmatprep.subr.msk.mxu0 %vm1630_vm10, %v2617_v43  ;;  %vm1549_vm10 = vcmp.eq.s32.totalorder %v3006_v62, 0 }
 0x24e   : > { %v2408_v27 = vpop.f32.mrf.mxu0 }
 0x250   : > { %v1270_v33 = vpop.f32.mrf.mxu0 }
 0x2c3   : > { %v2415_v32 = vpop.f32.mrf.mxu1 }
 0x2c4   : > { %v1357_v41 = vadd.f32 %v2415_v32, %v2408_v27 }
 0x2c5   : > { %v1351_v34 = vpop.f32.mrf.mxu1 }
 0x2c6   : > { %v1352_v45 = vadd.f32 %v1351_v34, %v1270_v33 }
 0x2c7   : > { %v2422_v44 = vpop.f32.mrf.mxu0 }
 0x2c8   : > { %v1445_v46 = vadd.f32 %v2422_v44, %v1357_v41 }
 0x2c9   : > { %v1435_v50 = vpop.f32.mrf.mxu0 }
 0x2ca   : > { %v1459_v51 = vadd.f32 %v1456_v49, %v1445_v46  ;;  %v1444_v52 = vadd.f32 %v1435_v50, %v1352_v45 }
 0x2cc   : > { %v1458_v58 = vadd.f32 %v1451_v57, %v1444_v52  ;;  %v1461_v59 = vadd.f32 %v1459_v51, %v2788_v9  ;;  %v1501_v9 = vsub.s32 %v2779_v5, %v1485_v19 }
 0x2ce   : > { %1463 = vst [vmem:[%s3098_s27 + $0x8] sm:$0xff] %v1461_v59  ;;  %2423 = vmatprep.subr.mxu1 %v1461_v59  ;;  %v1460_v60 = vadd.f32 %v1458_v58, %v2792_v10 }
 0x2cf   : > { %2424 = vmatpush3.msra.mxu1 %v1461_v59 }
 0x2d0   : > { %1462 = vst [vmem:[%s3098_s27] sm:$0xff] %v1460_v60  ;;  %2425 = vmatprep.subr.mxu1 %v1460_v60  ;;  %s2534_s27 = sshll.u32 %s2618_s19, 4  ;;  %s2535_s27 = int_to_ptr.vmem [resolvable:$false] %s2534_s27 }
 0x2d1   : > { %2426 = vmatpush3.msra.mxu1 %v1460_v60  ;;  %s2536_s29 = scalar_lea.vmem %s2535_s27, 512  ;;  %p2537_p0 = scmp.lt.s32.totalorder %s3182_s28, %s2535_s27 }
 0x2d2   : > { %2428 = vmatmul.mubr.msk.f32.vlgmr.msra.gmra.mxu1 %vm478_vm0, %v1465_v1  ;;  %2267 = vmatprep.subr.msk.mxu1 %vm1564_vm11, %v2617_v43  ;;  %vm1557_vm0 = vcmp.eq.s32.totalorder %v2953_v42, 0  ;;  %vm1548_vm11 = vcmp.eq.s32.totalorder %v3009_v63, 0  ;;  %p2538_p1 = scmp.lt.s32.totalorder %s2536_s29, %s2530_s26 }
 0x2d3   : > { %2268 = vmatpush1.msk.msra.mxu1 %vm1563_vm12, %v2617_v43  ;;  %1941 = vmatprep.mubr.f32.mxu1 %v2616_v20  ;;  %vm1547_vm12 = vcmp.eq.s32.totalorder %v3012_v0, 0 }
 0x2d4   : > { %2269 = vmatprep.subr.msk.mxu1 %vm1562_vm13, %v2617_v43  ;;  %vm1546_vm13 = vcmp.eq.s32.totalorder %v3022_v4, 0  ;;  %p2539_p2 = por %p2538_p1, %p2537_p0 }
 0x2d5   : > { %2270 = vmatpush1.msk.msra.mxu1 %vm1561_vm14, %v2617_v43  ;;  %vm1545_vm14 = vcmp.eq.s32.totalorder %v3025_v6, 0 }
 0x2d6   : > { %2271 = vmatprep.subr.msk.mxu1 %vm1560_vm15, %v2617_v43  ;;  %vm1544_vm15 = vcmp.eq.s32.totalorder %v3029_v7, 0  ;;  %p2540_p3 = pnand %p2539_p2, %p2533_p13 }
 0x2d7   : > { %2272 = vmatpush1.msk.msra.mxu1 %vm1559_vm1, %v2617_v43  ;;  %vm1543_vm1 = vcmp.eq.s32.totalorder %v3032_v8, 0 }
 0x2d8   : > { %2273 = vmatprep.subr.msk.mxu1 %vm1558_vm2, %v2617_v43  ;;  %vm1542_vm2 = vcmp.eq.s32.totalorder %v3047_v17, 0 }
 0x2d9   : > { %2274 = vmatpush1.msk.msra.mxu1 %vm1557_vm0, %v2617_v43  ;;  %vm1541_vm0 = vcmp.eq.s32.totalorder %v3050_v18, 0 }
 0x2da   : > { %2275 = vmatprep.subr.msk.mxu1 %vm1556_vm3, %v2617_v43  ;;  %vm1540_vm3 = vcmp.eq.s32.totalorder %v3055_v21, 0 }
 0x2db   : > { %2276 = vmatpush1.msk.msra.mxu1 %vm1555_vm4, %v2617_v43  ;;  %vm1539_vm4 = vcmp.eq.s32.totalorder %v3058_v22, 0 }
 0x2dc   : > { %2277 = vmatprep.subr.msk.mxu1 %vm1554_vm5, %v2617_v43  ;;  %vm1538_vm5 = vcmp.eq.s32.totalorder %v3067_v26, 0 }
 0x2dd   : > { %2278 = vmatpush1.msk.msra.mxu1 %vm1553_vm6, %v2617_v43  ;;  %vm1537_vm6 = vcmp.eq.s32.totalorder %v3071_v28, 0 }
 0x2de   : > { %2279 = vmatprep.subr.msk.mxu1 %vm1552_vm7, %v2617_v43  ;;  %vm1536_vm7 = vcmp.eq.s32.totalorder %v3074_v29, 0 }
 0x2df   : > { %2280 = vmatpush1.msk.msra.mxu1 %vm1551_vm8, %v2617_v43  ;;  %vm1629_vm8 = vcmp.eq.s32.totalorder %v1501_v9, 1 }
 0x2e0   : > { %2281 = vmatprep.subr.msk.mxu1 %vm1550_vm9, %v2617_v43  ;;  %vm1535_vm9 = vcmp.eq.s32.totalorder %v3077_v30, 0  ;;  %2266 = vmatpush1.msk.msra.mxu0 %vm1629_vm8, %v2617_v43 }
 0x2e1   : > { %2282 = vmatpush1.msk.msra.mxu1 %vm1549_vm10, %v2617_v43  ;;  %vm1534_vm10 = vcmp.eq.s32.totalorder %v3084_v31, 0 }
 0x2e2   : > { %2283 = vmatprep.subr.msk.mxu1 %vm1548_vm11, %v2617_v43  ;;  %vm1533_vm11 = vcmp.eq.s32.totalorder %v1501_v9, 0 }
 0x2e3   : > { %2284 = vmatpush1.msk.msra.mxu1 %vm1547_vm12, %v2617_v43 }
 0x2e4   : > { %2285 = vmatprep.subr.msk.mxu1 %vm1546_vm13, %v2617_v43 }
 0x2e5   : > { %2286 = vmatpush1.msk.msra.mxu1 %vm1545_vm14, %v2617_v43 }
 0x2e6   : > { %2287 = vmatprep.subr.msk.mxu1 %vm1544_vm15, %v2617_v43 }
 0x2e7   : > { %2288 = vmatpush1.msk.msra.mxu1 %vm1543_vm1, %v2617_v43 }
 0x2e8   : > { %2289 = vmatprep.subr.msk.mxu1 %vm1542_vm2, %v2617_v43 }
 0x2e9   : > { %2290 = vmatpush1.msk.msra.mxu1 %vm1541_vm0, %v2617_v43 }
 0x2ea   : > { %2291 = vmatprep.subr.msk.mxu1 %vm1540_vm3, %v2617_v43 }
 0x2eb   : > { %2292 = vmatpush1.msk.msra.mxu1 %vm1539_vm4, %v2617_v43 }
 0x2ec   : > { %2293 = vmatprep.subr.msk.mxu1 %vm1538_vm5, %v2617_v43 }
 0x2ed   : > { %2294 = vmatpush1.msk.msra.mxu1 %vm1537_vm6, %v2617_v43 }
 0x2ee   : > { %2295 = vmatprep.subr.msk.mxu1 %vm1536_vm7, %v2617_v43 }
 0x2ef   : > { %2296 = vmatpush1.msk.msra.mxu1 %vm1535_vm9, %v2617_v43 }
 0x2f0   : > { %2297 = vmatprep.subr.msk.mxu1 %vm1534_vm10, %v2617_v43 }
 0x2f1   : > { %2298 = vmatpush1.msk.msra.mxu1 %vm1533_vm11, %v2617_v43 }
 0x392   : > { %v2429_v10 = vpop.f32.mrf.mxu1 }
 0x393   : > { %1871 = vmatmul.mubr.f32.vlgmr.msra.gmra.mxu0 %v2429_v10 }
 0x394   : > { %v1797_v20 = vpop.f32.mrf.mxu1 }
 0x395   : > { %1942 = vmatmul.mubr.f32.vlgmr.msra.gmra.mxu1 %v1797_v20 }
 0x396   : > { %2543 = shalt.err (!%p2540_p3)
}
 0x397   : > { %s2544_s15 = scalar_lea.hbm %s3180_s18, 256  ;;  %s2548_s21 = scalar_lea.hbm %s3245_s8, 512 }
 0x398   : > { %p2545_p6 = scmp.ne.s32.totalorder %s3180_s18, %s2544_s15  ;;  %p2549_p9 = scmp.lt.s32.totalorder %s3180_s18, %s3245_s8 }
 0x399   : > { %p2550_p10 = scmp.lt.s32.totalorder %s2548_s21, %s2544_s15 }
 0x39a   : > { %p2546_p7 = pnand %p2545_p6, %p3257_p11 }
 0x39b   : > { %p2551_p4 = por %p2550_p10, %p2549_p9 }
 0x39c   : > { %p2547_p8 = pneg %p2546_p7 }
 0x39e   : > { %p2552_p12 = pnand %p2551_p4, %p2547_p8 }
 0x3a0   : > { %2555 = shalt.err (!%p2552_p12)
}
 0x3a1   : > { %s2619_s26 = smov 128   ;;  %s2620_s27 = smov 8   ;;  %v1951_v35 = vpop.permute.xlu1 %1950 }
 0x3a2   : > { %2434 = dma.vmem_to_hbm [thread:$0]  (%p3257_p11), %s3182_s28, 256, %s3180_s18, %s3186_s24, %s2619_s26, %s2619_s26, %s2620_s27  }
 0x3a3   : > { %p417_p13 = scmp.lt.s32.totalorder %s2602_s12, 1 }
 0x3a5   : > { %s3267_s12 = smov (!%p417_p13, %s2602_s12), 1 }
 0x3a6   : > { %s2305_s29 = sshll.u32 %s3267_s12, 4 }
 0x3a7   : > { %s424_s25 = scalar_lea.vmem %s3246_s9, %s2305_s29 }
 0x453   : > { %v1872_v5 = vpop.f32.mrf.mxu0 }
 0x455   : > { %v1943_v25 = vpop.f32.mrf.mxu1  ;;  %v1874_v36 = vpop.f32.mrf.mxu0 }
 0x456   : > { %v1944_v2 = vadd.f32 %v1943_v25, %v1872_v5 }
 0x457   : > { %v1945_v37 = vpop.f32.mrf.mxu1 }
 0x458   : > { %v1953_v38 = vadd.f32 %v1951_v35, %v1944_v2  ;;  %v1946_v39 = vadd.f32 %v1945_v37, %v1874_v36 }
 0x45a   : > { %1955 = vst [vmem:[%s424_s25] sm:$0xff] %v1953_v38  ;;  %v1954_v40 = vadd.f32 %v1951_v35, %v1946_v39 }
 0x45c   : > { %1956 = vst [vmem:[%s424_s25 + $0x8] sm:$0xff] %v1954_v40 }
 0x45d PF: > { %s2000_s20 = sand.u32 1, %s2590_s30   ;;  %p3258_p11 = scmp.ne.s32.totalorder %s3252_s23, 0 }
 0x45e   : > { %s2001_s12 = scalar_lea.sflag [#allocation4], %s2000_s20 }
 0x45f   : > { %p2441_p0 = pnand %p2118_p5, %p3258_p11 }
 0x461   : > { %p2442_p1 = pneg %p2441_p0 }
 0x463   : > { %2585 = dma.done.wait (%p2442_p1), %s2001_s12, 256  }
 0x464   : > { %2587 = vsyncadd (%p2442_p1), %s2001_s12, 4294967040  ;;  %s24_s14 = sadd.s32 1, %s2610_s14   ;;  %s3259_s30 = smov %s2594_s10 }
 0x465   : > { %p21_p2 = scmp.ge.s32.totalorder %s24_s14, 4   ;;  %s3260_s10 = smov %s2598_s11 }
 0x466   : > { %s3261_s11 = smov %s2725_s22  ;;  %s3262_s12 = smov %s2606_s13 }
 0x467   : > { %s3263_s13 = smov %s3265_s17  ;;  %23 = sbr.rel (!%p21_p2) target bundleno = 7 (0x7), region = 151 }
 0x46c   :  { %2018 = vsyncpa [#allocation4], 1 }
 0x46d   :  { %2020 = vsyncpa [#allocation4 + $0x1], 1 }
 0x46e   :  { %2021 = vsyncpa [#allocation5], 1 }
 0x46f   :  { %2023 = vsyncpa [#allocation5 + $0x1], 1 }

// kernel: _lambda_.3
= control target key start
LH: loop header
LB: loop body
LE: loop exit
PB: predicated region body
PF: predicated region fallthrough
CT: control target
= control target key end

     0   :  { %13 = vsyncpa [#allocation3], 0  ;;  %s5924_s0 = inlined_call_operand.vmem [shape: f32[2,32,128], index: 0, kind: input, shape index: {}]   ;;  %s5925_s1 = inlined_call_operand.vmem [shape: f32[3,32,32], index: 1, kind: input, shape index: {}]   ;;  %s5926_s2 = inlined_call_operand.hbm [shape: f32[32,1], index: 2, kind: input, shape index: {}]   ;;  %s5927_s3 = inlined_call_operand.vmem [shape: f32[3,32,32], index: 3, kind: input, shape index: {}]   ;;  %s5928_s4 = inlined_call_operand.hbm [shape: f32[32,1], index: 4, kind: input, shape index: {}]   ;;  %s5929_s5 = inlined_call_operand.vmem [shape: f32[2], index: 5, kind: input, shape index: {}]   ;;  %s5930_s6 = inlined_call_operand.vmem [shape: f32[64,32], index: 6, kind: input, shape index: {}]   ;;  %s5931_s7 = inlined_call_operand.vmem [shape: f32[16,1], index: 7, kind: input, shape index: {}]   ;;  %s5932_s8 = inlined_call_operand.vmem [shape: f32[2,16,512], index: 8, kind: output, shape index: {}]  }
   0x1   :  { %14 = vsyncpa [#allocation6], 0 }
   0x2   :  { %15 = vsyncpa [#allocation4], 0  ;;  %s4601_s27 = smov 0   ;;  %s4603_s28 = smov 0  }
   0x3   :  { %s4605_s29 = smov 0  }
   0x4 LB: > { %s3492_s30 = sadd.s32 4294967295, %s4544_s29   ;;  %s33_s9 = sadd.s32 1, %s4540_s28  ;;  %s4544_s29 = sphi %s4605_s29, %s21_s29   ;;  %s4540_s28 = sphi %s4603_s28, %s6016_s28   ;;  %s4536_s27 = sphi %s4601_s27, %s6015_s27  }
   0x5   : > { %p35_p0 = scmp.ge.s32.totalorder %s33_s9, 2  ;;  %p3494_p1 = scmp.ge.s32.totalorder %s4544_s29, 1 }
   0x6   : > { %p241_p2 = scmp.lt.s32.totalorder %s4544_s29, 3  ;;  %p4626_p4 = scmp.eq.s32.totalorder %s3492_s30, 0 }
   0x7   : > { %s6018_s9 = smov (%p35_p0, %s33_s9), 0  ;;  %s4546_s12 = smov [#allocation2]  }
   0x8   : > { %p4622_p3 = pnand %p3494_p1, %p241_p2  ;;  %s256_s13 = sshll.u32 %s4546_s12, 4  ;;  %s257_s13 = int_to_ptr.vmem [resolvable:$true] %s256_s13 }
   0x9   : > { %s5971_s11 = scalar_select %p4626_p4, 1, 0 }
   0xa   : > { %p4371_p5 = pneg %p4622_p3  ;;  %s4547_s15 = smov [#allocation5]  }
   0xb   : > { %s272_s16 = sshll.u32 %s4547_s15, 4  ;;  %s286_s19 = sshll.u32 %s5929_s5, 4  ;;  %s273_s16 = int_to_ptr.vmem [resolvable:$true] %s272_s16  ;;  %s287_s19 = int_to_ptr.vmem [resolvable:$true] %s286_s19 }
   0xc   : > { %p4634_p6 = pnand %p4626_p4, %p4371_p5  ;;  %s4454_s20 = scalar_lea.vmem %s257_s13, 512 }
   0xd   : > { %p4455_p8 = scmp.ne.s32.totalorder %s257_s13, %s4454_s20  ;;  %p4462_p11 = scmp.lt.s32.totalorder %s257_s13, %s257_s13 }
   0xe   : > { %p4445_p7 = pneg %p4634_p6  ;;  %p4463_p12 = scmp.lt.s32.totalorder %s4454_s20, %s4454_s20 }
  0x10   : > { %p4457_p9 = pnand %p4455_p8, %p4445_p7  ;;  %p4464_p13 = por %p4463_p12, %p4462_p11 }
  0x12   : > { %p4458_p10 = pneg %p4457_p9 }
  0x14   : > { %p4465_p0 = pnand %p4464_p13, %p4458_p10 }
  0x16   : > { %4468 = shalt.err (!%p4465_p0)
}
  0x17   : > { %s4548_s21 = smov 128   ;;  %s4549_s22 = smov 8  }
  0x18   : > { %4374 = dma.hbm_to_vmem [thread:$0]  (!%p4634_p6), %s5926_s2, 512, %s257_s13, [#allocation3], %s4548_s21, %s4548_s21, %s4549_s22  }
  0x19   : > { %s4480_s25 = scalar_lea.vmem %s273_s16, 512  ;;  %p4488_p8 = scmp.lt.s32.totalorder %s273_s16, %s273_s16 }
  0x1a   : > { %p4481_p1 = scmp.ne.s32.totalorder %s273_s16, %s4480_s25  ;;  %p4489_p9 = scmp.lt.s32.totalorder %s4480_s25, %s4480_s25 }
  0x1c   : > { %p4483_p2 = pnand %p4481_p1, %p4445_p7  ;;  %p4490_p11 = por %p4489_p9, %p4488_p8 }
  0x1e   : > { %p4484_p5 = pneg %p4483_p2 }
  0x20   : > { %p4491_p10 = pnand %p4490_p11, %p4484_p5 }
  0x22   : > { %4494 = shalt.err (!%p4491_p10)
}
  0x23   : > { %4377 = dma.hbm_to_vmem [thread:$0]  (!%p4634_p6), %s5928_s4, 512, %s273_s16, [#allocation6], %s4548_s21, %s4548_s21, %s4549_s22  }
  0x24   : > { %s4495_s12 = scalar_lea.vmem %s287_s19, 16  ;;  %p4503_p1 = scmp.lt.s32.totalorder %s287_s19, %s287_s19 }
  0x25   : > { %p4496_p12 = scmp.ne.s32.totalorder %s287_s19, %s4495_s12  ;;  %p4504_p2 = scmp.lt.s32.totalorder %s4495_s12, %s4495_s12 }
  0x27   : > { %p4498_p13 = pnand %p4496_p12, %p4445_p7  ;;  %p4505_p4 = por %p4504_p2, %p4503_p1 }
  0x29   : > { %p4499_p0 = pneg %p4498_p13 }
  0x2b   : > { %p4506_p8 = pnand %p4505_p4, %p4499_p0 }
  0x2d   : > { %4509 = shalt.err (!%p4506_p8)
}
  0x2e   : > { %s4550_s13 = smov [#allocation7]   ;;  %316 = sbr.rel (%p4622_p3) target bundleno = 1258 (0x4ea), region = 52 }
  0x2f   : > { %4380 = dma.vmem_to_smem (!%p4634_p6), %s287_s19, 16, %s4550_s13, [#allocation4]  }
  0x33   : > { %p5973_p5 = scmp.ne.s32.totalorder %s5971_s11, 0 }
  0x35   : > { %4523 = dma.done.wait (%p5973_p5), [#allocation3], 512  }
  0x36   : > { %4525 = vsyncadd (%p5973_p5), [#allocation3], 4294966784 }
  0x37   : > { %4527 = dma.done.wait (%p5973_p5), [#allocation6], 512  }
  0x38   : > { %4529 = vsyncadd (%p5973_p5), [#allocation6], 4294966784 }
  0x39   : > { %4531 = dma.done.wait (%p5973_p5), [#allocation4], 16  }
  0x3a   : > { %4533 = vsyncadd (%p5973_p5), [#allocation4], 4294967280 }
  0x3b   : > { %330 = sfence }
  0x3c   : > { %p366_p3 = scmp.lt.s32.totalorder %s4536_s27, 1  ;;  %v385_v0 = vlaneseq  ;;  %s390_s10 = sld [smem:[#allocation7]]  ;;  %v4682_v1 = vld [vmem:[%s5925_s1 + $0x20] sm:$0xff]  ;;  %vm466_vm0 = vcmask 261120   ;;  %v4761_v21 = vld [vmem:[%s5925_s1 + $0x28] sm:$0xff]  ;;  %v4553_v22 = vmov 0  }
  0x3d   : > { %4211 = vmatprep.mubr.msk.f32.mxu0 %vm466_vm0, %v4682_v1  ;;  %v4715_v13 = vld [vmem:[%s5925_s1] sm:$0xff]  ;;  %s4551_s21 = smov 127   ;;  %s4552_s22 = smov 1   ;;  %4422 = vset.pattern.permute.xlu1 %v4553_v22  ;;  %v4768_v23 = vld [vmem:[%s5925_s1 + $0x30] sm:$0xff]  ;;  %v4779_v24 = vld [vmem:[%s5925_s1 + $0x38] sm:$0xff]  ;;  %v5935_v30 = vmov 0.0  }
  0x3e   : > { %s6020_s27 = smov (!%p366_p3, %s4536_s27), 1  ;;  %v4690_v2 = vand.u32 127, %v385_v0  ;;  %4225 = vmatprep.mubr.msk.f32.mxu1 %vm466_vm0, %v4715_v13  ;;  %4421 = vset.pattern.permute.xlu0 %v4553_v22  ;;  %v4786_v25 = vld [vmem:[%s5925_s1 + $0x40] sm:$0xff]  ;;  %v464_v26 = vld [vmem:[#allocation2 + $0x10] sm:$0xff]  ;;  %v465_v27 = vld [vmem:[#allocation2 + $0x18] sm:$0xff]  ;;  %s3507_s30 = sld [smem:[#allocation7 + $0x1]] }
  0x3f   : > { %s4110_s11 = sshll.u32 %s6020_s27, 5  ;;  %v463_v28 = vld [vmem:[#allocation2 + $0x8] sm:$0xff]  ;;  %v462_v29 = vld [vmem:[#allocation2] sm:$0xff]  ;;  %v4846_v40 = vld [vmem:[%s5925_s1 + $0x10] sm:$0xff] }
  0x40   : > { %vm389_vm1 = vcmp.lt.s32.totalorder %v4690_v2, 24  ;;  %s373_s18 = scalar_lea.vmem %s5924_s0, %s4110_s11  ;;  %vm418_vm6 = vcmp.eq.s32.totalorder %v4690_v2, 0  ;;  %vm419_vm7 = vcmp.eq.s32.totalorder %v4690_v2, 127  ;;  %v4837_v39 = vld [vmem:[%s5925_s1 + $0x8] sm:$0xff]  ;;  %v451_v43 = vld [vmem:[%s5925_s1 + $0x18] sm:$0xff]  ;;  %v3514_v45 = vld [vmem:[%s5925_s1 + $0x50] sm:$0xff] }
  0x41   : > { %v395_v3 = vld [vmem:[%s373_s18 + $0x18] sm:$0xff]  ;;  %v394_v5 = vld [vmem:[%s373_s18 + $0x10] sm:$0xff]  ;;  %v393_v6 = vld [vmem:[%s373_s18 + $0x8] sm:$0xff] }
  0x42   : > { %v406_v4 = vstv %s390_s10  ;;  %v4699_v7 = vsel %vm389_vm1, %v395_v3, 0.0  ;;  %v4703_v8 = vsel %vm389_vm1, %v394_v5, 0.0  ;;  %v4707_v9 = vsel %vm389_vm1, %v393_v6, 0.0  ;;  %v392_v10 = vld [vmem:[%s373_s18] sm:$0xff]  ;;  %vm4808_vm8 = vmneg %vm418_vm6  ;;  %v3513_v44 = vld [vmem:[%s5925_s1 + $0x48] sm:$0xff]  ;;  %s4111_s18 = sshll.u32 %s6020_s27, 6 }
  0x43   : > { %vm405_vm2 = vcmp.ge.f32.partialorder %v4699_v7, 0.0  ;;  %v410_v11 = vmul.f32 %v406_v4, %v4699_v7  ;;  %v409_v12 = vmul.f32 %v406_v4, %v4703_v8  ;;  %vm404_vm3 = vcmp.ge.f32.partialorder %v4703_v8, 0.0  ;;  %vm4814_vm9 = vmneg %vm419_vm7  ;;  %v3515_v46 = vld [vmem:[%s5925_s1 + $0x58] sm:$0xff]  ;;  %v3564_v3 = vld [vmem:[%s5927_s3 + $0x20] sm:$0xff]  ;;  %s5905_s23 = scalar_lea.vmem %s5932_s8, %s4111_s18 }
  0x44   : > { %vm403_vm4 = vcmp.ge.f32.partialorder %v4707_v9, 0.0  ;;  %v408_v14 = vmul.f32 %v406_v4, %v4707_v9  ;;  %v4722_v15 = vsel %vm389_vm1, %v392_v10, 0.0  ;;  %v790_v5 = vstv %s3507_s30 }
  0x45   : > { %v4727_v16 = vsel %vm405_vm2, %v4699_v7, %v410_v11  ;;  %v4734_v17 = vsel %vm404_vm3, %v4703_v8, %v409_v12  ;;  %v407_v19 = vmul.f32 %v406_v4, %v4722_v15  ;;  %vm402_vm5 = vcmp.ge.f32.partialorder %v4722_v15, 0.0 }
  0x46   : > { %440 = vrot.lane.b32.xlu1 %v4727_v16, %s4551_s21  ;;  %426 = vrot.lane.b32.xlu0 %v4727_v16, %s4552_s22  ;;  %v4737_v18 = vsel %vm403_vm4, %v4707_v9, %v408_v14 }
  0x47   : > { %4203 = vmatprep.subr.mxu0 %v4727_v16  ;;  %v4749_v20 = vsel %vm402_vm5, %v4722_v15, %v407_v19 }
  0x48   : > { %4204 = vmatpush3.msra.mxu0 %v4727_v16 }
  0x49   : > { %4205 = vmatprep.subr.mxu0 %v4734_v17 }
  0x4a   : > { %424 = vrot.lane.b32.xlu0 %v4734_v17, %s4552_s22  ;;  %422 = vrot.lane.b32.xlu1 %v4737_v18, %s4552_s22 }
  0x4b   : > { %4206 = vmatpush3.msra.mxu0 %v4734_v17 }
  0x4c   : > { %4207 = vmatprep.subr.mxu0 %v4737_v18 }
  0x4d   : > { %4208 = vmatpush3.msra.mxu0 %v4737_v18 }
  0x4e   : > { %438 = vrot.lane.b32.xlu0 %v4734_v17, %s4551_s21  ;;  %420 = vrot.lane.b32.xlu1 %v4749_v20, %s4552_s22 }
  0x4f   : > { %4209 = vmatprep.subr.mxu0 %v4749_v20 }
  0x50   : > { %4210 = vmatpush3.msra.mxu0 %v4749_v20 }
  0x51   : > { %4212 = vmatmul.mubr.msk.f32.vlgmr.msra.gmra.mxu0 %vm466_vm0, %v4761_v21 }
  0x52   : > { %436 = vrot.lane.b32.xlu0 %v4737_v18, %s4551_s21  ;;  %434 = vrot.lane.b32.xlu1 %v4749_v20, %s4551_s21 }
  0x53   : > { %4214 = vmatprep.mubr.msk.f32.mxu0 %vm466_vm0, %v4768_v23 }
  0x55   : > { %4215 = vmatmul.mubr.msk.f32.gmra.mxu0 %vm466_vm0, %v4779_v24 }
  0x56   : > { %4239 = vmatprep.mubr.msk.f32.mxu0 %vm466_vm0, %v4786_v25  ;;  %774 = vperm.xlu1 %4422, %v464_v26  }
  0x57   : > { %779 = vperm.xlu0 %4421, %v465_v27  }
  0x5a   : > { %769 = vperm.xlu1 %4422, %v463_v28  }
  0x5b   : > { %764 = vperm.xlu0 %4421, %v462_v29  }
  0x5e   : > { %1098 = vrot.lane.b32.xlu1 %v4727_v16, %s4552_s22 }
  0x5f   : > { %1096 = vrot.lane.b32.xlu0 %v4734_v17, %s4552_s22 }
  0x62   : > { %1094 = vrot.lane.b32.xlu1 %v4737_v18, %s4552_s22 }
  0x63   : > { %1092 = vrot.lane.b32.xlu0 %v4749_v20, %s4552_s22 }
  0x66   : > { %4424 = vperm.xlu1 %4422, %v5935_v30  }
  0x67   : > { %4429 = vperm.xlu0 %4421, %v5935_v30  }
  0x6a   : > { %4434 = vperm.xlu1 %4422, %v5935_v30  }
  0x6e   : > { %4439 = vperm.xlu1 %4422, %v5935_v30  }
  0xb8   : > { %v441_v33 = vpop.permute.xlu1 %440  ;;  %v427_v34 = vpop.permute.xlu0 %426 }
  0xb9   : > { %4217 = vmatprep.subr.msk.mxu1 %vm4808_vm8, %v427_v34  ;;  %4231 = vmatprep.subr.msk.mxu0 %vm4814_vm9, %v441_v33 }
  0xba   : > { %4218 = vmatpush3.msk.msra.mxu1 %vm4808_vm8, %v427_v34  ;;  %4232 = vmatpush3.msk.msra.mxu0 %vm4814_vm9, %v441_v33  ;;  %v1365_v33 = vld [vmem:[%s5927_s3] sm:$0xff] }
  0xbc   : > { %v425_v35 = vpop.permute.xlu0 %424  ;;  %v423_v36 = vpop.permute.xlu1 %422 }
  0xbd   : > { %4219 = vmatprep.subr.msk.mxu1 %vm4808_vm8, %v425_v35 }
  0xbe   : > { %4220 = vmatpush3.msk.msra.mxu1 %vm4808_vm8, %v425_v35 }
  0xbf   : > { %4221 = vmatprep.subr.msk.mxu1 %vm4808_vm8, %v423_v36 }
  0xc0   : > { %v439_v37 = vpop.permute.xlu0 %438  ;;  %4222 = vmatpush3.msk.msra.mxu1 %vm4808_vm8, %v423_v36  ;;  %v421_v38 = vpop.permute.xlu1 %420 }
  0xc1   : > { %4223 = vmatprep.subr.msk.mxu1 %vm4808_vm8, %v421_v38  ;;  %4233 = vmatprep.subr.msk.mxu0 %vm4814_vm9, %v439_v37 }
  0xc2   : > { %4224 = vmatpush3.msk.msra.mxu1 %vm4808_vm8, %v421_v38  ;;  %4234 = vmatpush3.msk.msra.mxu0 %vm4814_vm9, %v439_v37 }
  0xc3   : > { %4226 = vmatmul.mubr.msk.f32.vlgmr.msra.gmra.mxu1 %vm466_vm0, %v4837_v39  ;;  %4245 = vmatprep.subr.mxu1 %v5935_v30 }
  0xc4   : > { %v437_v41 = vpop.permute.xlu0 %436  ;;  %4228 = vmatprep.mubr.msk.f32.mxu1 %vm466_vm0, %v4846_v40  ;;  %v435_v42 = vpop.permute.xlu1 %434  ;;  %4246 = vmatpush3.msra.mxu1 %v5935_v30 }
  0xc5   : > { %4235 = vmatprep.subr.msk.mxu0 %vm4814_vm9, %v437_v41  ;;  %4261 = vmatprep.subr.mxu1 %v4727_v16 }
  0xc6   : > { %4236 = vmatpush3.msk.msra.mxu0 %vm4814_vm9, %v437_v41 }
  0xc7   : > { %4229 = vmatmul.mubr.msk.f32.gmra.mxu1 %vm466_vm0, %v451_v43  ;;  %4237 = vmatprep.subr.msk.mxu0 %vm4814_vm9, %v435_v42 }
  0xc8   : > { %4238 = vmatpush3.msk.msra.mxu0 %vm4814_vm9, %v435_v42  ;;  %4247 = vmatprep.mubr.msk.f32.mxu1 %vm466_vm0, %v4682_v1 }
  0xc9   : > { %4240 = vmatmul.mubr.msk.f32.vlgmr.msra.gmra.mxu0 %vm466_vm0, %v3513_v44  ;;  %4253 = vmatprep.subr.mxu0 %v5935_v30 }
  0xca   : > { %4242 = vmatprep.mubr.msk.f32.mxu0 %vm466_vm0, %v3514_v45  ;;  %4254 = vmatpush3.msra.mxu0 %v5935_v30 }
  0xcb   : > { %4248 = vmatmul.mubr.msk.f32.vlgmr.msra.gmra.mxu1 %vm466_vm0, %v4761_v21 }
  0xcc   : > { %4262 = vmatpush3.msra.mxu1 %v4727_v16  ;;  %4250 = vmatprep.mubr.msk.f32.mxu1 %vm466_vm0, %v4768_v23 }
  0xcd   : > { %4243 = vmatmul.mubr.msk.f32.gmra.mxu0 %vm466_vm0, %v3515_v46  ;;  %4263 = vmatprep.subr.mxu1 %v4734_v17 }
  0xce   : > { %4255 = vmatprep.mubr.msk.f32.mxu0 %vm466_vm0, %v4715_v13  ;;  %4264 = vmatpush3.msra.mxu1 %v4734_v17 }
  0xcf   : > { %4251 = vmatmul.mubr.msk.f32.gmra.mxu1 %vm466_vm0, %v4779_v24  ;;  %4265 = vmatprep.subr.mxu1 %v4737_v18 }
  0xd0   : > { %4266 = vmatpush3.msra.mxu1 %v4737_v18  ;;  %4269 = vmatprep.mubr.msk.f32.mxu1 %vm466_vm0, %v4786_v25 }
  0xd1   : > { %v4902_v47 = vpop.permute.xlu1 %774  ;;  %4256 = vmatmul.mubr.msk.f32.vlgmr.msra.gmra.mxu0 %vm466_vm0, %v4837_v39  ;;  %4267 = vmatprep.subr.mxu1 %v4749_v20 }
  0xd2   : > { %4258 = vmatprep.mubr.msk.f32.mxu0 %vm466_vm0, %v4846_v40  ;;  %4268 = vmatpush3.msra.mxu1 %v4749_v20  ;;  %v780_v50 = vpop.permute.xlu0 %779 }
  0xd3   : > { %4270 = vmatmul.mubr.msk.f32.vlgmr.msra.gmra.mxu1 %vm466_vm0, %v3513_v44  ;;  %4289 = vmatprep.subr.mxu1 %v5935_v30 }
  0xd4   : > { %4272 = vmatprep.mubr.msk.f32.mxu1 %vm466_vm0, %v3514_v45  ;;  %4290 = vmatpush3.msra.mxu1 %v5935_v30 }
  0xd5   : > { %v770_v48 = vpop.permute.xlu1 %769  ;;  %4259 = vmatmul.mubr.msk.f32.gmra.mxu0 %vm466_vm0, %v451_v43 }
  0xd6   : > { %4283 = vmatprep.mubr.msk.f32.mxu0 %vm466_vm0, %v4715_v13  ;;  %v765_v51 = vpop.permute.xlu0 %764 }
  0xd7   : > { %4273 = vmatmul.mubr.msk.f32.gmra.mxu1 %vm466_vm0, %v3515_v46 }
  0xd8   : > { %4291 = vmatprep.mubr.msk.f32.mxu1 %vm466_vm0, %v4786_v25 }
  0xd9   : > { %v1099_v49 = vpop.permute.xlu1 %1098 }
  0xda   : > { %4275 = vmatprep.subr.mxu0 %v1099_v49  ;;  %v1097_v52 = vpop.permute.xlu0 %1096 }
  0xdb   : > { %4276 = vmatpush3.msra.mxu0 %v1099_v49  ;;  %4292 = vmatmul.mubr.msk.f32.vlgmr.msra.gmra.mxu1 %vm466_vm0, %v3513_v44  ;;  %v3566_v49 = vld [vmem:[%s5927_s3 + $0x30] sm:$0xff] }
  0xdc   : > { %4294 = vmatprep.mubr.msk.f32.mxu1 %vm466_vm0, %v3514_v45  ;;  %4277 = vmatprep.subr.mxu0 %v1097_v52 }
  0xdd   : > { %v1095_v53 = vpop.permute.xlu1 %1094  ;;  %4278 = vmatpush3.msra.mxu0 %v1097_v52 }
  0xde   : > { %4279 = vmatprep.subr.mxu0 %v1095_v53  ;;  %v1093_v54 = vpop.permute.xlu0 %1092 }
  0xdf   : > { %4295 = vmatmul.mubr.msk.f32.gmra.mxu1 %vm466_vm0, %v3515_v46  ;;  %4280 = vmatpush3.msra.mxu0 %v1095_v53  ;;  %v3567_v53 = vld [vmem:[%s5927_s3 + $0x38] sm:$0xff] }
  0xe0   : > { %4281 = vmatprep.subr.mxu0 %v1093_v54  ;;  %4319 = vmatprep.mubr.msk.f32.mxu1 %vm466_vm0, %v1365_v33 }
  0xe1   : > { %4282 = vmatpush3.msra.mxu0 %v1093_v54  ;;  %v1677_v54 = vld [vmem:[#allocation5 + $0x18] sm:$0xff] }
  0xe2   : > { %4284 = vmatmul.mubr.msk.f32.vlgmr.msra.gmra.mxu0 %vm466_vm0, %v4837_v39 }
  0xe3   : > { %4286 = vmatprep.mubr.msk.f32.mxu0 %vm466_vm0, %v4846_v40 }
  0xe6   : > { %4287 = vmatmul.mubr.msk.f32.gmra.mxu0 %vm466_vm0, %v451_v43 }
  0xe7   : > { %4305 = vmatprep.mubr.msk.f32.mxu0 %vm466_vm0, %v3564_v3 }
 0x111   : > { %v4213_v55 = vpop.f32.mrf.mxu0 }
 0x113   : > { %v545_v56 = vpop.f32.mrf.mxu0 }
 0x115   : > { %v4216_v58 = vpop.f32.mrf.mxu0 }
 0x117   : > { %v555_v60 = vpop.f32.mrf.mxu0 }
 0x183   : > { %v4227_v57 = vpop.f32.mrf.mxu1 }
 0x184   : > { %v648_v62 = vadd.f32 %v4227_v57, %v4213_v55  ;;  %v3580_v55 = vld [vmem:[%s5927_s3 + $0x40] sm:$0xff] }
 0x185   : > { %v642_v59 = vpop.f32.mrf.mxu1 }
 0x186   : > { %v643_v11 = vadd.f32 %v642_v59, %v545_v56  ;;  %v1676_v59 = vld [vmem:[#allocation5 + $0x10] sm:$0xff] }
 0x187   : > { %v4230_v61 = vpop.f32.mrf.mxu1 }
 0x188   : > { %v658_v12 = vadd.f32 %v4230_v61, %v4216_v58  ;;  %v1675_v58 = vld [vmem:[#allocation5 + $0x8] sm:$0xff]  ;;  %v1674_v61 = vld [vmem:[#allocation5] sm:$0xff] }
 0x189   : > { %v652_v63 = vpop.f32.mrf.mxu1  ;;  %v4241_v1 = vpop.f32.mrf.mxu0 }
 0x18a   : > { %v759_v4 = vadd.f32 %v4241_v1, %v648_v62  ;;  %v653_v14 = vadd.f32 %v652_v63, %v555_v60  ;;  %v1714_v60 = vld [vmem:[%s5931_s7] sm:$0xff]  ;;  %v1715_v62 = vld [vmem:[%s5931_s7 + $0x8] sm:$0xff] }
 0x18b   : > { %v739_v6 = vpop.f32.mrf.mxu0  ;;  %v4249_v10 = vpop.f32.mrf.mxu1 }
 0x18c   : > { %v783_v13 = vadd.f32 %v770_v48, %v759_v4  ;;  %v758_v19 = vadd.f32 %v739_v6, %v643_v11  ;;  %v3565_v48 = vld [vmem:[%s5927_s3 + $0x28] sm:$0xff]  ;;  %v4430_v10 = vpop.permute.xlu0 %4429 }
 0x18d   : > { %v4244_v16 = vpop.f32.mrf.mxu0  ;;  %v870_v17 = vpop.f32.mrf.mxu1 }
 0x18e   : > { %v792_v18 = vmul.f32 %v790_v5, %v783_v13  ;;  %v761_v20 = vadd.f32 %v4244_v16, %v658_v12  ;;  %vm787_vm10 = vcmp.ge.f32.partialorder %v783_v13, 0.0  ;;  %v782_v29 = vadd.f32 %v765_v51, %v758_v19 }
 0x18f   : > { %v749_v21 = vpop.f32.mrf.mxu0  ;;  %v4252_v22 = vpop.f32.mrf.mxu1 }
 0x190   : > { %v785_v23 = vadd.f32 %v780_v50, %v761_v20  ;;  %v760_v24 = vadd.f32 %v749_v21, %v653_v14  ;;  %v796_v25 = vsel %vm787_vm10, %v783_v13, %v792_v18  ;;  %v791_v41 = vmul.f32 %v790_v5, %v782_v29 }
 0x191   : > { %v800_v26 = vsel %vm389_vm1, %v796_v25, 0.0  ;;  %v4257_v27 = vpop.f32.mrf.mxu0  ;;  %v880_v28 = vpop.f32.mrf.mxu1  ;;  %vm786_vm13 = vcmp.ge.f32.partialorder %v782_v29, 0.0  ;;  %v4431_v13 = vunpack.i.l.bf16 %v4430_v10 }
 0x192   : > { %v794_v31 = vmul.f32 %v790_v5, %v785_v23  ;;  %v784_v32 = vadd.f32 %v4902_v47, %v760_v24  ;;  %1303 = vrot.lane.b32.xlu0 %v800_v26, %s4552_s22  ;;  %vm789_vm11 = vcmp.ge.f32.partialorder %v785_v23, 0.0  ;;  %v795_v47 = vsel %vm786_vm13, %v782_v29, %v791_v41  ;;  %v3581_v41 = vld [vmem:[%s5927_s3 + $0x48] sm:$0xff] }
 0x193   : > { %v955_v34 = vpop.f32.mrf.mxu0  ;;  %v4271_v35 = vpop.f32.mrf.mxu1  ;;  %v799_v52 = vsel %vm389_vm1, %v795_v47, 0.0 }
 0x194   : > { %v793_v36 = vmul.f32 %v790_v5, %v784_v32  ;;  %v798_v37 = vsel %vm789_vm11, %v785_v23, %v794_v31  ;;  %vm788_vm12 = vcmp.ge.f32.partialorder %v784_v32, 0.0  ;;  %v4425_v5 = vpop.permute.xlu1 %4424  ;;  %v1366_v35 = vld [vmem:[%s5927_s3 + $0x8] sm:$0xff] }
 0x195   : > { %4297 = vmatprep.subr.msk.mxu0 %vm389_vm1, %v798_v37  ;;  %v802_v38 = vsel %vm389_vm1, %v798_v37, 0.0  ;;  %v4260_v39 = vpop.f32.mrf.mxu0  ;;  %v1040_v40 = vpop.f32.mrf.mxu1  ;;  %v4426_v14 = vunpack.i.l.bf16 %v4425_v5  ;;  %v4427_v21 = vunpack.i.h.bf16 %v4425_v5 }
 0x196   : > { %4298 = vmatpush3.msk.msra.mxu0 %vm389_vm1, %v798_v37  ;;  %1339 = vrot.lane.b32.xlu1 %v802_v38, %s4551_s21  ;;  %v797_v42 = vsel %vm788_vm12, %v784_v32, %v793_v36  ;;  %v1367_v36 = vld [vmem:[%s5927_s3 + $0x10] sm:$0xff]  ;;  %v1368_v40 = vld [vmem:[%s5927_s3 + $0x18] sm:$0xff] }
 0x197   : > { %1307 = vrot.lane.b32.xlu0 %v802_v38, %s4552_s22  ;;  %4299 = vmatprep.subr.msk.mxu0 %vm389_vm1, %v797_v42  ;;  %v965_v43 = vpop.f32.mrf.mxu0  ;;  %v4274_v44 = vpop.f32.mrf.mxu1  ;;  %v801_v45 = vsel %vm389_vm1, %v797_v42, 0.0 }
 0x198   : > { %4300 = vmatpush3.msk.msra.mxu0 %vm389_vm1, %v797_v42  ;;  %v4435_v6 = vpop.permute.xlu1 %4434  ;;  %v3582_v42 = vld [vmem:[%s5927_s3 + $0x50] sm:$0xff]  ;;  %v3583_v43 = vld [vmem:[%s5927_s3 + $0x58] sm:$0xff]  ;;  %v1706_v44 = vld [vmem:[%s5930_s6] sm:$0xff] }
 0x199   : > { %4301 = vmatprep.subr.msk.mxu0 %vm389_vm1, %v796_v25  ;;  %v1050_v46 = vpop.f32.mrf.mxu1  ;;  %v4436_v20 = vunpack.i.l.bf16 %v4435_v6  ;;  %v4437_v28 = vunpack.i.h.bf16 %v4435_v6 }
 0x19a   : > { %4302 = vmatpush3.msk.msra.mxu0 %vm389_vm1, %v796_v25  ;;  %1337 = vrot.lane.b32.xlu1 %v801_v45, %s4551_s21  ;;  %v4432_v25 = vunpack.i.h.bf16 %v4430_v10 }
 0x19b   : > { %1305 = vrot.lane.b32.xlu0 %v801_v45, %s4552_s22  ;;  %4303 = vmatprep.subr.msk.mxu0 %vm389_vm1, %v795_v47  ;;  %v4293_v50 = vpop.f32.mrf.mxu1  ;;  %v5037_v45 = vshrl.u32 %v385_v0, 7 }
 0x19c   : > { %4304 = vmatpush3.msk.msra.mxu0 %vm389_vm1, %v795_v47  ;;  %v4440_v11 = vpop.permute.xlu1 %4439  ;;  %v5041_v47 = vadd.s32 128, %v4690_v2 }
 0x19d   : > { %4306 = vmatmul.mubr.msk.f32.vlgmr.msra.gmra.mxu0 %vm466_vm0, %v3565_v48  ;;  %v1255_v51 = vpop.f32.mrf.mxu1  ;;  %v4441_v27 = vunpack.i.l.bf16 %v4440_v11  ;;  %v4442_v37 = vunpack.i.h.bf16 %v4440_v11  ;;  %v1732_v46 = vadd.s32 120, %v5037_v45  ;;  %v1731_v48 = vadd.s32 112, %v5037_v45 }
 0x19e   : > { %1335 = vrot.lane.b32.xlu1 %v800_v26, %s4551_s21  ;;  %4308 = vmatprep.mubr.msk.f32.mxu0 %vm466_vm0, %v3566_v49  ;;  %v1730_v49 = vadd.s32 104, %v5037_v45  ;;  %v1729_v50 = vadd.s32 96, %v5037_v45 }
 0x19f   : > { %1301 = vrot.lane.b32.xlu0 %v799_v52, %s4552_s22  ;;  %v4296_v56 = vpop.f32.mrf.mxu1  ;;  %v5046_v51 = vmul.u32 4, %v1732_v46 }
 0x1a1   : > { %4309 = vmatmul.mubr.msk.f32.gmra.mxu0 %vm466_vm0, %v3567_v53  ;;  %v1265_v57 = vpop.f32.mrf.mxu1  ;;  %v5052_v53 = vsub.s32 %v5041_v47, %v5046_v51  ;;  %v5056_v0 = vsub.s32 %v4690_v2, %v5046_v51 }
 0x1a2   : > { %1695 = vperm.xlu1 %4422, %v1677_v54   ;;  %4333 = vmatprep.mubr.msk.f32.mxu0 %vm466_vm0, %v3580_v55  ;;  %v4285_v63 = vpop.f32.mrf.mxu0  ;;  %v5058_v54 = vmul.u32 4, %v1730_v49  ;;  %v5068_v57 = vmul.u32 4, %v1729_v50 }
 0x1a3   : > { %1333 = vrot.lane.b32.xlu0 %v799_v52, %s4551_s21  ;;  %v5048_v52 = vmul.u32 4, %v1731_v48  ;;  %vm2069_vm14 = vcmp.eq.s32.totalorder %v5052_v53, 1  ;;  %vm2068_vm15 = vcmp.eq.s32.totalorder %v5056_v0, 1 }
 0x1a4   : > { %v1170_v1 = vpop.f32.mrf.mxu0  ;;  %v5089_v63 = vsub.s32 %v5041_v47, %v5068_v57 }
 0x1a5   : > { %v5062_v55 = vsub.s32 %v5041_v47, %v5048_v52  ;;  %v5066_v56 = vsub.s32 %v4690_v2, %v5048_v52  ;;  %v5093_v1 = vsub.s32 %v4690_v2, %v5068_v57 }
 0x1a6   : > { %1685 = vperm.xlu1 %4422, %v1675_v58   ;;  %v4288_v3 = vpop.f32.mrf.mxu0  ;;  %v5941_v58 = vmov 1.0   ;;  %vm2057_vm5 = vcmp.eq.s32.totalorder %v5089_v63, 1 }
 0x1a7   : > { %1690 = vperm.xlu0 %4421, %v1676_v59   ;;  %vm2065_vm1 = vcmp.eq.s32.totalorder %v5062_v55, 1  ;;  %vm2064_vm2 = vcmp.eq.s32.totalorder %v5066_v56, 1  ;;  %v5078_v59 = vsub.s32 %v5041_v47, %v5058_v54  ;;  %v1726_v3 = vadd.s32 72, %v5037_v45 }
 0x1a8   : > { %v1180_v4 = vpop.f32.mrf.mxu0 }
 0x1a9   : > { %vm2061_vm3 = vcmp.eq.s32.totalorder %v5078_v59, 1  ;;  %v1725_v4 = vadd.s32 64, %v5037_v45 }
 0x1aa   : > { %3347 = vperm.xlu1 %4422, %v1714_v60   ;;  %v5082_v60 = vsub.s32 %v4690_v2, %v5058_v54 }
 0x1ab   : > { %1680 = vperm.xlu0 %4421, %v1674_v61   ;;  %v1728_v61 = vadd.s32 88, %v5037_v45 }
 0x1ac   : > { %vm2060_vm4 = vcmp.eq.s32.totalorder %v5082_v60, 1 }
 0x1ad   : > { %v5104_v5 = vmul.u32 4, %v1728_v61 }
 0x1af   : > { %3352 = vperm.xlu0 %4421, %v1715_v62   ;;  %v1727_v62 = vadd.s32 80, %v5037_v45  ;;  %v5112_v10 = vsub.s32 %v5041_v47, %v5104_v5  ;;  %v5116_v11 = vsub.s32 %v4690_v2, %v5104_v5 }
 0x1b1   : > { %v5106_v6 = vmul.u32 4, %v1727_v62  ;;  %vm2052_vm8 = vcmp.eq.s32.totalorder %v5116_v11, 1 }
 0x204   : > { %v1304_v12 = vpop.permute.xlu0 %1303 }
 0x205   : > { %v1330_v31 = vsel %vm418_vm6, %v4432_v25, %v1304_v12  ;;  %v5118_v12 = vmul.u32 4, %v1726_v3 }
 0x208   : > { %v1340_v16 = vpop.permute.xlu1 %1339 }
 0x209   : > { %v1308_v17 = vpop.permute.xlu0 %1307  ;;  %v1364_v18 = vsel %vm419_vm7, %v4431_v13, %v1340_v16  ;;  %v5122_v13 = vsub.s32 %v5041_v47, %v5106_v6  ;;  %v5128_v16 = vmul.u32 4, %v1725_v4 }
 0x20a   : > { %v1332_v19 = vsel %vm418_vm6, %v4426_v14, %v1308_v17  ;;  %4325 = vmatprep.subr.mxu0 %v1364_v18  ;;  %v5126_v14 = vsub.s32 %v4690_v2, %v5106_v6  ;;  %v5138_v17 = vsub.s32 %v5041_v47, %v5118_v12 }
 0x20b   : > { %4311 = vmatprep.subr.mxu1 %v1332_v19  ;;  %4326 = vmatpush3.msra.mxu0 %v1364_v18  ;;  %vm2049_vm9 = vcmp.eq.s32.totalorder %v5122_v13, 1  ;;  %v5142_v18 = vsub.s32 %v4690_v2, %v5118_v12 }
 0x20c   : > { %4312 = vmatpush3.msra.mxu1 %v1332_v19  ;;  %v1338_v22 = vpop.permute.xlu1 %1337  ;;  %vm2048_vm10 = vcmp.eq.s32.totalorder %v5126_v14, 1  ;;  %v1724_v19 = vadd.s32 56, %v5037_v45  ;;  %vm2045_vm11 = vcmp.eq.s32.totalorder %v5138_v17, 1 }
 0x20d   : > { %v1306_v23 = vpop.permute.xlu0 %1305  ;;  %v1363_v24 = vsel %vm419_vm7, %v4436_v20, %v1338_v22  ;;  %v1723_v20 = vadd.s32 48, %v5037_v45  ;;  %v5153_v22 = vsub.s32 %v4690_v2, %v5128_v16  ;;  %vm2044_vm12 = vcmp.eq.s32.totalorder %v5142_v18, 1 }
 0x20e   : > { %v1331_v26 = vsel %vm418_vm6, %v4427_v21, %v1306_v23  ;;  %4327 = vmatprep.subr.mxu0 %v1363_v24  ;;  %v5149_v21 = vsub.s32 %v5041_v47, %v5128_v16  ;;  %v1722_v23 = vadd.s32 40, %v5037_v45  ;;  %v5164_v25 = vmul.u32 4, %v1724_v19 }
 0x20f   : > { %4313 = vmatprep.subr.mxu1 %v1331_v26  ;;  %4328 = vmatpush3.msra.mxu0 %v1363_v24  ;;  %v1721_v24 = vadd.s32 32, %v5037_v45 }
 0x210   : > { %4314 = vmatpush3.msra.mxu1 %v1331_v26  ;;  %v1336_v29 = vpop.permute.xlu1 %1335  ;;  %vm2041_vm13 = vcmp.eq.s32.totalorder %v5149_v21, 1  ;;  %v5166_v26 = vmul.u32 4, %v1723_v20 }
 0x211   : > { %4315 = vmatprep.subr.mxu1 %v1330_v31  ;;  %v1302_v32 = vpop.permute.xlu0 %1301  ;;  %v1362_v33 = vsel %vm419_vm7, %v4441_v27, %v1336_v29  ;;  %v5172_v27 = vsub.s32 %v5041_v47, %v5164_v25  ;;  %v5178_v29 = vmul.u32 4, %v1722_v23 }
 0x212   : > { %4316 = vmatpush3.msra.mxu1 %v1330_v31  ;;  %v1329_v34 = vsel %vm418_vm6, %v4437_v28, %v1302_v32  ;;  %4329 = vmatprep.subr.mxu0 %v1362_v33  ;;  %vm2056_vm6 = vcmp.eq.s32.totalorder %v5093_v1, 1  ;;  %v5176_v28 = vsub.s32 %v4690_v2, %v5164_v25  ;;  %v5182_v31 = vsub.s32 %v5041_v47, %v5166_v26 }
 0x213   : > { %4317 = vmatprep.subr.mxu1 %v1329_v34  ;;  %4330 = vmatpush3.msra.mxu0 %v1362_v33  ;;  %5978 = vst [vmem:[#allocation11_spill] sm:$0xff] %v5172_v27  ;;  %v5186_v32 = vsub.s32 %v4690_v2, %v5166_v26  ;;  %v5188_v33 = vmul.u32 4, %v1721_v24 }
 0x214   : > { %4318 = vmatpush3.msra.mxu1 %v1329_v34  ;;  %5979 = vst [vmem:[#allocation12_spill] sm:$0xff] %v5176_v28  ;;  %5980 = vst [vmem:[#allocation13_spill] sm:$0xff] %v5182_v31  ;;  %v5198_v34 = vsub.s32 %v5041_v47, %v5178_v29 }
 0x215   : > { %4320 = vmatmul.mubr.msk.f32.vlgmr.msra.gmra.mxu1 %vm466_vm0, %v1366_v35  ;;  %v1334_v38 = vpop.permute.xlu0 %1333  ;;  %5981 = vst [vmem:[#allocation14_spill] sm:$0xff] %v5186_v32  ;;  %v5202_v35 = vsub.s32 %v4690_v2, %v5178_v29 }
 0x216   : > { %v1361_v39 = vsel %vm419_vm7, %v4442_v37, %v1334_v38  ;;  %4322 = vmatprep.mubr.msk.f32.mxu1 %vm466_vm0, %v1367_v36  ;;  %vm2053_vm7 = vcmp.eq.s32.totalorder %v5112_v10, 1  ;;  %5982 = vst [vmem:[#allocation15_spill] sm:$0xff] %v5198_v34  ;;  %v1720_v36 = vadd.s32 24, %v5037_v45  ;;  %v5208_v37 = vsub.s32 %v5041_v47, %v5188_v33 }
 0x217   : > { %4331 = vmatprep.subr.mxu0 %v1361_v39  ;;  %5983 = vst [vmem:[#allocation16_spill] sm:$0xff] %v5202_v35  ;;  %v5212_v38 = vsub.s32 %v4690_v2, %v5188_v33 }
 0x218   : > { %4332 = vmatpush3.msra.mxu0 %v1361_v39  ;;  %5984 = vst [vmem:[#allocation17_spill] sm:$0xff] %v5208_v37  ;;  %v5221_v39 = vmul.u32 4, %v1720_v36 }
 0x219   : > { %4323 = vmatmul.mubr.msk.f32.gmra.mxu1 %vm466_vm0, %v1368_v40  ;;  %4334 = vmatmul.mubr.msk.f32.vlgmr.msra.gmra.mxu0 %vm466_vm0, %v3581_v41  ;;  %5985 = vst [vmem:[#allocation18_spill] sm:$0xff] %v5212_v38 }
 0x21a   : > { %4336 = vmatprep.mubr.msk.f32.mxu0 %vm466_vm0, %v3582_v42  ;;  %4347 = vmatprep.mubr.msk.f32.mxu1 %vm466_vm0, %v1706_v44  ;;  %v5227_v40 = vsub.s32 %v5041_v47, %v5221_v39  ;;  %v5231_v41 = vsub.s32 %v4690_v2, %v5221_v39 }
 0x21b   : > { %3852 = vmatprep.subr.msk.mxu0 %vm2069_vm14, %v5941_v58  ;;  %vm2040_vm14 = vcmp.eq.s32.totalorder %v5153_v22, 1 }
 0x21c   : > { %3853 = vmatpush1.msk.msra.mxu0 %vm2068_vm15, %v5941_v58  ;;  %vm2037_vm15 = vcmp.eq.s32.totalorder %v5172_v27, 1  ;;  %5986 = vst [vmem:[#allocation19_spill] sm:$0xff] %v5227_v40  ;;  %5987 = vst [vmem:[#allocation20_spill] sm:$0xff] %v5231_v41 }
 0x21d   : > { %4337 = vmatmul.mubr.msk.f32.gmra.mxu0 %vm466_vm0, %v3583_v43  ;;  %3854 = vmatprep.subr.msk.mxu0 %vm2065_vm1, %v5941_v58  ;;  %vm2036_vm1 = vcmp.eq.s32.totalorder %v5176_v28, 1  ;;  %v1696_v62 = vpop.permute.xlu1 %1695 }
 0x21e   : > { %2777 = vmatprep.mubr.f32.mxu0 %v5935_v30  ;;  %3855 = vmatpush1.msk.msra.mxu0 %vm2064_vm2, %v5941_v58  ;;  %vm2033_vm2 = vcmp.eq.s32.totalorder %v5182_v31, 1 }
 0x21f   : > { %3856 = vmatprep.subr.msk.mxu0 %vm2061_vm3, %v5941_v58  ;;  %vm2032_vm3 = vcmp.eq.s32.totalorder %v5186_v32, 1  ;;  %v5238_v32 = vadd.s32 384, %v4690_v2 }
 0x220   : > { %3857 = vmatpush1.msk.msra.mxu0 %vm2060_vm4, %v5941_v58  ;;  %vm2029_vm4 = vcmp.eq.s32.totalorder %v5198_v34, 1 }
 0x221   : > { %3858 = vmatprep.subr.msk.mxu0 %vm2057_vm5, %v5941_v58  ;;  %vm2028_vm5 = vcmp.eq.s32.totalorder %v5202_v35, 1  ;;  %v1686_v34 = vpop.permute.xlu1 %1685 }
 0x222   : > { %3859 = vmatpush1.msk.msra.mxu0 %vm2056_vm6, %v5941_v58  ;;  %vm2025_vm6 = vcmp.eq.s32.totalorder %v5208_v37, 1  ;;  %v1691_v23 = vpop.permute.xlu0 %1690 }
 0x223   : > { %3860 = vmatprep.subr.msk.mxu0 %vm2053_vm7, %v5941_v58  ;;  %vm2024_vm7 = vcmp.eq.s32.totalorder %v5212_v38, 1 }
 0x224   : > { %3861 = vmatpush1.msk.msra.mxu0 %vm2052_vm8, %v5941_v58  ;;  %vm2021_vm8 = vcmp.eq.s32.totalorder %v5227_v40, 1 }
 0x225   : > { %3862 = vmatprep.subr.msk.mxu0 %vm2049_vm9, %v5941_v58  ;;  %vm2020_vm9 = vcmp.eq.s32.totalorder %v5231_v41, 1 }
 0x226   : > { %3863 = vmatpush1.msk.msra.mxu0 %vm2048_vm10, %v5941_v58 }
 0x227   : > { %3864 = vmatprep.subr.msk.mxu0 %vm2045_vm11, %v5941_v58 }
 0x228   : > { %3865 = vmatpush1.msk.msra.mxu0 %vm2044_vm12, %v5941_v58 }
 0x229   : > { %3866 = vmatprep.subr.msk.mxu0 %vm2041_vm13, %v5941_v58 }
 0x22a   : > { %3867 = vmatpush1.msk.msra.mxu0 %vm2040_vm14, %v5941_v58 }
 0x22b   : > { %3868 = vmatprep.subr.msk.mxu0 %vm2037_vm15, %v5941_v58 }
 0x22c   : > { %3869 = vmatpush1.msk.msra.mxu0 %vm2036_vm1, %v5941_v58 }
 0x22d   : > { %3870 = vmatprep.subr.msk.mxu0 %vm2033_vm2, %v5941_v58 }
 0x22e   : > { %3871 = vmatpush1.msk.msra.mxu0 %vm2032_vm3, %v5941_v58 }
 0x22f   : > { %3872 = vmatprep.subr.msk.mxu0 %vm2029_vm4, %v5941_v58 }
 0x230   : > { %3873 = vmatpush1.msk.msra.mxu0 %vm2028_vm5, %v5941_v58 }
 0x231   : > { %3874 = vmatprep.subr.msk.mxu0 %vm2025_vm6, %v5941_v58 }
 0x232   : > { %3875 = vmatpush1.msk.msra.mxu0 %vm2024_vm7, %v5941_v58 }
 0x233   : > { %3876 = vmatprep.subr.msk.mxu0 %vm2021_vm8, %v5941_v58 }
 0x234   : > { %3877 = vmatpush1.msk.msra.mxu0 %vm2020_vm9, %v5941_v58 }
 0x25d   : > { %v4307_v42 = vpop.f32.mrf.mxu0 }
 0x25f   : > { %v1452_v43 = vpop.f32.mrf.mxu0 }
 0x261   : > { %v4310_v44 = vpop.f32.mrf.mxu0 }
 0x263   : > { %v1462_v48 = vpop.f32.mrf.mxu0 }
 0x2d5   : > { %v4321_v46 = vpop.f32.mrf.mxu1 }
 0x2d6   : > { %v1555_v19 = vadd.f32 %v4321_v46, %v4307_v42  ;;  %v5242_v42 = vadd.s32 256, %v4690_v2 }
 0x2d7   : > { %v1549_v49 = vpop.f32.mrf.mxu1 }
 0x2d8   : > { %v1550_v36 = vadd.f32 %v1549_v49, %v1452_v43  ;;  %v1712_v49 = vld [vmem:[%s5930_s6 + $0x30] sm:$0xff] }
 0x2d9   : > { %v4324_v50 = vpop.f32.mrf.mxu1  ;;  %v4335_v61 = vpop.f32.mrf.mxu0 }
 0x2da   : > { %v1565_v20 = vadd.f32 %v4324_v50, %v4310_v44  ;;  %v1671_v30 = vadd.f32 %v4335_v61, %v1555_v19  ;;  %v1681_v44 = vpop.permute.xlu0 %1680  ;;  %v5346_v50 = vsub.s32 %v5238_v32, %v5128_v16  ;;  %v5353_v61 = vsub.s32 %v5242_v42, %v5128_v16 }
 0x2db   : > { %v1559_v3 = vpop.f32.mrf.mxu1  ;;  %v1651_v4 = vpop.f32.mrf.mxu0  ;;  %v5369_v16 = vsub.s32 %v5242_v42, %v5164_v25  ;;  %v5992_v19 = vmov 0.0  }
 0x2dc   : > { %v1560_v41 = vadd.f32 %v1559_v3, %v1462_v48  ;;  %v1670_v38 = vadd.f32 %v1651_v4, %v1550_v36  ;;  %v1699_v31 = vadd.f32 %v1686_v34, %v1671_v30  ;;  %v5252_v30 = vsub.s32 %v5242_v42, %v5046_v51 }
 0x2dd   : > { %v4338_v24 = vpop.f32.mrf.mxu0  ;;  %v5289_v34 = vsub.s32 %v5242_v42, %v5068_v57  ;;  %v5331_v48 = vsub.s32 %v5238_v32, %v5118_v12  ;;  %vm2043_vm9 = vcmp.eq.s32.totalorder %v5346_v50, 1  ;;  %v5375_v3 = vsub.s32 %v5238_v32, %v5166_v26 }
 0x2de   : > { %v1673_v40 = vadd.f32 %v4338_v24, %v1565_v20  ;;  %v1698_v43 = vadd.f32 %v1681_v44, %v1670_v38  ;;  %vm2070_vm11 = vcmp.eq.s32.totalorder %v5252_v30, 1  ;;  %v5314_v38 = vsub.s32 %v5238_v32, %v5106_v6 }
 0x2df   : > { %v1661_v58 = vpop.f32.mrf.mxu0  ;;  %vm2058_vm2 = vcmp.eq.s32.totalorder %v5289_v34, 1  ;;  %vm2047_vm7 = vcmp.eq.s32.totalorder %v5331_v48, 1  ;;  %5989 = vst [vmem:[#allocation21_spill] sm:$0xff] %v5375_v3  ;;  %v5382_v4 = vsub.s32 %v5242_v42, %v5166_v26  ;;  %v5395_v20 = vsub.s32 %v5242_v42, %v5178_v29 }
 0x2e0   : > { %v1701_v37 = vadd.f32 %v1696_v62, %v1673_v40  ;;  %v1672_v35 = vadd.f32 %v1661_v58, %v1560_v41  ;;  %v5247_v58 = vsub.s32 %v5238_v32, %v5046_v51  ;;  %v1703_v40 = vadd.f32 %v1699_v31, %v4707_v9  ;;  %v1707_v9 = vld [vmem:[%s5930_s6 + $0x8] sm:$0xff] }
 0x2e1   : > { %v5269_v51 = vsub.s32 %v5238_v32, %v5058_v54  ;;  %v5988_v31 = vmov 1.0   ;;  %v5321_v41 = vsub.s32 %v5242_v42, %v5106_v6  ;;  %v5340_v6 = vsub.s32 %v5242_v42, %v5118_v12  ;;  %v1713_v12 = vld [vmem:[%s5930_s6 + $0x38] sm:$0xff]  ;;  %5990 = vst [vmem:[#allocation22_spill] sm:$0xff] %v5382_v4  ;;  %5993 = vst [vmem:[#allocation24_spill] sm:$0xff] %v5395_v20 }
 0x2e2   : > { %v1700_v28 = vadd.f32 %v1691_v23, %v1672_v35  ;;  %v1705_v27 = vadd.f32 %v1701_v37, %v4699_v7  ;;  %v5256_v7 = vsub.s32 %v5238_v32, %v5048_v52  ;;  %vm2071_vm10 = vcmp.eq.s32.totalorder %v5247_v58, 1  ;;  %v1710_v37 = vld [vmem:[%s5930_s6 + $0x20] sm:$0xff] }
 0x2e3   : > { %vm2063_vm14 = vcmp.eq.s32.totalorder %v5269_v51, 1  ;;  %v5299_v35 = vsub.s32 %v5238_v32, %v5104_v5  ;;  %vm2051_vm5 = vcmp.eq.s32.totalorder %v5314_v38, 1  ;;  %vm2050_vm6 = vcmp.eq.s32.totalorder %v5321_v41, 1 }
 0x2e4   : > { %4339 = vmatprep.subr.mxu1 %v1705_v27  ;;  %v1704_v46 = vadd.f32 %v1700_v28, %v4703_v8  ;;  %v1702_v8 = vadd.f32 %v1698_v43, %v4722_v15  ;;  %v1708_v15 = vld [vmem:[%s5930_s6 + $0x10] sm:$0xff]  ;;  %vm2067_vm12 = vcmp.eq.s32.totalorder %v5256_v7, 1  ;;  %v5282_v28 = vsub.s32 %v5238_v32, %v5068_v57 }
 0x2e5   : > { %4340 = vmatpush3.msra.mxu1 %v1705_v27  ;;  %v5261_v27 = vsub.s32 %v5242_v42, %v5048_v52  ;;  %v5277_v52 = vsub.s32 %v5242_v42, %v5058_v54  ;;  %v1709_v54 = vld [vmem:[%s5930_s6 + $0x18] sm:$0xff]  ;;  %v5308_v57 = vsub.s32 %v5242_v42, %v5104_v5  ;;  %v1711_v5 = vld [vmem:[%s5930_s6 + $0x28] sm:$0xff]  ;;  %vm2055_vm3 = vcmp.eq.s32.totalorder %v5299_v35, 1 }
 0x2e6   : > { %4341 = vmatprep.subr.mxu1 %v1704_v46  ;;  %vm2059_vm1 = vcmp.eq.s32.totalorder %v5282_v28, 1  ;;  %v5363_v62 = vsub.s32 %v5238_v32, %v5164_v25  ;;  %vm2046_vm8 = vcmp.eq.s32.totalorder %v5340_v6, 1  ;;  %v5388_v25 = vsub.s32 %v5238_v32, %v5178_v29 }
 0x2e7   : > { %4342 = vmatpush3.msra.mxu1 %v1704_v46  ;;  %vm2066_vm13 = vcmp.eq.s32.totalorder %v5261_v27, 1  ;;  %vm2062_vm15 = vcmp.eq.s32.totalorder %v5277_v52, 1  ;;  %vm2054_vm4 = vcmp.eq.s32.totalorder %v5308_v57, 1  ;;  %v5401_v26 = vsub.s32 %v5238_v32, %v5188_v33 }
 0x2e8   : > { %4343 = vmatprep.subr.mxu1 %v1703_v40  ;;  %5991 = vst [vmem:[#allocation23_spill] sm:$0xff] %v5388_v25  ;;  %v5407_v23 = vsub.s32 %v5242_v42, %v5188_v33  ;;  %v5413_v29 = vsub.s32 %v5238_v32, %v5221_v39  ;;  %v5419_v24 = vsub.s32 %v5242_v42, %v5221_v39  ;;  %v1719_v33 = vadd.s32 16, %v5037_v45 }
 0x2e9   : > { %4344 = vmatpush3.msra.mxu1 %v1703_v40  ;;  %5994 = vst [vmem:[#allocation25_spill] sm:$0xff] %v5401_v26  ;;  %v1718_v36 = vadd.s32 8, %v5037_v45 }
 0x2ea   : > { %4345 = vmatprep.subr.mxu1 %v1702_v8  ;;  %v1738_v39 = vmul.u32 4, %v1719_v33 }
 0x2eb   : > { %4346 = vmatpush3.msra.mxu1 %v1702_v8  ;;  %v1737_v46 = vmul.u32 4, %v1718_v36  ;;  %v5998_v36 = vld [vmem:[#allocation12_spill] sm:$0xff] }
 0x2ec   : > { %4348 = vmatmul.mubr.msk.f32.vlgmr.msra.gmra.mxu1 %vm466_vm0, %v1707_v9  ;;  %3884 = vmatprep.subr.msk.mxu1 %vm2071_vm10, %v5988_v31  ;;  %vm2042_vm10 = vcmp.eq.s32.totalorder %v5353_v61, 1  ;;  %v5435_v44 = vsub.s32 %v5041_v47, %v1738_v39  ;;  %v5438_v43 = vsub.s32 %v5238_v32, %v1738_v39  ;;  %v5441_v40 = vsub.s32 %v4690_v2, %v1738_v39 }
 0x2ed   : > { %4350 = vmatprep.mubr.msk.f32.mxu1 %vm466_vm0, %v1708_v15  ;;  %3885 = vmatpush1.msk.msra.mxu1 %vm2070_vm11, %v5988_v31  ;;  %vm2039_vm11 = vcmp.eq.s32.totalorder %v5363_v62, 1  ;;  %v5444_v8 = vsub.s32 %v5242_v42, %v1738_v39  ;;  %v5449_v9 = vsub.s32 %v5041_v47, %v1737_v46  ;;  %v5452_v15 = vsub.s32 %v5238_v32, %v1737_v46  ;;  %v5997_v39 = vld [vmem:[#allocation11_spill] sm:$0xff] }
 0x2ee   : > { %3886 = vmatprep.subr.msk.mxu1 %vm2067_vm12, %v5988_v31  ;;  %vm2035_vm12 = vcmp.eq.s32.totalorder %v5375_v3, 1  ;;  %5995 = vst [vmem:[#allocation26_spill] sm:$0xff] %v5438_v43 }
 0x2ef   : > { %3887 = vmatpush1.msk.msra.mxu1 %vm2066_vm13, %v5988_v31  ;;  %vm2034_vm13 = vcmp.eq.s32.totalorder %v5382_v4, 1 }
 0x2f0   : > { %4351 = vmatmul.mubr.msk.f32.gmra.mxu1 %vm466_vm0, %v1709_v54  ;;  %3888 = vmatprep.subr.msk.mxu1 %vm2063_vm14, %v5988_v31  ;;  %vm2031_vm14 = vcmp.eq.s32.totalorder %v5388_v25, 1  ;;  %v5459_v54 = vsub.s32 %v4690_v2, %v1737_v46 }
 0x2f1   : > { %4353 = vmatprep.mubr.msk.f32.mxu1 %vm466_vm0, %v1710_v37  ;;  %3889 = vmatpush1.msk.msra.mxu1 %vm2062_vm15, %v5988_v31  ;;  %vm2030_vm15 = vcmp.eq.s32.totalorder %v5395_v20, 1  ;;  %v5462_v37 = vsub.s32 %v5242_v42, %v1737_v46  ;;  %v5999_v46 = vld [vmem:[#allocation13_spill] sm:$0xff] }
 0x2f2   : > { %3890 = vmatprep.subr.msk.mxu1 %vm2059_vm1, %v5988_v31  ;;  %vm2027_vm1 = vcmp.eq.s32.totalorder %v5401_v26, 1 }
 0x2f3   : > { %3891 = vmatpush1.msk.msra.mxu1 %vm2058_vm2, %v5988_v31  ;;  %vm2026_vm2 = vcmp.eq.s32.totalorder %v5407_v23, 1  ;;  %5996 = vst [vmem:[#allocation27_spill] sm:$0xff] %v5462_v37 }
 0x2f4   : > { %4354 = vmatmul.mubr.msk.f32.gmra.mxu1 %vm466_vm0, %v1711_v5  ;;  %3892 = vmatprep.subr.msk.mxu1 %vm2055_vm3, %v5988_v31  ;;  %vm2023_vm3 = vcmp.eq.s32.totalorder %v5413_v29, 1  ;;  %v1736_v5 = vmul.u32 4, %v5037_v45 }
 0x2f5   : > { %4356 = vmatprep.mubr.msk.f32.mxu1 %vm466_vm0, %v1712_v49  ;;  %3893 = vmatpush1.msk.msra.mxu1 %vm2054_vm4, %v5988_v31  ;;  %vm2022_vm4 = vcmp.eq.s32.totalorder %v5419_v24, 1 }
 0x2f6   : > { %3894 = vmatprep.subr.msk.mxu1 %vm2051_vm5, %v5988_v31  ;;  %vm2017_vm5 = vcmp.eq.s32.totalorder %v5435_v44, 1  ;;  %v5476_v49 = vsub.s32 %v5041_v47, %v1736_v5  ;;  %v5482_v45 = vsub.s32 %v4690_v2, %v1736_v5  ;;  %v5485_v33 = vsub.s32 %v5242_v42, %v1736_v5 }
 0x2f7   : > { %3895 = vmatpush1.msk.msra.mxu1 %vm2050_vm6, %v5988_v31  ;;  %vm2019_vm6 = vcmp.eq.s32.totalorder %v5438_v43, 1  ;;  %3878 = vmatprep.subr.msk.mxu0 %vm2017_vm5, %v5988_v31  ;;  %vm1873_vm5 = vcmp.eq.s32.totalorder %v5062_v55, 0 }
 0x2f8   : > { %4357 = vmatmul.mubr.msk.f32.gmra.mxu1 %vm466_vm0, %v1713_v12  ;;  %3896 = vmatprep.subr.msk.mxu1 %vm2047_vm7, %v5988_v31  ;;  %vm2038_vm0 = vcmp.eq.s32.totalorder %v5369_v16, 1  ;;  %vm2016_vm7 = vcmp.eq.s32.totalorder %v5441_v40, 1  ;;  %v5479_v12 = vsub.s32 %v5238_v32, %v1736_v5  ;;  %v6000_v5 = vld [vmem:[#allocation14_spill] sm:$0xff] }
 0x2f9   : > { %3897 = vmatpush1.msk.msra.mxu1 %vm2046_vm8, %v5988_v31  ;;  %2854 = vmatprep.mubr.f32.mxu1 %v5992_v19  ;;  %vm2018_vm8 = vcmp.eq.s32.totalorder %v5444_v8, 1 }
 0x2fa   : > { %3898 = vmatprep.subr.msk.mxu1 %vm2043_vm9, %v5988_v31  ;;  %3879 = vmatpush1.msk.msra.mxu0 %vm2016_vm7, %v5988_v31  ;;  %vm2013_vm9 = vcmp.eq.s32.totalorder %v5449_v9, 1  ;;  %vm1872_vm7 = vcmp.eq.s32.totalorder %v5066_v56, 0 }
 0x2fb   : > { %3899 = vmatpush1.msk.msra.mxu1 %vm2042_vm10, %v5988_v31  ;;  %vm2015_vm10 = vcmp.eq.s32.totalorder %v5452_v15, 1  ;;  %3880 = vmatprep.subr.msk.mxu0 %vm2013_vm9, %v5988_v31  ;;  %vm1869_vm9 = vcmp.eq.s32.totalorder %v5078_v59, 0 }
 0x2fc   : > { %3900 = vmatprep.subr.msk.mxu1 %vm2039_vm11, %v5988_v31  ;;  %vm2012_vm11 = vcmp.eq.s32.totalorder %v5459_v54, 1 }
 0x2fd   : > { %3901 = vmatpush1.msk.msra.mxu1 %vm2038_vm0, %v5988_v31  ;;  %vm2014_vm0 = vcmp.eq.s32.totalorder %v5462_v37, 1  ;;  %3881 = vmatpush1.msk.msra.mxu0 %vm2012_vm11, %v5988_v31  ;;  %vm1868_vm11 = vcmp.eq.s32.totalorder %v5082_v60, 0 }
 0x2fe   : > { %3902 = vmatprep.subr.msk.mxu1 %vm2035_vm12, %v5988_v31  ;;  %vm2009_vm12 = vcmp.eq.s32.totalorder %v5476_v49, 1 }
 0x2ff   : > { %3903 = vmatpush1.msk.msra.mxu1 %vm2034_vm13, %v5988_v31  ;;  %vm2011_vm13 = vcmp.eq.s32.totalorder %v5479_v12, 1  ;;  %3882 = vmatprep.subr.msk.mxu0 %vm2009_vm12, %v5988_v31  ;;  %vm1865_vm12 = vcmp.eq.s32.totalorder %v5089_v63, 0 }
 0x300   : > { %3904 = vmatprep.subr.msk.mxu1 %vm2031_vm14, %v5988_v31  ;;  %vm2008_vm14 = vcmp.eq.s32.totalorder %v5482_v45, 1 }
 0x301   : > { %3905 = vmatpush1.msk.msra.mxu1 %vm2030_vm15, %v5988_v31  ;;  %vm1877_vm15 = vcmp.eq.s32.totalorder %v5052_v53, 0  ;;  %3883 = vmatpush1.msk.msra.mxu0 %vm2008_vm14, %v5988_v31  ;;  %vm1864_vm14 = vcmp.eq.s32.totalorder %v5093_v1, 0 }
 0x302   : > { %3906 = vmatprep.subr.msk.mxu1 %vm2027_vm1, %v5988_v31  ;;  %vm2010_vm1 = vcmp.eq.s32.totalorder %v5485_v33, 1  ;;  %3916 = vmatprep.subr.msk.mxu0 %vm1877_vm15, %v5988_v31  ;;  %vm1866_vm15 = vcmp.eq.s32.totalorder %v5289_v34, 0 }
 0x303   : > { %3907 = vmatpush1.msk.msra.mxu1 %vm2026_vm2, %v5988_v31  ;;  %vm1879_vm2 = vcmp.eq.s32.totalorder %v5247_v58, 0 }
 0x304   : > { %3908 = vmatprep.subr.msk.mxu1 %vm2023_vm3, %v5988_v31  ;;  %vm1876_vm3 = vcmp.eq.s32.totalorder %v5056_v0, 0 }
 0x305   : > { %3909 = vmatpush1.msk.msra.mxu1 %vm2022_vm4, %v5988_v31  ;;  %vm1878_vm4 = vcmp.eq.s32.totalorder %v5252_v30, 0 }
 0x306   : > { %3910 = vmatprep.subr.msk.mxu1 %vm2019_vm6, %v5988_v31  ;;  %vm1875_vm6 = vcmp.eq.s32.totalorder %v5256_v7, 0 }
 0x307   : > { %3911 = vmatpush1.msk.msra.mxu1 %vm2018_vm8, %v5988_v31  ;;  %vm1874_vm8 = vcmp.eq.s32.totalorder %v5261_v27, 0 }
 0x308   : > { %3912 = vmatprep.subr.msk.mxu1 %vm2015_vm10, %v5988_v31  ;;  %vm1871_vm10 = vcmp.eq.s32.totalorder %v5269_v51, 0 }
 0x309   : > { %3913 = vmatpush1.msk.msra.mxu1 %vm2014_vm0, %v5988_v31  ;;  %vm1870_vm0 = vcmp.eq.s32.totalorder %v5277_v52, 0 }
 0x30a   : > { %3914 = vmatprep.subr.msk.mxu1 %vm2011_vm13, %v5988_v31  ;;  %vm1867_vm13 = vcmp.eq.s32.totalorder %v5282_v28, 0 }
 0x30b   : > { %3915 = vmatpush1.msk.msra.mxu1 %vm2010_vm1, %v5988_v31  ;;  %vm1861_vm1 = vcmp.eq.s32.totalorder %v5112_v10, 0 }
 0x30c   : > { %3948 = vmatprep.subr.msk.mxu1 %vm1879_vm2, %v5988_v31  ;;  %vm1863_vm2 = vcmp.eq.s32.totalorder %v5299_v35, 0 }
 0x3ac   : > { %v5499_v2 = vpop.f32.mrf.mxu1 }
 0x3ae   : > { %v5501_v47 = vpop.f32.mrf.mxu1 }
 0x3b0   : > { %v4352_v32 = vpop.f32.mrf.mxu1 }
 0x3b2   : > { %v2684_v42 = vpop.f32.mrf.mxu1 }
 0x3b3   : > { %2778 = vmatmul.mubr.f32.vlgmr.msra.gmra.mxu0 %v2684_v42  ;;  %2855 = vmatmul.mubr.f32.vlgmr.msra.gmra.mxu1 %v2684_v42  ;;  %v6002_v42 = vld [vmem:[#allocation16_spill] sm:$0xff] }
 0x3b4   : > { %3917 = vmatpush1.msk.msra.mxu0 %vm1876_vm3, %v5988_v31  ;;  %3949 = vmatpush1.msk.msra.mxu1 %vm1878_vm4, %v5988_v31  ;;  %vm1860_vm3 = vcmp.eq.s32.totalorder %v5116_v11, 0  ;;  %vm1862_vm4 = vcmp.eq.s32.totalorder %v5308_v57, 0 }
 0x3b5   : > { %3918 = vmatprep.subr.msk.mxu0 %vm1873_vm5, %v5988_v31  ;;  %3950 = vmatprep.subr.msk.mxu1 %vm1875_vm6, %v5988_v31  ;;  %vm1857_vm5 = vcmp.eq.s32.totalorder %v5122_v13, 0  ;;  %vm1859_vm6 = vcmp.eq.s32.totalorder %v5314_v38, 0 }
 0x3b6   : > { %3919 = vmatpush1.msk.msra.mxu0 %vm1872_vm7, %v5988_v31  ;;  %3951 = vmatpush1.msk.msra.mxu1 %vm1874_vm8, %v5988_v31  ;;  %vm1856_vm7 = vcmp.eq.s32.totalorder %v5126_v14, 0  ;;  %vm1858_vm8 = vcmp.eq.s32.totalorder %v5321_v41, 0 }
 0x3b7   : > { %2783 = vmatprep.mubr.f32.mxu0 %v5992_v19  ;;  %2860 = vmatprep.mubr.f32.mxu1 %v5992_v19 }
 0x3b8   : > { %3920 = vmatprep.subr.msk.mxu0 %vm1869_vm9, %v5988_v31  ;;  %3952 = vmatprep.subr.msk.mxu1 %vm1871_vm10, %v5988_v31  ;;  %vm1853_vm9 = vcmp.eq.s32.totalorder %v5138_v17, 0  ;;  %vm1855_vm10 = vcmp.eq.s32.totalorder %v5331_v48, 0 }
 0x3b9   : > { %2784 = vmatmul.mubr.f32.gmra.mxu0 %v4352_v32  ;;  %2861 = vmatmul.mubr.f32.gmra.mxu1 %v4352_v32  ;;  %v6001_v32 = vld [vmem:[#allocation15_spill] sm:$0xff] }
 0x3ba   : > { %3921 = vmatpush1.msk.msra.mxu0 %vm1868_vm11, %v5988_v31  ;;  %3953 = vmatpush1.msk.msra.mxu1 %vm1870_vm0, %v5988_v31  ;;  %vm1852_vm11 = vcmp.eq.s32.totalorder %v5142_v18, 0  ;;  %vm1854_vm0 = vcmp.eq.s32.totalorder %v5340_v6, 0 }
 0x3bb   : > { %3922 = vmatprep.subr.msk.mxu0 %vm1865_vm12, %v5988_v31  ;;  %3954 = vmatprep.subr.msk.mxu1 %vm1867_vm13, %v5988_v31  ;;  %vm1849_vm12 = vcmp.eq.s32.totalorder %v5149_v21, 0  ;;  %vm1851_vm13 = vcmp.eq.s32.totalorder %v5346_v50, 0 }
 0x3bc   : > { %3923 = vmatpush1.msk.msra.mxu0 %vm1864_vm14, %v5988_v31  ;;  %3955 = vmatpush1.msk.msra.mxu1 %vm1866_vm15, %v5988_v31  ;;  %vm1848_vm14 = vcmp.eq.s32.totalorder %v5153_v22, 0  ;;  %vm1850_vm15 = vcmp.eq.s32.totalorder %v5353_v61, 0 }
 0x3bd   : > { %3924 = vmatprep.subr.msk.mxu0 %vm1861_vm1, %v5988_v31  ;;  %3956 = vmatprep.subr.msk.mxu1 %vm1863_vm2, %v5988_v31  ;;  %vm1845_vm1 = vcmp.eq.s32.totalorder %v5997_v39, 0  ;;  %vm1847_vm2 = vcmp.eq.s32.totalorder %v5363_v62, 0 }
 0x3be   : > { %3925 = vmatpush1.msk.msra.mxu0 %vm1860_vm3, %v5988_v31  ;;  %3957 = vmatpush1.msk.msra.mxu1 %vm1862_vm4, %v5988_v31  ;;  %vm1844_vm3 = vcmp.eq.s32.totalorder %v5998_v36, 0  ;;  %vm1846_vm4 = vcmp.eq.s32.totalorder %v5369_v16, 0 }
 0x3bf   : > { %3926 = vmatprep.subr.msk.mxu0 %vm1857_vm5, %v5988_v31  ;;  %3958 = vmatprep.subr.msk.mxu1 %vm1859_vm6, %v5988_v31  ;;  %vm1841_vm5 = vcmp.eq.s32.totalorder %v5999_v46, 0  ;;  %vm1843_vm6 = vcmp.eq.s32.totalorder %v5375_v3, 0 }
 0x3c0   : > { %3927 = vmatpush1.msk.msra.mxu0 %vm1856_vm7, %v5988_v31  ;;  %3959 = vmatpush1.msk.msra.mxu1 %vm1858_vm8, %v5988_v31  ;;  %vm1840_vm7 = vcmp.eq.s32.totalorder %v6000_v5, 0  ;;  %vm1842_vm8 = vcmp.eq.s32.totalorder %v5382_v4, 0  ;;  %v6003_v4 = vld [vmem:[#allocation17_spill] sm:$0xff] }
 0x3c1   : > { %3928 = vmatprep.subr.msk.mxu0 %vm1853_vm9, %v5988_v31  ;;  %3960 = vmatprep.subr.msk.mxu1 %vm1855_vm10, %v5988_v31  ;;  %vm1837_vm9 = vcmp.eq.s32.totalorder %v6001_v32, 0  ;;  %vm1839_vm10 = vcmp.eq.s32.totalorder %v5388_v25, 0  ;;  %v6004_v25 = vld [vmem:[#allocation18_spill] sm:$0xff] }
 0x3c2   : > { %3929 = vmatpush1.msk.msra.mxu0 %vm1852_vm11, %v5988_v31  ;;  %3961 = vmatpush1.msk.msra.mxu1 %vm1854_vm0, %v5988_v31  ;;  %vm1836_vm11 = vcmp.eq.s32.totalorder %v6002_v42, 0  ;;  %vm1838_vm0 = vcmp.eq.s32.totalorder %v5395_v20, 0  ;;  %v6005_v20 = vld [vmem:[#allocation19_spill] sm:$0xff] }
 0x3c3   : > { %3930 = vmatprep.subr.msk.mxu0 %vm1849_vm12, %v5988_v31  ;;  %3962 = vmatprep.subr.msk.mxu1 %vm1851_vm13, %v5988_v31  ;;  %vm1833_vm12 = vcmp.eq.s32.totalorder %v6003_v4, 0  ;;  %vm1835_vm13 = vcmp.eq.s32.totalorder %v5401_v26, 0  ;;  %v6006_v26 = vld [vmem:[#allocation20_spill] sm:$0xff] }
 0x3c4   : > { %3931 = vmatpush1.msk.msra.mxu0 %vm1848_vm14, %v5988_v31  ;;  %3963 = vmatpush1.msk.msra.mxu1 %vm1850_vm15, %v5988_v31  ;;  %vm1832_vm14 = vcmp.eq.s32.totalorder %v6004_v25, 0  ;;  %vm1834_vm15 = vcmp.eq.s32.totalorder %v5407_v23, 0 }
 0x3c5   : > { %3932 = vmatprep.subr.msk.mxu0 %vm1845_vm1, %v5988_v31  ;;  %3964 = vmatprep.subr.msk.mxu1 %vm1847_vm2, %v5988_v31  ;;  %vm1829_vm1 = vcmp.eq.s32.totalorder %v6005_v20, 0  ;;  %vm1831_vm2 = vcmp.eq.s32.totalorder %v5413_v29, 0 }
 0x3c6   : > { %3933 = vmatpush1.msk.msra.mxu0 %vm1844_vm3, %v5988_v31  ;;  %3965 = vmatpush1.msk.msra.mxu1 %vm1846_vm4, %v5988_v31  ;;  %vm1828_vm3 = vcmp.eq.s32.totalorder %v6006_v26, 0  ;;  %vm1830_vm4 = vcmp.eq.s32.totalorder %v5419_v24, 0 }
 0x3c7   : > { %3934 = vmatprep.subr.msk.mxu0 %vm1841_vm5, %v5988_v31  ;;  %3966 = vmatprep.subr.msk.mxu1 %vm1843_vm6, %v5988_v31  ;;  %vm1825_vm5 = vcmp.eq.s32.totalorder %v5435_v44, 0  ;;  %vm1827_vm6 = vcmp.eq.s32.totalorder %v5438_v43, 0 }
 0x3c8   : > { %3935 = vmatpush1.msk.msra.mxu0 %vm1840_vm7, %v5988_v31  ;;  %3967 = vmatpush1.msk.msra.mxu1 %vm1842_vm8, %v5988_v31  ;;  %vm1824_vm7 = vcmp.eq.s32.totalorder %v5441_v40, 0  ;;  %vm1826_vm8 = vcmp.eq.s32.totalorder %v5444_v8, 0 }
 0x3c9   : > { %3936 = vmatprep.subr.msk.mxu0 %vm1837_vm9, %v5988_v31  ;;  %3968 = vmatprep.subr.msk.mxu1 %vm1839_vm10, %v5988_v31  ;;  %vm1821_vm9 = vcmp.eq.s32.totalorder %v5449_v9, 0  ;;  %vm1823_vm10 = vcmp.eq.s32.totalorder %v5452_v15, 0 }
 0x3ca   : > { %3937 = vmatpush1.msk.msra.mxu0 %vm1836_vm11, %v5988_v31  ;;  %3969 = vmatpush1.msk.msra.mxu1 %vm1838_vm0, %v5988_v31  ;;  %vm1820_vm11 = vcmp.eq.s32.totalorder %v5459_v54, 0  ;;  %vm1822_vm0 = vcmp.eq.s32.totalorder %v5462_v37, 0 }
 0x3cb   : > { %3938 = vmatprep.subr.msk.mxu0 %vm1833_vm12, %v5988_v31  ;;  %3970 = vmatprep.subr.msk.mxu1 %vm1835_vm13, %v5988_v31  ;;  %vm1817_vm12 = vcmp.eq.s32.totalorder %v5476_v49, 0  ;;  %vm1819_vm13 = vcmp.eq.s32.totalorder %v5479_v12, 0 }
 0x3cc   : > { %3939 = vmatpush1.msk.msra.mxu0 %vm1832_vm14, %v5988_v31  ;;  %3971 = vmatpush1.msk.msra.mxu1 %vm1834_vm15, %v5988_v31  ;;  %vm1816_vm14 = vcmp.eq.s32.totalorder %v5482_v45, 0  ;;  %vm1818_vm15 = vcmp.eq.s32.totalorder %v5485_v33, 0 }
 0x3cd   : > { %3940 = vmatprep.subr.msk.mxu0 %vm1829_vm1, %v5988_v31  ;;  %3972 = vmatprep.subr.msk.mxu1 %vm1831_vm2, %v5988_v31  ;;  %vm2261_vm1 = vcmp.eq.s32.totalorder %v5052_v53, 2  ;;  %vm2263_vm2 = vcmp.eq.s32.totalorder %v5247_v58, 2 }
 0x3ce   : > { %3941 = vmatpush1.msk.msra.mxu0 %vm1828_vm3, %v5988_v31  ;;  %3973 = vmatpush1.msk.msra.mxu1 %vm1830_vm4, %v5988_v31  ;;  %vm2260_vm3 = vcmp.eq.s32.totalorder %v5056_v0, 2  ;;  %vm2262_vm4 = vcmp.eq.s32.totalorder %v5252_v30, 2 }
 0x3cf   : > { %3942 = vmatprep.subr.msk.mxu0 %vm1825_vm5, %v5988_v31  ;;  %3974 = vmatprep.subr.msk.mxu1 %vm1827_vm6, %v5988_v31  ;;  %vm2257_vm5 = vcmp.eq.s32.totalorder %v5062_v55, 2  ;;  %vm2259_vm6 = vcmp.eq.s32.totalorder %v5256_v7, 2 }
 0x3d0   : > { %3943 = vmatpush1.msk.msra.mxu0 %vm1824_vm7, %v5988_v31  ;;  %3975 = vmatpush1.msk.msra.mxu1 %vm1826_vm8, %v5988_v31  ;;  %vm2256_vm7 = vcmp.eq.s32.totalorder %v5066_v56, 2  ;;  %vm2258_vm8 = vcmp.eq.s32.totalorder %v5261_v27, 2 }
 0x3d1   : > { %3944 = vmatprep.subr.msk.mxu0 %vm1821_vm9, %v5988_v31  ;;  %3976 = vmatprep.subr.msk.mxu1 %vm1823_vm10, %v5988_v31  ;;  %vm2253_vm9 = vcmp.eq.s32.totalorder %v5078_v59, 2  ;;  %vm2255_vm10 = vcmp.eq.s32.totalorder %v5269_v51, 2 }
 0x3d2   : > { %3945 = vmatpush1.msk.msra.mxu0 %vm1820_vm11, %v5988_v31  ;;  %3977 = vmatpush1.msk.msra.mxu1 %vm1822_vm0, %v5988_v31  ;;  %vm2252_vm11 = vcmp.eq.s32.totalorder %v5082_v60, 2  ;;  %vm2254_vm0 = vcmp.eq.s32.totalorder %v5277_v52, 2 }
 0x3d3   : > { %3946 = vmatprep.subr.msk.mxu0 %vm1817_vm12, %v5988_v31  ;;  %3978 = vmatprep.subr.msk.mxu1 %vm1819_vm13, %v5988_v31  ;;  %vm2249_vm12 = vcmp.eq.s32.totalorder %v5089_v63, 2  ;;  %vm2251_vm13 = vcmp.eq.s32.totalorder %v5282_v28, 2 }
 0x3d4   : > { %3947 = vmatpush1.msk.msra.mxu0 %vm1816_vm14, %v5988_v31  ;;  %2931 = vmatprep.mubr.f32.mxu0 %v5992_v19  ;;  %vm2248_vm14 = vcmp.eq.s32.totalorder %v5093_v1, 2 }
 0x3d5   : > { %3979 = vmatpush1.msk.msra.mxu1 %vm1818_vm15, %v5988_v31  ;;  %3008 = vmatprep.mubr.f32.mxu1 %v5992_v19  ;;  %vm2250_vm15 = vcmp.eq.s32.totalorder %v5289_v34, 2 }
 0x3d6   : > { %2932 = vmatmul.mubr.f32.vlgmr.msra.gmra.mxu0 %v5501_v47  ;;  %3009 = vmatmul.mubr.f32.vlgmr.msra.gmra.mxu1 %v5501_v47  ;;  %v6008_v47 = vld [vmem:[#allocation23_spill] sm:$0xff] }
 0x3d7   : > { %3980 = vmatprep.subr.msk.mxu0 %vm2261_vm1, %v5988_v31  ;;  %4012 = vmatprep.subr.msk.mxu1 %vm2263_vm2, %v5988_v31  ;;  %vm2245_vm1 = vcmp.eq.s32.totalorder %v5112_v10, 2  ;;  %vm2247_vm2 = vcmp.eq.s32.totalorder %v5299_v35, 2 }
 0x3d8   : > { %3981 = vmatpush1.msk.msra.mxu0 %vm2260_vm3, %v5988_v31  ;;  %4013 = vmatpush1.msk.msra.mxu1 %vm2262_vm4, %v5988_v31  ;;  %vm2244_vm3 = vcmp.eq.s32.totalorder %v5116_v11, 2  ;;  %vm2246_vm4 = vcmp.eq.s32.totalorder %v5308_v57, 2 }
 0x3d9   : > { %3982 = vmatprep.subr.msk.mxu0 %vm2257_vm5, %v5988_v31  ;;  %4014 = vmatprep.subr.msk.mxu1 %vm2259_vm6, %v5988_v31  ;;  %vm2241_vm5 = vcmp.eq.s32.totalorder %v5122_v13, 2  ;;  %vm2243_vm6 = vcmp.eq.s32.totalorder %v5314_v38, 2 }
 0x3da   : > { %2937 = vmatprep.mubr.f32.mxu0 %v5992_v19  ;;  %3014 = vmatprep.mubr.f32.mxu1 %v5992_v19 }
 0x3db   : > { %3983 = vmatpush1.msk.msra.mxu0 %vm2256_vm7, %v5988_v31  ;;  %4015 = vmatpush1.msk.msra.mxu1 %vm2258_vm8, %v5988_v31  ;;  %vm2240_vm7 = vcmp.eq.s32.totalorder %v5126_v14, 2  ;;  %vm2242_vm8 = vcmp.eq.s32.totalorder %v5321_v41, 2 }
 0x3dc   : > { %2938 = vmatmul.mubr.f32.gmra.mxu0 %v5499_v2  ;;  %3015 = vmatmul.mubr.f32.gmra.mxu1 %v5499_v2  ;;  %v6007_v2 = vld [vmem:[#allocation22_spill] sm:$0xff] }
 0x3dd   : > { %3984 = vmatprep.subr.msk.mxu0 %vm2253_vm9, %v5988_v31  ;;  %4016 = vmatprep.subr.msk.mxu1 %vm2255_vm10, %v5988_v31  ;;  %vm2237_vm9 = vcmp.eq.s32.totalorder %v5138_v17, 2  ;;  %vm2239_vm10 = vcmp.eq.s32.totalorder %v5331_v48, 2 }
 0x3de   : > { %3985 = vmatpush1.msk.msra.mxu0 %vm2252_vm11, %v5988_v31  ;;  %4017 = vmatpush1.msk.msra.mxu1 %vm2254_vm0, %v5988_v31  ;;  %vm2236_vm11 = vcmp.eq.s32.totalorder %v5142_v18, 2  ;;  %vm2238_vm0 = vcmp.eq.s32.totalorder %v5340_v6, 2 }
 0x3df   : > { %3986 = vmatprep.subr.msk.mxu0 %vm2249_vm12, %v5988_v31  ;;  %4018 = vmatprep.subr.msk.mxu1 %vm2251_vm13, %v5988_v31  ;;  %vm2233_vm12 = vcmp.eq.s32.totalorder %v5149_v21, 2  ;;  %vm2235_vm13 = vcmp.eq.s32.totalorder %v5346_v50, 2 }
 0x3e0   : > { %3987 = vmatpush1.msk.msra.mxu0 %vm2248_vm14, %v5988_v31  ;;  %4019 = vmatpush1.msk.msra.mxu1 %vm2250_vm15, %v5988_v31  ;;  %vm2232_vm14 = vcmp.eq.s32.totalorder %v5153_v22, 2  ;;  %vm2234_vm15 = vcmp.eq.s32.totalorder %v5353_v61, 2 }
 0x3e1   : > { %3988 = vmatprep.subr.msk.mxu0 %vm2245_vm1, %v5988_v31  ;;  %4020 = vmatprep.subr.msk.mxu1 %vm2247_vm2, %v5988_v31  ;;  %vm2229_vm1 = vcmp.eq.s32.totalorder %v5997_v39, 2  ;;  %vm2231_vm2 = vcmp.eq.s32.totalorder %v5363_v62, 2 }
 0x3e2   : > { %3989 = vmatpush1.msk.msra.mxu0 %vm2244_vm3, %v5988_v31  ;;  %4021 = vmatpush1.msk.msra.mxu1 %vm2246_vm4, %v5988_v31  ;;  %vm2228_vm3 = vcmp.eq.s32.totalorder %v5998_v36, 2  ;;  %vm2230_vm4 = vcmp.eq.s32.totalorder %v5369_v16, 2 }
 0x3e3   : > { %3990 = vmatprep.subr.msk.mxu0 %vm2241_vm5, %v5988_v31  ;;  %4022 = vmatprep.subr.msk.mxu1 %vm2243_vm6, %v5988_v31  ;;  %vm2225_vm5 = vcmp.eq.s32.totalorder %v5999_v46, 2  ;;  %vm2227_vm6 = vcmp.eq.s32.totalorder %v5375_v3, 2  ;;  %v6009_v3 = vld [vmem:[#allocation24_spill] sm:$0xff] }
 0x3e4   : > { %3991 = vmatpush1.msk.msra.mxu0 %vm2240_vm7, %v5988_v31  ;;  %4023 = vmatpush1.msk.msra.mxu1 %vm2242_vm8, %v5988_v31  ;;  %vm2224_vm7 = vcmp.eq.s32.totalorder %v6000_v5, 2  ;;  %vm2226_vm8 = vcmp.eq.s32.totalorder %v6007_v2, 2  ;;  %v6010_v2 = vld [vmem:[#allocation25_spill] sm:$0xff] }
 0x3e5   : > { %3992 = vmatprep.subr.msk.mxu0 %vm2237_vm9, %v5988_v31  ;;  %4024 = vmatprep.subr.msk.mxu1 %vm2239_vm10, %v5988_v31  ;;  %vm2221_vm9 = vcmp.eq.s32.totalorder %v6001_v32, 2  ;;  %vm2223_vm10 = vcmp.eq.s32.totalorder %v6008_v47, 2 }
 0x3e6   : > { %3993 = vmatpush1.msk.msra.mxu0 %vm2236_vm11, %v5988_v31  ;;  %4025 = vmatpush1.msk.msra.mxu1 %vm2238_vm0, %v5988_v31  ;;  %vm2220_vm11 = vcmp.eq.s32.totalorder %v6002_v42, 2  ;;  %vm2222_vm0 = vcmp.eq.s32.totalorder %v6009_v3, 2 }
 0x3e7   : > { %3994 = vmatprep.subr.msk.mxu0 %vm2233_vm12, %v5988_v31  ;;  %4026 = vmatprep.subr.msk.mxu1 %vm2235_vm13, %v5988_v31  ;;  %vm2217_vm12 = vcmp.eq.s32.totalorder %v6003_v4, 2  ;;  %vm2219_vm13 = vcmp.eq.s32.totalorder %v6010_v2, 2 }
 0x3e8   : > { %3995 = vmatpush1.msk.msra.mxu0 %vm2232_vm14, %v5988_v31  ;;  %4027 = vmatpush1.msk.msra.mxu1 %vm2234_vm15, %v5988_v31  ;;  %vm2216_vm14 = vcmp.eq.s32.totalorder %v6004_v25, 2  ;;  %vm2218_vm15 = vcmp.eq.s32.totalorder %v5407_v23, 2 }
 0x3e9   : > { %3996 = vmatprep.subr.msk.mxu0 %vm2229_vm1, %v5988_v31  ;;  %4028 = vmatprep.subr.msk.mxu1 %vm2231_vm2, %v5988_v31  ;;  %vm2213_vm1 = vcmp.eq.s32.totalorder %v6005_v20, 2  ;;  %vm2215_vm2 = vcmp.eq.s32.totalorder %v5413_v29, 2 }
 0x3ea   : > { %3997 = vmatpush1.msk.msra.mxu0 %vm2228_vm3, %v5988_v31  ;;  %4029 = vmatpush1.msk.msra.mxu1 %vm2230_vm4, %v5988_v31  ;;  %vm2212_vm3 = vcmp.eq.s32.totalorder %v6006_v26, 2  ;;  %vm2214_vm4 = vcmp.eq.s32.totalorder %v5419_v24, 2 }
 0x3eb   : > { %3998 = vmatprep.subr.msk.mxu0 %vm2225_vm5, %v5988_v31  ;;  %4030 = vmatprep.subr.msk.mxu1 %vm2227_vm6, %v5988_v31  ;;  %vm2209_vm5 = vcmp.eq.s32.totalorder %v5435_v44, 2  ;;  %vm2211_vm6 = vcmp.eq.s32.totalorder %v5438_v43, 2  ;;  %v4355_v43 = vpop.f32.mrf.mxu1 }
 0x3ec   : > { %3999 = vmatpush1.msk.msra.mxu0 %vm2224_vm7, %v5988_v31  ;;  %4031 = vmatpush1.msk.msra.mxu1 %vm2226_vm8, %v5988_v31  ;;  %vm2208_vm7 = vcmp.eq.s32.totalorder %v5441_v40, 2  ;;  %vm2210_vm8 = vcmp.eq.s32.totalorder %v5444_v8, 2 }
 0x3ed   : > { %4000 = vmatprep.subr.msk.mxu0 %vm2221_vm9, %v5988_v31  ;;  %4032 = vmatprep.subr.msk.mxu1 %vm2223_vm10, %v5988_v31  ;;  %vm2205_vm9 = vcmp.eq.s32.totalorder %v5449_v9, 2  ;;  %vm2207_vm10 = vcmp.eq.s32.totalorder %v5452_v15, 2 }
 0x3ee   : > { %4001 = vmatpush1.msk.msra.mxu0 %vm2220_vm11, %v5988_v31  ;;  %4033 = vmatpush1.msk.msra.mxu1 %vm2222_vm0, %v5988_v31  ;;  %vm2204_vm11 = vcmp.eq.s32.totalorder %v5459_v54, 2  ;;  %vm2206_vm0 = vcmp.eq.s32.totalorder %v5462_v37, 2  ;;  %v2694_v37 = vpop.f32.mrf.mxu1 }
 0x3ef   : > { %4002 = vmatprep.subr.msk.mxu0 %vm2217_vm12, %v5988_v31  ;;  %4034 = vmatprep.subr.msk.mxu1 %vm2219_vm13, %v5988_v31  ;;  %vm2201_vm12 = vcmp.eq.s32.totalorder %v5476_v49, 2  ;;  %vm2203_vm13 = vcmp.eq.s32.totalorder %v5479_v12, 2 }
 0x3f0   : > { %4003 = vmatpush1.msk.msra.mxu0 %vm2216_vm14, %v5988_v31  ;;  %4035 = vmatpush1.msk.msra.mxu1 %vm2218_vm15, %v5988_v31  ;;  %vm2200_vm14 = vcmp.eq.s32.totalorder %v5482_v45, 2  ;;  %vm2202_vm15 = vcmp.eq.s32.totalorder %v5485_v33, 2 }
 0x3f1   : > { %4004 = vmatprep.subr.msk.mxu0 %vm2213_vm1, %v5988_v31  ;;  %4036 = vmatprep.subr.msk.mxu1 %vm2215_vm2, %v5988_v31  ;;  %vm2453_vm1 = vcmp.eq.s32.totalorder %v5052_v53, 3  ;;  %vm2455_vm2 = vcmp.eq.s32.totalorder %v5247_v58, 3  ;;  %v6011_v53 = vld [vmem:[#allocation21_spill] sm:$0xff] }
 0x3f2   : > { %4005 = vmatpush1.msk.msra.mxu0 %vm2212_vm3, %v5988_v31  ;;  %4037 = vmatpush1.msk.msra.mxu1 %vm2214_vm4, %v5988_v31  ;;  %vm2452_vm3 = vcmp.eq.s32.totalorder %v5056_v0, 3  ;;  %vm2454_vm4 = vcmp.eq.s32.totalorder %v5252_v30, 3  ;;  %v6012_v0 = vld [vmem:[#allocation22_spill] sm:$0xff] }
 0x3f3   : > { %4006 = vmatprep.subr.msk.mxu0 %vm2209_vm5, %v5988_v31  ;;  %4038 = vmatprep.subr.msk.mxu1 %vm2211_vm6, %v5988_v31  ;;  %vm2449_vm5 = vcmp.eq.s32.totalorder %v5062_v55, 3  ;;  %vm2451_vm6 = vcmp.eq.s32.totalorder %v5256_v7, 3  ;;  %v6013_v55 = vld [vmem:[#allocation26_spill] sm:$0xff] }
 0x3f4   : > { %4007 = vmatpush1.msk.msra.mxu0 %vm2208_vm7, %v5988_v31  ;;  %4039 = vmatpush1.msk.msra.mxu1 %vm2210_vm8, %v5988_v31  ;;  %vm2448_vm7 = vcmp.eq.s32.totalorder %v5066_v56, 3  ;;  %vm2450_vm8 = vcmp.eq.s32.totalorder %v5261_v27, 3  ;;  %v6014_v56 = vld [vmem:[#allocation27_spill] sm:$0xff] }
 0x3f5   : > { %4008 = vmatprep.subr.msk.mxu0 %vm2205_vm9, %v5988_v31  ;;  %4040 = vmatprep.subr.msk.mxu1 %vm2207_vm10, %v5988_v31  ;;  %vm2445_vm9 = vcmp.eq.s32.totalorder %v5078_v59, 3  ;;  %vm2447_vm10 = vcmp.eq.s32.totalorder %v5269_v51, 3  ;;  %v4358_v59 = vpop.f32.mrf.mxu1 }
 0x3f6   : > { %4009 = vmatpush1.msk.msra.mxu0 %vm2204_vm11, %v5988_v31  ;;  %4041 = vmatpush1.msk.msra.mxu1 %vm2206_vm0, %v5988_v31  ;;  %vm2444_vm11 = vcmp.eq.s32.totalorder %v5082_v60, 3  ;;  %vm2446_vm0 = vcmp.eq.s32.totalorder %v5277_v52, 3 }
 0x3f7   : > { %4010 = vmatprep.subr.msk.mxu0 %vm2201_vm12, %v5988_v31  ;;  %4042 = vmatprep.subr.msk.mxu1 %vm2203_vm13, %v5988_v31  ;;  %vm2441_vm12 = vcmp.eq.s32.totalorder %v5089_v63, 3  ;;  %vm2443_vm13 = vcmp.eq.s32.totalorder %v5282_v28, 3  ;;  %v2704_v60 = vpop.f32.mrf.mxu1 }
 0x3f8   : > { %4011 = vmatpush1.msk.msra.mxu0 %vm2200_vm14, %v5988_v31  ;;  %3085 = vmatprep.mubr.f32.mxu0 %v5992_v19  ;;  %vm2440_vm14 = vcmp.eq.s32.totalorder %v5093_v1, 3 }
 0x3f9   : > { %4043 = vmatpush1.msk.msra.mxu1 %vm2202_vm15, %v5988_v31  ;;  %3162 = vmatprep.mubr.f32.mxu1 %v5992_v19  ;;  %vm2442_vm15 = vcmp.eq.s32.totalorder %v5289_v34, 3 }
 0x3fa   : > { %3086 = vmatmul.mubr.f32.vlgmr.msra.gmra.mxu0 %v2694_v37  ;;  %3163 = vmatmul.mubr.f32.vlgmr.msra.gmra.mxu1 %v2694_v37 }
 0x3fb   : > { %4044 = vmatprep.subr.msk.mxu0 %vm2453_vm1, %v5988_v31  ;;  %4076 = vmatprep.subr.msk.mxu1 %vm2455_vm2, %v5988_v31  ;;  %vm2437_vm1 = vcmp.eq.s32.totalorder %v5112_v10, 3  ;;  %vm2439_vm2 = vcmp.eq.s32.totalorder %v5299_v35, 3 }
 0x3fc   : > { %4045 = vmatpush1.msk.msra.mxu0 %vm2452_vm3, %v5988_v31  ;;  %4077 = vmatpush1.msk.msra.mxu1 %vm2454_vm4, %v5988_v31  ;;  %vm2436_vm3 = vcmp.eq.s32.totalorder %v5116_v11, 3  ;;  %vm2438_vm4 = vcmp.eq.s32.totalorder %v5308_v57, 3 }
 0x3fd   : > { %4046 = vmatprep.subr.msk.mxu0 %vm2449_vm5, %v5988_v31  ;;  %4078 = vmatprep.subr.msk.mxu1 %vm2451_vm6, %v5988_v31  ;;  %vm2433_vm5 = vcmp.eq.s32.totalorder %v5122_v13, 3  ;;  %vm2435_vm6 = vcmp.eq.s32.totalorder %v5314_v38, 3 }
 0x3fe   : > { %3091 = vmatprep.mubr.f32.mxu0 %v5992_v19  ;;  %3168 = vmatprep.mubr.f32.mxu1 %v5992_v19 }
 0x3ff   : > { %4047 = vmatpush1.msk.msra.mxu0 %vm2448_vm7, %v5988_v31  ;;  %4079 = vmatpush1.msk.msra.mxu1 %vm2450_vm8, %v5988_v31  ;;  %vm2432_vm7 = vcmp.eq.s32.totalorder %v5126_v14, 3  ;;  %vm2434_vm8 = vcmp.eq.s32.totalorder %v5321_v41, 3 }
 0x400   : > { %3092 = vmatmul.mubr.f32.gmra.mxu0 %v4355_v43  ;;  %3169 = vmatmul.mubr.f32.gmra.mxu1 %v4355_v43 }
 0x401   : > { %4048 = vmatprep.subr.msk.mxu0 %vm2445_vm9, %v5988_v31  ;;  %4080 = vmatprep.subr.msk.mxu1 %vm2447_vm10, %v5988_v31  ;;  %vm2429_vm9 = vcmp.eq.s32.totalorder %v5138_v17, 3  ;;  %vm2431_vm10 = vcmp.eq.s32.totalorder %v5331_v48, 3 }
 0x402   : > { %4049 = vmatpush1.msk.msra.mxu0 %vm2444_vm11, %v5988_v31  ;;  %4081 = vmatpush1.msk.msra.mxu1 %vm2446_vm0, %v5988_v31  ;;  %vm2428_vm11 = vcmp.eq.s32.totalorder %v5142_v18, 3  ;;  %vm2430_vm0 = vcmp.eq.s32.totalorder %v5340_v6, 3 }
 0x403   : > { %4050 = vmatprep.subr.msk.mxu0 %vm2441_vm12, %v5988_v31  ;;  %4082 = vmatprep.subr.msk.mxu1 %vm2443_vm13, %v5988_v31  ;;  %vm2425_vm12 = vcmp.eq.s32.totalorder %v5149_v21, 3  ;;  %vm2427_vm13 = vcmp.eq.s32.totalorder %v5346_v50, 3 }
 0x404   : > { %4051 = vmatpush1.msk.msra.mxu0 %vm2440_vm14, %v5988_v31  ;;  %4083 = vmatpush1.msk.msra.mxu1 %vm2442_vm15, %v5988_v31  ;;  %vm2424_vm14 = vcmp.eq.s32.totalorder %v5153_v22, 3  ;;  %vm2426_vm15 = vcmp.eq.s32.totalorder %v5353_v61, 3 }
 0x405   : > { %4052 = vmatprep.subr.msk.mxu0 %vm2437_vm1, %v5988_v31  ;;  %4084 = vmatprep.subr.msk.mxu1 %vm2439_vm2, %v5988_v31  ;;  %vm2421_vm1 = vcmp.eq.s32.totalorder %v5997_v39, 3  ;;  %vm2423_vm2 = vcmp.eq.s32.totalorder %v5363_v62, 3 }
 0x406   : > { %4053 = vmatpush1.msk.msra.mxu0 %vm2436_vm3, %v5988_v31  ;;  %4085 = vmatpush1.msk.msra.mxu1 %vm2438_vm4, %v5988_v31  ;;  %vm2420_vm3 = vcmp.eq.s32.totalorder %v5998_v36, 3  ;;  %vm2422_vm4 = vcmp.eq.s32.totalorder %v5369_v16, 3 }
 0x407   : > { %4054 = vmatprep.subr.msk.mxu0 %vm2433_vm5, %v5988_v31  ;;  %4086 = vmatprep.subr.msk.mxu1 %vm2435_vm6, %v5988_v31  ;;  %vm2417_vm5 = vcmp.eq.s32.totalorder %v5999_v46, 3  ;;  %vm2419_vm6 = vcmp.eq.s32.totalorder %v6011_v53, 3 }
 0x408   : > { %4055 = vmatpush1.msk.msra.mxu0 %vm2432_vm7, %v5988_v31  ;;  %4087 = vmatpush1.msk.msra.mxu1 %vm2434_vm8, %v5988_v31  ;;  %vm2416_vm7 = vcmp.eq.s32.totalorder %v6000_v5, 3  ;;  %vm2418_vm8 = vcmp.eq.s32.totalorder %v6012_v0, 3  ;;  %v3353_v5 = vpop.permute.xlu0 %3352 }
 0x409   : > { %4056 = vmatprep.subr.msk.mxu0 %vm2429_vm9, %v5988_v31  ;;  %4088 = vmatprep.subr.msk.mxu1 %vm2431_vm10, %v5988_v31  ;;  %vm2413_vm9 = vcmp.eq.s32.totalorder %v6001_v32, 3  ;;  %vm2415_vm10 = vcmp.eq.s32.totalorder %v6008_v47, 3 }
 0x40a   : > { %4057 = vmatpush1.msk.msra.mxu0 %vm2428_vm11, %v5988_v31  ;;  %4089 = vmatpush1.msk.msra.mxu1 %vm2430_vm0, %v5988_v31  ;;  %vm2412_vm11 = vcmp.eq.s32.totalorder %v6002_v42, 3  ;;  %vm2414_vm0 = vcmp.eq.s32.totalorder %v6009_v3, 3 }
 0x40b   : > { %4058 = vmatprep.subr.msk.mxu0 %vm2425_vm12, %v5988_v31  ;;  %4090 = vmatprep.subr.msk.mxu1 %vm2427_vm13, %v5988_v31  ;;  %vm2409_vm12 = vcmp.eq.s32.totalorder %v6003_v4, 3  ;;  %vm2411_vm13 = vcmp.eq.s32.totalorder %v6010_v2, 3 }
 0x40c   : > { %4059 = vmatpush1.msk.msra.mxu0 %vm2424_vm14, %v5988_v31  ;;  %4091 = vmatpush1.msk.msra.mxu1 %vm2426_vm15, %v5988_v31  ;;  %vm2408_vm14 = vcmp.eq.s32.totalorder %v6004_v25, 3  ;;  %vm2410_vm15 = vcmp.eq.s32.totalorder %v5407_v23, 3 }
 0x40d   : > { %4060 = vmatprep.subr.msk.mxu0 %vm2421_vm1, %v5988_v31  ;;  %4092 = vmatprep.subr.msk.mxu1 %vm2423_vm2, %v5988_v31  ;;  %vm2405_vm1 = vcmp.eq.s32.totalorder %v6005_v20, 3  ;;  %vm2407_vm2 = vcmp.eq.s32.totalorder %v5413_v29, 3 }
 0x40e   : > { %4061 = vmatpush1.msk.msra.mxu0 %vm2420_vm3, %v5988_v31  ;;  %4093 = vmatpush1.msk.msra.mxu1 %vm2422_vm4, %v5988_v31  ;;  %vm2404_vm3 = vcmp.eq.s32.totalorder %v6006_v26, 3  ;;  %vm2406_vm4 = vcmp.eq.s32.totalorder %v5419_v24, 3  ;;  %v3348_v26 = vpop.permute.xlu1 %3347 }
 0x40f   : > { %4062 = vmatprep.subr.msk.mxu0 %vm2417_vm5, %v5988_v31  ;;  %4094 = vmatprep.subr.msk.mxu1 %vm2419_vm6, %v5988_v31  ;;  %vm2401_vm5 = vcmp.eq.s32.totalorder %v5435_v44, 3  ;;  %vm2403_vm6 = vcmp.eq.s32.totalorder %v6013_v55, 3 }
 0x410   : > { %4063 = vmatpush1.msk.msra.mxu0 %vm2416_vm7, %v5988_v31  ;;  %4095 = vmatpush1.msk.msra.mxu1 %vm2418_vm8, %v5988_v31  ;;  %vm2400_vm7 = vcmp.eq.s32.totalorder %v5441_v40, 3  ;;  %vm2402_vm8 = vcmp.eq.s32.totalorder %v5444_v8, 3 }
 0x411   : > { %4064 = vmatprep.subr.msk.mxu0 %vm2413_vm9, %v5988_v31  ;;  %4096 = vmatprep.subr.msk.mxu1 %vm2415_vm10, %v5988_v31  ;;  %vm2397_vm9 = vcmp.eq.s32.totalorder %v5449_v9, 3  ;;  %vm2399_vm10 = vcmp.eq.s32.totalorder %v5452_v15, 3 }
 0x412   : > { %4065 = vmatpush1.msk.msra.mxu0 %vm2412_vm11, %v5988_v31  ;;  %4097 = vmatpush1.msk.msra.mxu1 %vm2414_vm0, %v5988_v31  ;;  %vm2396_vm11 = vcmp.eq.s32.totalorder %v5459_v54, 3  ;;  %vm2398_vm0 = vcmp.eq.s32.totalorder %v6014_v56, 3 }
 0x413   : > { %4066 = vmatprep.subr.msk.mxu0 %vm2409_vm12, %v5988_v31  ;;  %4098 = vmatprep.subr.msk.mxu1 %vm2411_vm13, %v5988_v31  ;;  %vm2393_vm12 = vcmp.eq.s32.totalorder %v5476_v49, 3  ;;  %vm2395_vm13 = vcmp.eq.s32.totalorder %v5479_v12, 3 }
 0x414   : > { %4067 = vmatpush1.msk.msra.mxu0 %vm2408_vm14, %v5988_v31  ;;  %4099 = vmatpush1.msk.msra.mxu1 %vm2410_vm15, %v5988_v31  ;;  %vm2392_vm14 = vcmp.eq.s32.totalorder %v5482_v45, 3  ;;  %vm2394_vm15 = vcmp.eq.s32.totalorder %v5485_v33, 3 }
 0x415   : > { %4068 = vmatprep.subr.msk.mxu0 %vm2405_vm1, %v5988_v31  ;;  %4100 = vmatprep.subr.msk.mxu1 %vm2407_vm2, %v5988_v31 }
 0x416   : > { %4069 = vmatpush1.msk.msra.mxu0 %vm2404_vm3, %v5988_v31  ;;  %4101 = vmatpush1.msk.msra.mxu1 %vm2406_vm4, %v5988_v31 }
 0x417   : > { %4070 = vmatprep.subr.msk.mxu0 %vm2401_vm5, %v5988_v31  ;;  %4102 = vmatprep.subr.msk.mxu1 %vm2403_vm6, %v5988_v31 }
 0x418   : > { %4071 = vmatpush1.msk.msra.mxu0 %vm2400_vm7, %v5988_v31  ;;  %4103 = vmatpush1.msk.msra.mxu1 %vm2402_vm8, %v5988_v31 }
 0x419   : > { %4072 = vmatprep.subr.msk.mxu0 %vm2397_vm9, %v5988_v31  ;;  %4104 = vmatprep.subr.msk.mxu1 %vm2399_vm10, %v5988_v31 }
 0x41a   : > { %4073 = vmatpush1.msk.msra.mxu0 %vm2396_vm11, %v5988_v31  ;;  %4105 = vmatpush1.msk.msra.mxu1 %vm2398_vm0, %v5988_v31 }
 0x41b   : > { %4074 = vmatprep.subr.msk.mxu0 %vm2393_vm12, %v5988_v31  ;;  %4106 = vmatprep.subr.msk.mxu1 %vm2395_vm13, %v5988_v31 }
 0x41c   : > { %4075 = vmatpush1.msk.msra.mxu0 %vm2392_vm14, %v5988_v31  ;;  %3247 = vmatprep.mubr.f32.mxu0 %v5992_v19 }
 0x41d   : > { %4107 = vmatpush1.msk.msra.mxu1 %vm2394_vm15, %v5988_v31  ;;  %3324 = vmatprep.mubr.f32.mxu1 %v5992_v19 }
 0x41e   : > { %3248 = vmatmul.mubr.f32.vlgmr.msra.gmra.mxu0 %v2704_v60  ;;  %3325 = vmatmul.mubr.f32.vlgmr.msra.gmra.mxu1 %v2704_v60 }
 0x41f   : > { %3253 = vmatprep.mubr.f32.mxu0 %v5992_v19  ;;  %3330 = vmatprep.mubr.f32.mxu1 %v5992_v19 }
 0x422   : > { %3254 = vmatmul.mubr.f32.gmra.mxu0 %v4358_v59  ;;  %3331 = vmatmul.mubr.f32.gmra.mxu1 %v4358_v59 }
 0x473   : > { %v2779_v63 = vpop.f32.mrf.mxu0  ;;  %v2856_v1 = vpop.f32.mrf.mxu1 }
 0x475   : > { %v2781_v10 = vpop.f32.mrf.mxu0  ;;  %v2858_v11 = vpop.f32.mrf.mxu1 }
 0x479   : > { %v2785_v13 = vpop.f32.mrf.mxu0  ;;  %v2862_v14 = vpop.f32.mrf.mxu1 }
 0x47b   : > { %v2787_v17 = vpop.f32.mrf.mxu0  ;;  %v2864_v18 = vpop.f32.mrf.mxu1 }
 0x496   : > { %v2933_v21 = vpop.f32.mrf.mxu0  ;;  %v3010_v22 = vpop.f32.mrf.mxu1 }
 0x497   : > { %v2934_v41 = vadd.f32 %v2933_v21, %v2779_v63  ;;  %v3011_v48 = vadd.f32 %v3010_v22, %v2856_v1 }
 0x498   : > { %v2935_v58 = vpop.f32.mrf.mxu0  ;;  %v3012_v30 = vpop.f32.mrf.mxu1 }
 0x499   : > { %v2936_v61 = vadd.f32 %v2935_v58, %v2781_v10  ;;  %v3013_v62 = vadd.f32 %v3012_v30, %v2858_v11 }
 0x49c   : > { %v2939_v7 = vpop.f32.mrf.mxu0  ;;  %v3016_v27 = vpop.f32.mrf.mxu1 }
 0x49d   : > { %v2940_v4 = vadd.f32 %v2939_v7, %v2785_v13  ;;  %v3017_v25 = vadd.f32 %v3016_v27, %v2862_v14 }
 0x49e   : > { %v2941_v51 = vpop.f32.mrf.mxu0  ;;  %v3018_v52 = vpop.f32.mrf.mxu1 }
 0x49f   : > { %v2942_v43 = vadd.f32 %v2941_v51, %v2787_v17  ;;  %v3019_v40 = vadd.f32 %v3018_v52, %v2864_v18 }
 0x4ba   : > { %v3087_v28 = vpop.f32.mrf.mxu0  ;;  %v3164_v31 = vpop.f32.mrf.mxu1 }
 0x4bb   : > { %v3175_v16 = vadd.f32 %v3087_v28, %v2934_v41  ;;  %v3177_v3 = vadd.f32 %v3164_v31, %v3011_v48 }
 0x4bc   : > { %v3089_v34 = vpop.f32.mrf.mxu0  ;;  %v3166_v35 = vpop.f32.mrf.mxu1 }
 0x4bd   : > { %v3176_v23 = vadd.f32 %v3089_v34, %v2936_v61  ;;  %v3178_v29 = vadd.f32 %v3166_v35, %v3013_v62 }
 0x4c0   : > { %v3093_v57 = vpop.f32.mrf.mxu0  ;;  %v3170_v38 = vpop.f32.mrf.mxu1 }
 0x4c1   : > { %v3179_v8 = vadd.f32 %v3093_v57, %v2940_v4  ;;  %v3181_v9 = vadd.f32 %v3170_v38, %v3017_v25 }
 0x4c2   : > { %v3095_v6 = vpop.f32.mrf.mxu0  ;;  %v3172_v50 = vpop.f32.mrf.mxu1 }
 0x4c3   : > { %v3180_v33 = vadd.f32 %v3095_v6, %v2942_v43  ;;  %v3182_v39 = vadd.f32 %v3172_v50, %v3019_v40 }
 0x4de   : > { %v3249_v19 = vpop.f32.mrf.mxu0  ;;  %v3326_v20 = vpop.f32.mrf.mxu1 }
 0x4df   : > { %v3337_v24 = vadd.f32 %v3249_v19, %v3175_v16  ;;  %v3339_v44 = vadd.f32 %v3326_v20, %v3177_v3 }
 0x4e0   : > { %v3251_v15 = vpop.f32.mrf.mxu0  ;;  %v3328_v54 = vpop.f32.mrf.mxu1 }
 0x4e1   : > { %v3355_v37 = vadd.f32 %v3348_v26, %v3337_v24  ;;  %v3357_v49 = vadd.f32 %v3348_v26, %v3339_v44  ;;  %v3338_v12 = vadd.f32 %v3251_v15, %v3176_v23  ;;  %v3340_v45 = vadd.f32 %v3328_v54, %v3178_v29 }
 0x4e2   : > { %v3255_v36 = vpop.f32.mrf.mxu0  ;;  %v3332_v46 = vpop.f32.mrf.mxu1 }
 0x4e3   : > { %3363 = vst [vmem:[%s5905_s23] sm:$0xff] %v3355_v37  ;;  %3365 = vst [vmem:[%s5905_s23 + $0x10] sm:$0xff] %v3357_v49  ;;  %v3356_v32 = vadd.f32 %v3348_v26, %v3338_v12  ;;  %v3358_v42 = vadd.f32 %v3348_v26, %v3340_v45  ;;  %v3341_v2 = vadd.f32 %v3255_v36, %v3179_v8 }
 0x4e4   : > { %v3343_v47 = vadd.f32 %v3332_v46, %v3181_v9  ;;  %v3257_v53 = vpop.f32.mrf.mxu0  ;;  %v3334_v0 = vpop.f32.mrf.mxu1 }
 0x4e5   : > { %3364 = vst [vmem:[%s5905_s23 + $0x8] sm:$0xff] %v3356_v32  ;;  %3366 = vst [vmem:[%s5905_s23 + $0x18] sm:$0xff] %v3358_v42  ;;  %v3359_v55 = vadd.f32 %v3353_v5, %v3341_v2  ;;  %v3342_v59 = vadd.f32 %v3257_v53, %v3180_v33  ;;  %v3344_v60 = vadd.f32 %v3334_v0, %v3182_v39 }
 0x4e6   : > { %v3361_v56 = vadd.f32 %v3353_v5, %v3343_v47 }
 0x4e7   : > { %3367 = vst [vmem:[%s5905_s23 + $0x20] sm:$0xff] %v3359_v55  ;;  %v3360_v63 = vadd.f32 %v3353_v5, %v3342_v59  ;;  %v3362_v1 = vadd.f32 %v3353_v5, %v3344_v60 }
 0x4e8   : > { %3369 = vst [vmem:[%s5905_s23 + $0x30] sm:$0xff] %v3361_v56 }
 0x4e9   : > { %3368 = vst [vmem:[%s5905_s23 + $0x28] sm:$0xff] %v3360_v63  ;;  %3370 = vst [vmem:[%s5905_s23 + $0x38] sm:$0xff] %v3362_v1 }
 0x4ea PF: > { %s21_s29 = sadd.s32 1, %s4544_s29   ;;  %s6015_s27 = smov %s4540_s28 }
 0x4eb   : > { %p18_p4 = scmp.ge.s32.totalorder %s21_s29, 4   ;;  %s6016_s28 = smov %s6018_s9 }
 0x4ed   :  { %20 = sbr.rel (!%p18_p4) target bundleno = 4 (0x4), region = 100 }
 0x4f2   :  { %3401 = vsyncpa [#allocation3], 1 }
 0x4f3   :  { %3403 = vsyncpa [#allocation3 + $0x1], 1 }
 0x4f4   :  { %3404 = vsyncpa [#allocation6], 1 }
 0x4f5   :  { %3405 = vsyncpa [#allocation4], 1 }
 0x4f6   :  { %3407 = vsyncpa [#allocation4 + $0x1], 1 }

</bundles_post_ra>
